<compile_context>
chip_gen: v5e
topology: v5e:2x2
jax: 0.10.0
libtpu: 0.0.40
codegen_flags: <defaults>
</compile_context>

<pallas_src>
import jax
import jax.numpy as jnp
import numpy as np
from jax.experimental import pallas as pl
from jax.experimental.pallas import tpu as pltpu

BATCH_BLOCK = 128   # MXU rows per grid step (128 fills v5e; use 256 on v6e/v7x)


# ----------------------------------------------------------------------------
# Fused kernel: whole network for a block of B samples, everything in VMEM.
# ----------------------------------------------------------------------------
def _lenet_fused_kernel(x_ref, B1_ref, b1_ref, B2_ref, b2_ref,
                        W1_ref, c1_ref, W2_ref, c2_ref, W3_ref, c3_ref,
                        o_ref, p1_ref, p2_ref):
    f32 = jnp.float32

    def conv_relu_pool(src_ref, w_ref, b_ref, dst_ref, n_out_rows):
        # Pooled output row r needs the 4 pooling taps (dr, dm) in {0,1}^2.
        # dm is fused into the weight's 256 output lanes (two 128-lane halves);
        # dr picks the input row offset.  tap(dr) = sum_i src[2r+dr+i] @ w[i].
        @pl.loop(0, n_out_rows)
        def _(r):
            best = None
            for dr in range(2):
                acc = None
                for i in range(5):
                    mm = jnp.dot(src_ref[2 * r + dr + i], w_ref[i],
                                 preferred_element_type=f32)      # (B, 256)
                    acc = mm if acc is None else acc + mm
                tap = jnp.maximum(acc[:, :128], acc[:, 128:])     # max over dm
                best = tap if best is None else jnp.maximum(best, tap)
            dst_ref[r] = jnp.maximum(best + b_ref[...], 0.0).astype(dst_ref.dtype)

    # conv1 (5x5, 3->6) + ReLU + 2x2 pool : x (32, B, 96) -> p1 (14, B, 128)
    conv_relu_pool(x_ref, B1_ref, b1_ref, p1_ref, 14)
    # conv2 (5x5, 6->16) + ReLU + 2x2 pool: p1 -> p2 (5, B, 128)
    conv_relu_pool(p1_ref, B2_ref, b2_ref, p2_ref, 5)

    # ---- fc1 (400->120) as a single K=640 GEMM (padded lanes are zero) ----
    flat = jnp.concatenate([p2_ref[r] for r in range(5)], axis=-1)  # (B, 640)
    h = jnp.dot(flat, W1_ref[...], preferred_element_type=f32) + c1_ref[...]
    h = jnp.maximum(h, 0.0)

    # ---- fc2 (120->84) + ReLU ----
    h = jnp.dot(h.astype(W2_ref.dtype), W2_ref[...],
                preferred_element_type=f32) + c2_ref[...]
    h = jnp.maximum(h, 0.0)

    # ---- fc3 (84->10) + log-softmax ----
    # Padded logit lanes carry a -1e9 bias so they never win the max and their
    # exp() underflows to zero.
    z = jnp.dot(h.astype(W3_ref.dtype), W3_ref[...],
                preferred_element_type=f32) + c3_ref[...]
    m = jnp.max(z, axis=-1, keepdims=True)
    s = z - m
    lse = jnp.log(jnp.sum(jnp.exp(s), axis=-1, keepdims=True))
    o_ref[...] = s - lse                                            # (B, 128)


# ----------------------------------------------------------------------------
# Host/XLA-side weight prep: block-Toeplitz expansion fusing the conv sliding
# window and the 2x2-pool column taps into a GEMM weight.
#   B[dm, i, w*Cin+ci, m*Cout+co] = w[i, w-(2m+dm), ci, co]   (0 where invalid)
# ----------------------------------------------------------------------------
def _pool_conv_expander(kw, in_w, out_w):
    """Constant E[dm, j, w, m] = 1 iff w == 2*m + dm + j (numpy, trace-time)."""
    E = np.zeros((2, kw, in_w, out_w), np.float32)
    for dm in range(2):
        for j in range(kw):
            for m in range(out_w):
                w = 2 * m + dm + j
                if w < in_w:
                    E[dm, j, w, m] = 1.0
    return E


# ----------------------------------------------------------------------------
# Full forward pass.
# ----------------------------------------------------------------------------
def convolutional_forward(x_nchw, params, *, batch_block=BATCH_BLOCK,
                          use_bf16=True):
    n = x_nchw.shape[0]
    bb = batch_block
    n_pad = -(-n // bb) * bb
    f32 = jnp.float32
    cdt = jnp.bfloat16 if use_bf16 else f32

    # ---- input layout: NCHW -> (row h, batch, lane = w*3 + ci), batch padded
    x = jnp.transpose(x_nchw, (2, 0, 3, 1)).reshape(32, n, 96)
    x = jnp.pad(x, ((0, 0), (0, n_pad - n), (0, 0))).astype(cdt)

    # ---- conv weights: column block-Toeplitz, dm taps concatenated along N,
    #      each tap zero-padded 84/80 -> 128 lanes (lane-dense GEMM outputs).
    E1 = _pool_conv_expander(5, 32, 14)
    E2 = _pool_conv_expander(5, 14, 5)
    B1 = jnp.einsum("sjwm,ijcd->siwcmd", E1, params["w1"]).reshape(2, 5, 96, 84)
    B2 = jnp.einsum("sjwm,ijcd->siwcmd", E2, params["w2"]).reshape(2, 5, 84, 80)
    B1p = jnp.zeros((2, 5, 96, 128), f32).at[..., :84].set(B1)
    B2p = jnp.zeros((2, 5, 128, 128), f32).at[:, :, :84, :80].set(B2)
    B1c = jnp.concatenate([B1p[0], B1p[1]], axis=-1).astype(cdt)   # (5, 96, 256)
    B2c = jnp.concatenate([B2p[0], B2p[1]], axis=-1).astype(cdt)   # (5,128, 256)
    b1l = jnp.zeros((1, 128), f32).at[0, :84].set(jnp.tile(params["b1"], 14))
    b2l = jnp.zeros((1, 128), f32).at[0, :80].set(jnp.tile(params["b2"], 5))

    # ---- fc1: fold PyTorch's NCHW flatten (row index co*25 + h*5 + w) into
    #      the weight rows; pooled2 lane layout is (w*16 + co), 128-padded,
    #      five rows concatenated along lanes -> K = 640, N padded to 128.
    W1 = params["fw1"].reshape(16, 5, 5, 120).transpose(1, 2, 0, 3)
    W1 = W1.reshape(5, 80, 120)
    W1e = jnp.zeros((5, 128, 128), f32).at[:, :80, :120].set(W1)
    W1e = W1e.reshape(640, 128).astype(cdt)
    c1e = jnp.zeros((1, 128), f32).at[0, :120].set(params["fb1"])
    W2e = jnp.zeros((128, 128), f32).at[:120, :84].set(params["fw2"]).astype(cdt)
    c2e = jnp.zeros((1, 128), f32).at[0, :84].set(params["fb2"])
    W3e = jnp.zeros((128, 128), f32).at[:84, :10].set(params["fw3"]).astype(cdt)
    c3e = jnp.full((1, 128), -1e9, f32).at[0, :10].set(params["fb3"])

    def whole(arr):
        nd = arr.ndim
        return pl.BlockSpec(arr.shape, lambda i, _nd=nd: (0,) * _nd)

    out = pl.pallas_call(
        _lenet_fused_kernel,
        out_shape=jax.ShapeDtypeStruct((n_pad, 128), f32),
        grid=(n_pad // bb,),
        in_specs=[
            pl.BlockSpec((32, bb, 96), lambda i: (0, i, 0)),        # x block
            whole(B1c), whole(b1l), whole(B2c), whole(b2l),
            whole(W1e), whole(c1e), whole(W2e), whole(c2e),
            whole(W3e), whole(c3e),
        ],
        out_specs=pl.BlockSpec((bb, 128), lambda i: (i, 0)),
        scratch_shapes=[
            pltpu.VMEM((14, bb, 128), cdt),   # pooled conv1 activations
            pltpu.VMEM((5, bb, 128), cdt),    # pooled conv2 activations
        ],
        compiler_params=pltpu.CompilerParams(
            dimension_semantics=("parallel",)),
    )(x, B1c, b1l, B2c, b2l, W1e, c1e, W2e, c2e, W3e, c3e)
    return out[:n, :10]


# ----------------------------------------------------------------------------
# Pure-JAX reference (for the self-check) and synthetic params.
# ----------------------------------------------------------------------------
def reference_forward(x_nchw, params):
    hi = jax.lax.Precision.HIGHEST
    dn = ("NCHW", "HWIO", "NCHW")
    y = jax.lax.conv_general_dilated(x_nchw, params["w1"], (1, 1), "VALID",
                                     dimension_numbers=dn, precision=hi)
    y = jnp.maximum(y + params["b1"][None, :, None, None], 0.0)
    y = jax.lax.reduce_window(y, -jnp.inf, jax.lax.max,
                              (1, 1, 2, 2), (1, 1, 2, 2), "VALID")
    y = jax.lax.conv_general_dilated(y, params["w2"], (1, 1), "VALID",
                                     dimension_numbers=dn, precision=hi)
    y = jnp.maximum(y + params["b2"][None, :, None, None], 0.0)
    y = jax.lax.reduce_window(y, -jnp.inf, jax.lax.max,
                              (1, 1, 2, 2), (1, 1, 2, 2), "VALID")
    y = y.reshape(y.shape[0], -1)                      # PyTorch NCHW flatten
    y = jnp.maximum(jnp.dot(y, params["fw1"], precision=hi) + params["fb1"], 0.0)
    y = jnp.maximum(jnp.dot(y, params["fw2"], precision=hi) + params["fb2"], 0.0)
    y = jnp.dot(y, params["fw3"], precision=hi) + params["fb3"]
    return jax.nn.log_softmax(y, axis=-1)


def init_params(key):
    """Deterministic synthetic params (PyTorch-default-like uniform ranges)."""
    ks = jax.random.split(key, 10)

    def unif(k, shape, fan_in):
        bound = 1.0 / jnp.sqrt(jnp.float32(fan_in))
        return jax.random.uniform(k, shape, jnp.float32, -bound, bound)

    return {
        # conv weights stored as (kh, kw, Cin, Cout)
        "w1": unif(ks[0], (5, 5, 3, 6), 3 * 5 * 5),
        "b1": unif(ks[1], (6,), 3 * 5 * 5),
        "w2": unif(ks[2], (5, 5, 6, 16), 6 * 5 * 5),
        "b2": unif(ks[3], (16,), 6 * 5 * 5),
        # linear weights stored as (in, out)
        "fw1": unif(ks[4], (400, 120), 400),
        "fb1": unif(ks[5], (120,), 400),
        "fw2": unif(ks[6], (120, 84), 120),
        "fb2": unif(ks[7], (84,), 120),
        "fw3": unif(ks[8], (84, 10), 84),
        "fb3": unif(ks[9], (10,), 84),
    }


if __name__ == "__main__":
    key = jax.random.PRNGKey(0)
    k_in, k_par = jax.random.split(key)
    # Input implied by the module: NCHW, 3x32x32 (fc1 expects 16*5*5 features).
    x = jax.random.normal(k_in, (2, 3, 32, 32), jnp.float32)
    params = init_params(k_par)

    out = jax.jit(convolutional_forward)(x, params)
    out = jax.block_until_ready(out)

    assert out.shape == (2, 10)
    row_sums = jnp.sum(jnp.exp(out), axis=-1)
    assert bool(jnp.all(jnp.abs(row_sums - 1.0) < 1e-3))
    assert bool(jnp.all(jnp.isfinite(out)))

    ref = jax.jit(reference_forward)(x, params)
    err = float(jnp.max(jnp.abs(out - ref)))
    # bf16 MXU operands (f32 accumulation) -> slightly looser tolerance.
    assert bool(jnp.allclose(out, ref, atol=3e-2, rtol=3e-2)), err
    print("KERNEL_OK")
</pallas_src>

<mosaic_0001>
module attributes {stable_mosaic.version = 11 : i64} {
  func.func @_lenet_fused_kernel(%arg0: i32, %arg1: memref<32x128x96xbf16, #tpu.memory_space<vmem>>, %arg2: memref<5x96x256xbf16, #tpu.memory_space<vmem>>, %arg3: memref<1x128xf32, #tpu.memory_space<vmem>>, %arg4: memref<5x128x256xbf16, #tpu.memory_space<vmem>>, %arg5: memref<1x128xf32, #tpu.memory_space<vmem>>, %arg6: memref<640x128xbf16, #tpu.memory_space<vmem>>, %arg7: memref<1x128xf32, #tpu.memory_space<vmem>>, %arg8: memref<128x128xbf16, #tpu.memory_space<vmem>>, %arg9: memref<1x128xf32, #tpu.memory_space<vmem>>, %arg10: memref<128x128xbf16, #tpu.memory_space<vmem>>, %arg11: memref<1x128xf32, #tpu.memory_space<vmem>>, %arg12: memref<128x128xf32, #tpu.memory_space<vmem>>, %arg13: memref<14x128x128xbf16, #tpu.memory_space<vmem>>, %arg14: memref<5x128x128xbf16, #tpu.memory_space<vmem>>) attributes {dimension_semantics = [#tpu.dimension_semantics<parallel>], iteration_bounds = array<i64: 1>, scalar_prefetch = 0 : i64, scratch_operands = 2 : i64, tpu.core_type = #tpu.core_type<tc>, window_params = [{transform_indices = @transform_0, window_bounds = array<i64: 32, 128, 96>}, {pipeline_mode = #tpu.pipeline_mode<synchronous>, transform_indices = @transform_1, window_bounds = array<i64: 5, 96, 256>}, {pipeline_mode = #tpu.pipeline_mode<synchronous>, transform_indices = @transform_2, window_bounds = array<i64: 1, 128>}, {pipeline_mode = #tpu.pipeline_mode<synchronous>, transform_indices = @transform_3, window_bounds = array<i64: 5, 128, 256>}, {pipeline_mode = #tpu.pipeline_mode<synchronous>, transform_indices = @transform_4, window_bounds = array<i64: 1, 128>}, {pipeline_mode = #tpu.pipeline_mode<synchronous>, transform_indices = @transform_5, window_bounds = array<i64: 640, 128>}, {pipeline_mode = #tpu.pipeline_mode<synchronous>, transform_indices = @transform_6, window_bounds = array<i64: 1, 128>}, {pipeline_mode = #tpu.pipeline_mode<synchronous>, transform_indices = @transform_7, window_bounds = array<i64: 128, 128>}, {pipeline_mode = #tpu.pipeline_mode<synchronous>, transform_indices = @transform_8, window_bounds = array<i64: 1, 128>}, {pipeline_mode = #tpu.pipeline_mode<synchronous>, transform_indices = @transform_9, window_bounds = array<i64: 128, 128>}, {pipeline_mode = #tpu.pipeline_mode<synchronous>, transform_indices = @transform_10, window_bounds = array<i64: 1, 128>}, {transform_indices = @transform_11, window_bounds = array<i64: 128, 128>}]} {
    %c0_i32 = arith.constant 0 : i32
    %c14_i32 = arith.constant 14 : i32
    %0 = arith.addi %c0_i32, %c14_i32 : i32
    %c1_i32 = arith.constant 1 : i32
    scf.for %arg15 = %c0_i32 to %0 step %c1_i32  : i32 {
      %c1_i32_34 = arith.constant 1 : i32
      %45 = arith.muli %arg15, %c1_i32_34 : i32
      %c0_i32_35 = arith.constant 0 : i32
      %46 = arith.addi %c0_i32_35, %45 : i32
      %c2_i32 = arith.constant 2 : i32
      %47 = arith.muli %c2_i32, %46 : i32
      %c0_i32_36 = arith.constant 0 : i32
      %48 = arith.addi %47, %c0_i32_36 : i32
      %c0_i32_37 = arith.constant 0 : i32
      %49 = arith.addi %48, %c0_i32_37 : i32
      %50 = arith.index_cast %49 : i32 to index
      %c0_38 = arith.constant 0 : index
      %c0_39 = arith.constant 0 : index
      %51 = vector.load %arg1[%50, %c0_38, %c0_39] : memref<32x128x96xbf16, #tpu.memory_space<vmem>>, vector<1x128x96xbf16>
      %52 = vector.shape_cast %51 : vector<1x128x96xbf16> to vector<128x96xbf16>
      %c0_40 = arith.constant 0 : index
      %c0_41 = arith.constant 0 : index
      %c0_42 = arith.constant 0 : index
      %53 = vector.load %arg2[%c0_40, %c0_41, %c0_42] : memref<5x96x256xbf16, #tpu.memory_space<vmem>>, vector<1x96x256xbf16>
      %54 = vector.shape_cast %53 : vector<1x96x256xbf16> to vector<96x256xbf16>
      %cst_43 = arith.constant dense<0.000000e+00> : vector<128x256xf32>
      %55 = tpu.matmul %52, %54, %cst_43 {dimension_numbers = #tpu.dot_dimension_numbers<[1], [0], [0], [1], [0, 0, 1, 1], [], []>} : vector<128x96xbf16>, vector<96x256xbf16>, vector<128x256xf32> -> vector<128x256xf32>
      %c2_i32_44 = arith.constant 2 : i32
      %56 = arith.muli %c2_i32_44, %46 : i32
      %c0_i32_45 = arith.constant 0 : i32
      %57 = arith.addi %56, %c0_i32_45 : i32
      %c1_i32_46 = arith.constant 1 : i32
      %58 = arith.addi %57, %c1_i32_46 : i32
      %59 = arith.index_cast %58 : i32 to index
      %c0_47 = arith.constant 0 : index
      %c0_48 = arith.constant 0 : index
      %60 = vector.load %arg1[%59, %c0_47, %c0_48] : memref<32x128x96xbf16, #tpu.memory_space<vmem>>, vector<1x128x96xbf16>
      %61 = vector.shape_cast %60 : vector<1x128x96xbf16> to vector<128x96xbf16>
      %c1_49 = arith.constant 1 : index
      %c0_50 = arith.constant 0 : index
      %c0_51 = arith.constant 0 : index
      %62 = vector.load %arg2[%c1_49, %c0_50, %c0_51] : memref<5x96x256xbf16, #tpu.memory_space<vmem>>, vector<1x96x256xbf16>
      %63 = vector.shape_cast %62 : vector<1x96x256xbf16> to vector<96x256xbf16>
      %cst_52 = arith.constant dense<0.000000e+00> : vector<128x256xf32>
      %64 = tpu.matmul %61, %63, %cst_52 {dimension_numbers = #tpu.dot_dimension_numbers<[1], [0], [0], [1], [0, 0, 1, 1], [], []>} : vector<128x96xbf16>, vector<96x256xbf16>, vector<128x256xf32> -> vector<128x256xf32>
      %65 = arith.addf %55, %64 : vector<128x256xf32>
      %c2_i32_53 = arith.constant 2 : i32
      %66 = arith.muli %c2_i32_53, %46 : i32
      %c0_i32_54 = arith.constant 0 : i32
      %67 = arith.addi %66, %c0_i32_54 : i32
      %c2_i32_55 = arith.constant 2 : i32
      %68 = arith.addi %67, %c2_i32_55 : i32
      %69 = arith.index_cast %68 : i32 to index
      %c0_56 = arith.constant 0 : index
      %c0_57 = arith.constant 0 : index
      %70 = vector.load %arg1[%69, %c0_56, %c0_57] : memref<32x128x96xbf16, #tpu.memory_space<vmem>>, vector<1x128x96xbf16>
      %71 = vector.shape_cast %70 : vector<1x128x96xbf16> to vector<128x96xbf16>
      %c2_58 = arith.constant 2 : index
      %c0_59 = arith.constant 0 : index
      %c0_60 = arith.constant 0 : index
      %72 = vector.load %arg2[%c2_58, %c0_59, %c0_60] : memref<5x96x256xbf16, #tpu.memory_space<vmem>>, vector<1x96x256xbf16>
      %73 = vector.shape_cast %72 : vector<1x96x256xbf16> to vector<96x256xbf16>
      %cst_61 = arith.constant dense<0.000000e+00> : vector<128x256xf32>
      %74 = tpu.matmul %71, %73, %cst_61 {dimension_numbers = #tpu.dot_dimension_numbers<[1], [0], [0], [1], [0, 0, 1, 1], [], []>} : vector<128x96xbf16>, vector<96x256xbf16>, vector<128x256xf32> -> vector<128x256xf32>
      %75 = arith.addf %65, %74 : vector<128x256xf32>
      %c2_i32_62 = arith.constant 2 : i32
      %76 = arith.muli %c2_i32_62, %46 : i32
      %c0_i32_63 = arith.constant 0 : i32
      %77 = arith.addi %76, %c0_i32_63 : i32
      %c3_i32 = arith.constant 3 : i32
      %78 = arith.addi %77, %c3_i32 : i32
      %79 = arith.index_cast %78 : i32 to index
      %c0_64 = arith.constant 0 : index
      %c0_65 = arith.constant 0 : index
      %80 = vector.load %arg1[%79, %c0_64, %c0_65] : memref<32x128x96xbf16, #tpu.memory_space<vmem>>, vector<1x128x96xbf16>
      %81 = vector.shape_cast %80 : vector<1x128x96xbf16> to vector<128x96xbf16>
      %c3_66 = arith.constant 3 : index
      %c0_67 = arith.constant 0 : index
      %c0_68 = arith.constant 0 : index
      %82 = vector.load %arg2[%c3_66, %c0_67, %c0_68] : memref<5x96x256xbf16, #tpu.memory_space<vmem>>, vector<1x96x256xbf16>
      %83 = vector.shape_cast %82 : vector<1x96x256xbf16> to vector<96x256xbf16>
      %cst_69 = arith.constant dense<0.000000e+00> : vector<128x256xf32>
      %84 = tpu.matmul %81, %83, %cst_69 {dimension_numbers = #tpu.dot_dimension_numbers<[1], [0], [0], [1], [0, 0, 1, 1], [], []>} : vector<128x96xbf16>, vector<96x256xbf16>, vector<128x256xf32> -> vector<128x256xf32>
      %85 = arith.addf %75, %84 : vector<128x256xf32>
      %c2_i32_70 = arith.constant 2 : i32
      %86 = arith.muli %c2_i32_70, %46 : i32
      %c0_i32_71 = arith.constant 0 : i32
      %87 = arith.addi %86, %c0_i32_71 : i32
      %c4_i32 = arith.constant 4 : i32
      %88 = arith.addi %87, %c4_i32 : i32
      %89 = arith.index_cast %88 : i32 to index
      %c0_72 = arith.constant 0 : index
      %c0_73 = arith.constant 0 : index
      %90 = vector.load %arg1[%89, %c0_72, %c0_73] : memref<32x128x96xbf16, #tpu.memory_space<vmem>>, vector<1x128x96xbf16>
      %91 = vector.shape_cast %90 : vector<1x128x96xbf16> to vector<128x96xbf16>
      %c4_74 = arith.constant 4 : index
      %c0_75 = arith.constant 0 : index
      %c0_76 = arith.constant 0 : index
      %92 = vector.load %arg2[%c4_74, %c0_75, %c0_76] : memref<5x96x256xbf16, #tpu.memory_space<vmem>>, vector<1x96x256xbf16>
      %93 = vector.shape_cast %92 : vector<1x96x256xbf16> to vector<96x256xbf16>
      %cst_77 = arith.constant dense<0.000000e+00> : vector<128x256xf32>
      %94 = tpu.matmul %91, %93, %cst_77 {dimension_numbers = #tpu.dot_dimension_numbers<[1], [0], [0], [1], [0, 0, 1, 1], [], []>} : vector<128x96xbf16>, vector<96x256xbf16>, vector<128x256xf32> -> vector<128x256xf32>
      %95 = arith.addf %85, %94 : vector<128x256xf32>
      %96 = vector.extract_strided_slice %95 {offsets = [0, 0], sizes = [128, 128], strides = [1, 1]} : vector<128x256xf32> to vector<128x128xf32>
      %97 = vector.extract_strided_slice %95 {offsets = [0, 128], sizes = [128, 128], strides = [1, 1]} : vector<128x256xf32> to vector<128x128xf32>
      %98 = arith.maximumf %96, %97 : vector<128x128xf32>
      %c2_i32_78 = arith.constant 2 : i32
      %99 = arith.muli %c2_i32_78, %46 : i32
      %c1_i32_79 = arith.constant 1 : i32
      %100 = arith.addi %99, %c1_i32_79 : i32
      %c0_i32_80 = arith.constant 0 : i32
      %101 = arith.addi %100, %c0_i32_80 : i32
      %102 = arith.index_cast %101 : i32 to index
      %c0_81 = arith.constant 0 : index
      %c0_82 = arith.constant 0 : index
      %103 = vector.load %arg1[%102, %c0_81, %c0_82] : memref<32x128x96xbf16, #tpu.memory_space<vmem>>, vector<1x128x96xbf16>
      %104 = vector.shape_cast %103 : vector<1x128x96xbf16> to vector<128x96xbf16>
      %c0_83 = arith.constant 0 : index
      %c0_84 = arith.constant 0 : index
      %c0_85 = arith.constant 0 : index
      %105 = vector.load %arg2[%c0_83, %c0_84, %c0_85] : memref<5x96x256xbf16, #tpu.memory_space<vmem>>, vector<1x96x256xbf16>
      %106 = vector.shape_cast %105 : vector<1x96x256xbf16> to vector<96x256xbf16>
      %cst_86 = arith.constant dense<0.000000e+00> : vector<128x256xf32>
      %107 = tpu.matmul %104, %106, %cst_86 {dimension_numbers = #tpu.dot_dimension_numbers<[1], [0], [0], [1], [0, 0, 1, 1], [], []>} : vector<128x96xbf16>, vector<96x256xbf16>, vector<128x256xf32> -> vector<128x256xf32>
      %c2_i32_87 = arith.constant 2 : i32
      %108 = arith.muli %c2_i32_87, %46 : i32
      %c1_i32_88 = arith.constant 1 : i32
      %109 = arith.addi %108, %c1_i32_88 : i32
      %c1_i32_89 = arith.constant 1 : i32
      %110 = arith.addi %109, %c1_i32_89 : i32
      %111 = arith.index_cast %110 : i32 to index
      %c0_90 = arith.constant 0 : index
      %c0_91 = arith.constant 0 : index
      %112 = vector.load %arg1[%111, %c0_90, %c0_91] : memref<32x128x96xbf16, #tpu.memory_space<vmem>>, vector<1x128x96xbf16>
      %113 = vector.shape_cast %112 : vector<1x128x96xbf16> to vector<128x96xbf16>
      %c1_92 = arith.constant 1 : index
      %c0_93 = arith.constant 0 : index
      %c0_94 = arith.constant 0 : index
      %114 = vector.load %arg2[%c1_92, %c0_93, %c0_94] : memref<5x96x256xbf16, #tpu.memory_space<vmem>>, vector<1x96x256xbf16>
      %115 = vector.shape_cast %114 : vector<1x96x256xbf16> to vector<96x256xbf16>
      %cst_95 = arith.constant dense<0.000000e+00> : vector<128x256xf32>
      %116 = tpu.matmul %113, %115, %cst_95 {dimension_numbers = #tpu.dot_dimension_numbers<[1], [0], [0], [1], [0, 0, 1, 1], [], []>} : vector<128x96xbf16>, vector<96x256xbf16>, vector<128x256xf32> -> vector<128x256xf32>
      %117 = arith.addf %107, %116 : vector<128x256xf32>
      %c2_i32_96 = arith.constant 2 : i32
      %118 = arith.muli %c2_i32_96, %46 : i32
      %c1_i32_97 = arith.constant 1 : i32
      %119 = arith.addi %118, %c1_i32_97 : i32
      %c2_i32_98 = arith.constant 2 : i32
      %120 = arith.addi %119, %c2_i32_98 : i32
      %121 = arith.index_cast %120 : i32 to index
      %c0_99 = arith.constant 0 : index
      %c0_100 = arith.constant 0 : index
      %122 = vector.load %arg1[%121, %c0_99, %c0_100] : memref<32x128x96xbf16, #tpu.memory_space<vmem>>, vector<1x128x96xbf16>
      %123 = vector.shape_cast %122 : vector<1x128x96xbf16> to vector<128x96xbf16>
      %c2_101 = arith.constant 2 : index
      %c0_102 = arith.constant 0 : index
      %c0_103 = arith.constant 0 : index
      %124 = vector.load %arg2[%c2_101, %c0_102, %c0_103] : memref<5x96x256xbf16, #tpu.memory_space<vmem>>, vector<1x96x256xbf16>
      %125 = vector.shape_cast %124 : vector<1x96x256xbf16> to vector<96x256xbf16>
      %cst_104 = arith.constant dense<0.000000e+00> : vector<128x256xf32>
      %126 = tpu.matmul %123, %125, %cst_104 {dimension_numbers = #tpu.dot_dimension_numbers<[1], [0], [0], [1], [0, 0, 1, 1], [], []>} : vector<128x96xbf16>, vector<96x256xbf16>, vector<128x256xf32> -> vector<128x256xf32>
      %127 = arith.addf %117, %126 : vector<128x256xf32>
      %c2_i32_105 = arith.constant 2 : i32
      %128 = arith.muli %c2_i32_105, %46 : i32
      %c1_i32_106 = arith.constant 1 : i32
      %129 = arith.addi %128, %c1_i32_106 : i32
      %c3_i32_107 = arith.constant 3 : i32
      %130 = arith.addi %129, %c3_i32_107 : i32
      %131 = arith.index_cast %130 : i32 to index
      %c0_108 = arith.constant 0 : index
      %c0_109 = arith.constant 0 : index
      %132 = vector.load %arg1[%131, %c0_108, %c0_109] : memref<32x128x96xbf16, #tpu.memory_space<vmem>>, vector<1x128x96xbf16>
      %133 = vector.shape_cast %132 : vector<1x128x96xbf16> to vector<128x96xbf16>
      %c3_110 = arith.constant 3 : index
      %c0_111 = arith.constant 0 : index
      %c0_112 = arith.constant 0 : index
      %134 = vector.load %arg2[%c3_110, %c0_111, %c0_112] : memref<5x96x256xbf16, #tpu.memory_space<vmem>>, vector<1x96x256xbf16>
      %135 = vector.shape_cast %134 : vector<1x96x256xbf16> to vector<96x256xbf16>
      %cst_113 = arith.constant dense<0.000000e+00> : vector<128x256xf32>
      %136 = tpu.matmul %133, %135, %cst_113 {dimension_numbers = #tpu.dot_dimension_numbers<[1], [0], [0], [1], [0, 0, 1, 1], [], []>} : vector<128x96xbf16>, vector<96x256xbf16>, vector<128x256xf32> -> vector<128x256xf32>
      %137 = arith.addf %127, %136 : vector<128x256xf32>
      %c2_i32_114 = arith.constant 2 : i32
      %138 = arith.muli %c2_i32_114, %46 : i32
      %c1_i32_115 = arith.constant 1 : i32
      %139 = arith.addi %138, %c1_i32_115 : i32
      %c4_i32_116 = arith.constant 4 : i32
      %140 = arith.addi %139, %c4_i32_116 : i32
      %141 = arith.index_cast %140 : i32 to index
      %c0_117 = arith.constant 0 : index
      %c0_118 = arith.constant 0 : index
      %142 = vector.load %arg1[%141, %c0_117, %c0_118] : memref<32x128x96xbf16, #tpu.memory_space<vmem>>, vector<1x128x96xbf16>
      %143 = vector.shape_cast %142 : vector<1x128x96xbf16> to vector<128x96xbf16>
      %c4_119 = arith.constant 4 : index
      %c0_120 = arith.constant 0 : index
      %c0_121 = arith.constant 0 : index
      %144 = vector.load %arg2[%c4_119, %c0_120, %c0_121] : memref<5x96x256xbf16, #tpu.memory_space<vmem>>, vector<1x96x256xbf16>
      %145 = vector.shape_cast %144 : vector<1x96x256xbf16> to vector<96x256xbf16>
      %cst_122 = arith.constant dense<0.000000e+00> : vector<128x256xf32>
      %146 = tpu.matmul %143, %145, %cst_122 {dimension_numbers = #tpu.dot_dimension_numbers<[1], [0], [0], [1], [0, 0, 1, 1], [], []>} : vector<128x96xbf16>, vector<96x256xbf16>, vector<128x256xf32> -> vector<128x256xf32>
      %147 = arith.addf %137, %146 : vector<128x256xf32>
      %148 = vector.extract_strided_slice %147 {offsets = [0, 0], sizes = [128, 128], strides = [1, 1]} : vector<128x256xf32> to vector<128x128xf32>
      %149 = vector.extract_strided_slice %147 {offsets = [0, 128], sizes = [128, 128], strides = [1, 1]} : vector<128x256xf32> to vector<128x128xf32>
      %150 = arith.maximumf %148, %149 : vector<128x128xf32>
      %151 = arith.maximumf %98, %150 : vector<128x128xf32>
      %c0_123 = arith.constant 0 : index
      %c0_124 = arith.constant 0 : index
      %152 = vector.load %arg3[%c0_123, %c0_124] : memref<1x128xf32, #tpu.memory_space<vmem>>, vector<1x128xf32>
      %153 = vector.broadcast %152 : vector<1x128xf32> to vector<128x128xf32>
      %154 = arith.addf %151, %153 : vector<128x128xf32>
      %cst_125 = arith.constant 0.000000e+00 : f32
      %155 = vector.broadcast %cst_125 : f32 to vector<128x128xf32>
      %156 = arith.maximumf %154, %155 : vector<128x128xf32>
      %157 = arith.truncf %156 : vector<128x128xf32> to vector<128x128xbf16>
      %158 = arith.index_cast %46 : i32 to index
      %c0_126 = arith.constant 0 : index
      %c0_127 = arith.constant 0 : index
      %159 = vector.load %arg13[%158, %c0_126, %c0_127] : memref<14x128x128xbf16, #tpu.memory_space<vmem>>, vector<1x128x128xbf16>
      %160 = vector.shape_cast %159 : vector<1x128x128xbf16> to vector<128x128xbf16>
      %161 = vector.shape_cast %157 : vector<128x128xbf16> to vector<1x128x128xbf16>
      tpu.vector_store %arg13[%158, %c0_126, %c0_127], %161 {strides = array<i32>} : memref<14x128x128xbf16, #tpu.memory_space<vmem>>, vector<1x128x128xbf16>,
    }
    %c14_i32_0 = arith.constant 14 : i32
    %c0_i32_1 = arith.constant 0 : i32
    %c5_i32 = arith.constant 5 : i32
    %1 = arith.addi %c0_i32_1, %c5_i32 : i32
    %c1_i32_2 = arith.constant 1 : i32
    scf.for %arg15 = %c0_i32_1 to %1 step %c1_i32_2  : i32 {
      %c1_i32_34 = arith.constant 1 : i32
      %45 = arith.muli %arg15, %c1_i32_34 : i32
      %c0_i32_35 = arith.constant 0 : i32
      %46 = arith.addi %c0_i32_35, %45 : i32
      %c2_i32 = arith.constant 2 : i32
      %47 = arith.muli %c2_i32, %46 : i32
      %c0_i32_36 = arith.constant 0 : i32
      %48 = arith.addi %47, %c0_i32_36 : i32
      %c0_i32_37 = arith.constant 0 : i32
      %49 = arith.addi %48, %c0_i32_37 : i32
      %50 = arith.index_cast %49 : i32 to index
      %c0_38 = arith.constant 0 : index
      %c0_39 = arith.constant 0 : index
      %51 = vector.load %arg13[%50, %c0_38, %c0_39] : memref<14x128x128xbf16, #tpu.memory_space<vmem>>, vector<1x128x128xbf16>
      %52 = vector.shape_cast %51 : vector<1x128x128xbf16> to vector<128x128xbf16>
      %c0_40 = arith.constant 0 : index
      %c0_41 = arith.constant 0 : index
      %c0_42 = arith.constant 0 : index
      %53 = vector.load %arg4[%c0_40, %c0_41, %c0_42] : memref<5x128x256xbf16, #tpu.memory_space<vmem>>, vector<1x128x256xbf16>
      %54 = vector.shape_cast %53 : vector<1x128x256xbf16> to vector<128x256xbf16>
      %cst_43 = arith.constant dense<0.000000e+00> : vector<128x256xf32>
      %55 = tpu.matmul %52, %54, %cst_43 {dimension_numbers = #tpu.dot_dimension_numbers<[1], [0], [0], [1], [0, 0, 1, 1], [], []>} : vector<128x128xbf16>, vector<128x256xbf16>, vector<128x256xf32> -> vector<128x256xf32>
      %c2_i32_44 = arith.constant 2 : i32
      %56 = arith.muli %c2_i32_44, %46 : i32
      %c0_i32_45 = arith.constant 0 : i32
      %57 = arith.addi %56, %c0_i32_45 : i32
      %c1_i32_46 = arith.constant 1 : i32
      %58 = arith.addi %57, %c1_i32_46 : i32
      %59 = arith.index_cast %58 : i32 to index
      %c0_47 = arith.constant 0 : index
      %c0_48 = arith.constant 0 : index
      %60 = vector.load %arg13[%59, %c0_47, %c0_48] : memref<14x128x128xbf16, #tpu.memory_space<vmem>>, vector<1x128x128xbf16>
      %61 = vector.shape_cast %60 : vector<1x128x128xbf16> to vector<128x128xbf16>
      %c1_49 = arith.constant 1 : index
      %c0_50 = arith.constant 0 : index
      %c0_51 = arith.constant 0 : index
      %62 = vector.load %arg4[%c1_49, %c0_50, %c0_51] : memref<5x128x256xbf16, #tpu.memory_space<vmem>>, vector<1x128x256xbf16>
      %63 = vector.shape_cast %62 : vector<1x128x256xbf16> to vector<128x256xbf16>
      %cst_52 = arith.constant dense<0.000000e+00> : vector<128x256xf32>
      %64 = tpu.matmul %61, %63, %cst_52 {dimension_numbers = #tpu.dot_dimension_numbers<[1], [0], [0], [1], [0, 0, 1, 1], [], []>} : vector<128x128xbf16>, vector<128x256xbf16>, vector<128x256xf32> -> vector<128x256xf32>
      %65 = arith.addf %55, %64 : vector<128x256xf32>
      %c2_i32_53 = arith.constant 2 : i32
      %66 = arith.muli %c2_i32_53, %46 : i32
      %c0_i32_54 = arith.constant 0 : i32
      %67 = arith.addi %66, %c0_i32_54 : i32
      %c2_i32_55 = arith.constant 2 : i32
      %68 = arith.addi %67, %c2_i32_55 : i32
      %69 = arith.index_cast %68 : i32 to index
      %c0_56 = arith.constant 0 : index
      %c0_57 = arith.constant 0 : index
      %70 = vector.load %arg13[%69, %c0_56, %c0_57] : memref<14x128x128xbf16, #tpu.memory_space<vmem>>, vector<1x128x128xbf16>
      %71 = vector.shape_cast %70 : vector<1x128x128xbf16> to vector<128x128xbf16>
      %c2_58 = arith.constant 2 : index
      %c0_59 = arith.constant 0 : index
      %c0_60 = arith.constant 0 : index
      %72 = vector.load %arg4[%c2_58, %c0_59, %c0_60] : memref<5x128x256xbf16, #tpu.memory_space<vmem>>, vector<1x128x256xbf16>
      %73 = vector.shape_cast %72 : vector<1x128x256xbf16> to vector<128x256xbf16>
      %cst_61 = arith.constant dense<0.000000e+00> : vector<128x256xf32>
      %74 = tpu.matmul %71, %73, %cst_61 {dimension_numbers = #tpu.dot_dimension_numbers<[1], [0], [0], [1], [0, 0, 1, 1], [], []>} : vector<128x128xbf16>, vector<128x256xbf16>, vector<128x256xf32> -> vector<128x256xf32>
      %75 = arith.addf %65, %74 : vector<128x256xf32>
      %c2_i32_62 = arith.constant 2 : i32
      %76 = arith.muli %c2_i32_62, %46 : i32
      %c0_i32_63 = arith.constant 0 : i32
      %77 = arith.addi %76, %c0_i32_63 : i32
      %c3_i32 = arith.constant 3 : i32
      %78 = arith.addi %77, %c3_i32 : i32
      %79 = arith.index_cast %78 : i32 to index
      %c0_64 = arith.constant 0 : index
      %c0_65 = arith.constant 0 : index
      %80 = vector.load %arg13[%79, %c0_64, %c0_65] : memref<14x128x128xbf16, #tpu.memory_space<vmem>>, vector<1x128x128xbf16>
      %81 = vector.shape_cast %80 : vector<1x128x128xbf16> to vector<128x128xbf16>
      %c3_66 = arith.constant 3 : index
      %c0_67 = arith.constant 0 : index
      %c0_68 = arith.constant 0 : index
      %82 = vector.load %arg4[%c3_66, %c0_67, %c0_68] : memref<5x128x256xbf16, #tpu.memory_space<vmem>>, vector<1x128x256xbf16>
      %83 = vector.shape_cast %82 : vector<1x128x256xbf16> to vector<128x256xbf16>
      %cst_69 = arith.constant dense<0.000000e+00> : vector<128x256xf32>
      %84 = tpu.matmul %81, %83, %cst_69 {dimension_numbers = #tpu.dot_dimension_numbers<[1], [0], [0], [1], [0, 0, 1, 1], [], []>} : vector<128x128xbf16>, vector<128x256xbf16>, vector<128x256xf32> -> vector<128x256xf32>
      %85 = arith.addf %75, %84 : vector<128x256xf32>
      %c2_i32_70 = arith.constant 2 : i32
      %86 = arith.muli %c2_i32_70, %46 : i32
      %c0_i32_71 = arith.constant 0 : i32
      %87 = arith.addi %86, %c0_i32_71 : i32
      %c4_i32 = arith.constant 4 : i32
      %88 = arith.addi %87, %c4_i32 : i32
      %89 = arith.index_cast %88 : i32 to index
      %c0_72 = arith.constant 0 : index
      %c0_73 = arith.constant 0 : index
      %90 = vector.load %arg13[%89, %c0_72, %c0_73] : memref<14x128x128xbf16, #tpu.memory_space<vmem>>, vector<1x128x128xbf16>
      %91 = vector.shape_cast %90 : vector<1x128x128xbf16> to vector<128x128xbf16>
      %c4_74 = arith.constant 4 : index
      %c0_75 = arith.constant 0 : index
      %c0_76 = arith.constant 0 : index
      %92 = vector.load %arg4[%c4_74, %c0_75, %c0_76] : memref<5x128x256xbf16, #tpu.memory_space<vmem>>, vector<1x128x256xbf16>
      %93 = vector.shape_cast %92 : vector<1x128x256xbf16> to vector<128x256xbf16>
      %cst_77 = arith.constant dense<0.000000e+00> : vector<128x256xf32>
      %94 = tpu.matmul %91, %93, %cst_77 {dimension_numbers = #tpu.dot_dimension_numbers<[1], [0], [0], [1], [0, 0, 1, 1], [], []>} : vector<128x128xbf16>, vector<128x256xbf16>, vector<128x256xf32> -> vector<128x256xf32>
      %95 = arith.addf %85, %94 : vector<128x256xf32>
      %96 = vector.extract_strided_slice %95 {offsets = [0, 0], sizes = [128, 128], strides = [1, 1]} : vector<128x256xf32> to vector<128x128xf32>
      %97 = vector.extract_strided_slice %95 {offsets = [0, 128], sizes = [128, 128], strides = [1, 1]} : vector<128x256xf32> to vector<128x128xf32>
      %98 = arith.maximumf %96, %97 : vector<128x128xf32>
      %c2_i32_78 = arith.constant 2 : i32
      %99 = arith.muli %c2_i32_78, %46 : i32
      %c1_i32_79 = arith.constant 1 : i32
      %100 = arith.addi %99, %c1_i32_79 : i32
      %c0_i32_80 = arith.constant 0 : i32
      %101 = arith.addi %100, %c0_i32_80 : i32
      %102 = arith.index_cast %101 : i32 to index
      %c0_81 = arith.constant 0 : index
      %c0_82 = arith.constant 0 : index
      %103 = vector.load %arg13[%102, %c0_81, %c0_82] : memref<14x128x128xbf16, #tpu.memory_space<vmem>>, vector<1x128x128xbf16>
      %104 = vector.shape_cast %103 : vector<1x128x128xbf16> to vector<128x128xbf16>
      %c0_83 = arith.constant 0 : index
      %c0_84 = arith.constant 0 : index
      %c0_85 = arith.constant 0 : index
      %105 = vector.load %arg4[%c0_83, %c0_84, %c0_85] : memref<5x128x256xbf16, #tpu.memory_space<vmem>>, vector<1x128x256xbf16>
      %106 = vector.shape_cast %105 : vector<1x128x256xbf16> to vector<128x256xbf16>
      %cst_86 = arith.constant dense<0.000000e+00> : vector<128x256xf32>
      %107 = tpu.matmul %104, %106, %cst_86 {dimension_numbers = #tpu.dot_dimension_numbers<[1], [0], [0], [1], [0, 0, 1, 1], [], []>} : vector<128x128xbf16>, vector<128x256xbf16>, vector<128x256xf32> -> vector<128x256xf32>
      %c2_i32_87 = arith.constant 2 : i32
      %108 = arith.muli %c2_i32_87, %46 : i32
      %c1_i32_88 = arith.constant 1 : i32
      %109 = arith.addi %108, %c1_i32_88 : i32
      %c1_i32_89 = arith.constant 1 : i32
      %110 = arith.addi %109, %c1_i32_89 : i32
      %111 = arith.index_cast %110 : i32 to index
      %c0_90 = arith.constant 0 : index
      %c0_91 = arith.constant 0 : index
      %112 = vector.load %arg13[%111, %c0_90, %c0_91] : memref<14x128x128xbf16, #tpu.memory_space<vmem>>, vector<1x128x128xbf16>
      %113 = vector.shape_cast %112 : vector<1x128x128xbf16> to vector<128x128xbf16>
      %c1_92 = arith.constant 1 : index
      %c0_93 = arith.constant 0 : index
      %c0_94 = arith.constant 0 : index
      %114 = vector.load %arg4[%c1_92, %c0_93, %c0_94] : memref<5x128x256xbf16, #tpu.memory_space<vmem>>, vector<1x128x256xbf16>
      %115 = vector.shape_cast %114 : vector<1x128x256xbf16> to vector<128x256xbf16>
      %cst_95 = arith.constant dense<0.000000e+00> : vector<128x256xf32>
      %116 = tpu.matmul %113, %115, %cst_95 {dimension_numbers = #tpu.dot_dimension_numbers<[1], [0], [0], [1], [0, 0, 1, 1], [], []>} : vector<128x128xbf16>, vector<128x256xbf16>, vector<128x256xf32> -> vector<128x256xf32>
      %117 = arith.addf %107, %116 : vector<128x256xf32>
      %c2_i32_96 = arith.constant 2 : i32
      %118 = arith.muli %c2_i32_96, %46 : i32
      %c1_i32_97 = arith.constant 1 : i32
      %119 = arith.addi %118, %c1_i32_97 : i32
      %c2_i32_98 = arith.constant 2 : i32
      %120 = arith.addi %119, %c2_i32_98 : i32
      %121 = arith.index_cast %120 : i32 to index
      %c0_99 = arith.constant 0 : index
      %c0_100 = arith.constant 0 : index
      %122 = vector.load %arg13[%121, %c0_99, %c0_100] : memref<14x128x128xbf16, #tpu.memory_space<vmem>>, vector<1x128x128xbf16>
      %123 = vector.shape_cast %122 : vector<1x128x128xbf16> to vector<128x128xbf16>
      %c2_101 = arith.constant 2 : index
      %c0_102 = arith.constant 0 : index
      %c0_103 = arith.constant 0 : index
      %124 = vector.load %arg4[%c2_101, %c0_102, %c0_103] : memref<5x128x256xbf16, #tpu.memory_space<vmem>>, vector<1x128x256xbf16>
      %125 = vector.shape_cast %124 : vector<1x128x256xbf16> to vector<128x256xbf16>
      %cst_104 = arith.constant dense<0.000000e+00> : vector<128x256xf32>
      %126 = tpu.matmul %123, %125, %cst_104 {dimension_numbers = #tpu.dot_dimension_numbers<[1], [0], [0], [1], [0, 0, 1, 1], [], []>} : vector<128x128xbf16>, vector<128x256xbf16>, vector<128x256xf32> -> vector<128x256xf32>
      %127 = arith.addf %117, %126 : vector<128x256xf32>
      %c2_i32_105 = arith.constant 2 : i32
      %128 = arith.muli %c2_i32_105, %46 : i32
      %c1_i32_106 = arith.constant 1 : i32
      %129 = arith.addi %128, %c1_i32_106 : i32
      %c3_i32_107 = arith.constant 3 : i32
      %130 = arith.addi %129, %c3_i32_107 : i32
      %131 = arith.index_cast %130 : i32 to index
      %c0_108 = arith.constant 0 : index
      %c0_109 = arith.constant 0 : index
      %132 = vector.load %arg13[%131, %c0_108, %c0_109] : memref<14x128x128xbf16, #tpu.memory_space<vmem>>, vector<1x128x128xbf16>
      %133 = vector.shape_cast %132 : vector<1x128x128xbf16> to vector<128x128xbf16>
      %c3_110 = arith.constant 3 : index
      %c0_111 = arith.constant 0 : index
      %c0_112 = arith.constant 0 : index
      %134 = vector.load %arg4[%c3_110, %c0_111, %c0_112] : memref<5x128x256xbf16, #tpu.memory_space<vmem>>, vector<1x128x256xbf16>
      %135 = vector.shape_cast %134 : vector<1x128x256xbf16> to vector<128x256xbf16>
      %cst_113 = arith.constant dense<0.000000e+00> : vector<128x256xf32>
      %136 = tpu.matmul %133, %135, %cst_113 {dimension_numbers = #tpu.dot_dimension_numbers<[1], [0], [0], [1], [0, 0, 1, 1], [], []>} : vector<128x128xbf16>, vector<128x256xbf16>, vector<128x256xf32> -> vector<128x256xf32>
      %137 = arith.addf %127, %136 : vector<128x256xf32>
      %c2_i32_114 = arith.constant 2 : i32
      %138 = arith.muli %c2_i32_114, %46 : i32
      %c1_i32_115 = arith.constant 1 : i32
      %139 = arith.addi %138, %c1_i32_115 : i32
      %c4_i32_116 = arith.constant 4 : i32
      %140 = arith.addi %139, %c4_i32_116 : i32
      %141 = arith.index_cast %140 : i32 to index
      %c0_117 = arith.constant 0 : index
      %c0_118 = arith.constant 0 : index
      %142 = vector.load %arg13[%141, %c0_117, %c0_118] : memref<14x128x128xbf16, #tpu.memory_space<vmem>>, vector<1x128x128xbf16>
      %143 = vector.shape_cast %142 : vector<1x128x128xbf16> to vector<128x128xbf16>
      %c4_119 = arith.constant 4 : index
      %c0_120 = arith.constant 0 : index
      %c0_121 = arith.constant 0 : index
      %144 = vector.load %arg4[%c4_119, %c0_120, %c0_121] : memref<5x128x256xbf16, #tpu.memory_space<vmem>>, vector<1x128x256xbf16>
      %145 = vector.shape_cast %144 : vector<1x128x256xbf16> to vector<128x256xbf16>
      %cst_122 = arith.constant dense<0.000000e+00> : vector<128x256xf32>
      %146 = tpu.matmul %143, %145, %cst_122 {dimension_numbers = #tpu.dot_dimension_numbers<[1], [0], [0], [1], [0, 0, 1, 1], [], []>} : vector<128x128xbf16>, vector<128x256xbf16>, vector<128x256xf32> -> vector<128x256xf32>
      %147 = arith.addf %137, %146 : vector<128x256xf32>
      %148 = vector.extract_strided_slice %147 {offsets = [0, 0], sizes = [128, 128], strides = [1, 1]} : vector<128x256xf32> to vector<128x128xf32>
      %149 = vector.extract_strided_slice %147 {offsets = [0, 128], sizes = [128, 128], strides = [1, 1]} : vector<128x256xf32> to vector<128x128xf32>
      %150 = arith.maximumf %148, %149 : vector<128x128xf32>
      %151 = arith.maximumf %98, %150 : vector<128x128xf32>
      %c0_123 = arith.constant 0 : index
      %c0_124 = arith.constant 0 : index
      %152 = vector.load %arg5[%c0_123, %c0_124] : memref<1x128xf32, #tpu.memory_space<vmem>>, vector<1x128xf32>
      %153 = vector.broadcast %152 : vector<1x128xf32> to vector<128x128xf32>
      %154 = arith.addf %151, %153 : vector<128x128xf32>
      %cst_125 = arith.constant 0.000000e+00 : f32
      %155 = vector.broadcast %cst_125 : f32 to vector<128x128xf32>
      %156 = arith.maximumf %154, %155 : vector<128x128xf32>
      %157 = arith.truncf %156 : vector<128x128xf32> to vector<128x128xbf16>
      %158 = arith.index_cast %46 : i32 to index
      %c0_126 = arith.constant 0 : index
      %c0_127 = arith.constant 0 : index
      %159 = vector.load %arg14[%158, %c0_126, %c0_127] : memref<5x128x128xbf16, #tpu.memory_space<vmem>>, vector<1x128x128xbf16>
      %160 = vector.shape_cast %159 : vector<1x128x128xbf16> to vector<128x128xbf16>
      %161 = vector.shape_cast %157 : vector<128x128xbf16> to vector<1x128x128xbf16>
      tpu.vector_store %arg14[%158, %c0_126, %c0_127], %161 {strides = array<i32>} : memref<5x128x128xbf16, #tpu.memory_space<vmem>>, vector<1x128x128xbf16>,
    }
    %c5_i32_3 = arith.constant 5 : i32
    %c0 = arith.constant 0 : index
    %c0_4 = arith.constant 0 : index
    %c0_5 = arith.constant 0 : index
    %2 = vector.load %arg14[%c0, %c0_4, %c0_5] : memref<5x128x128xbf16, #tpu.memory_space<vmem>>, vector<1x128x128xbf16>
    %3 = vector.shape_cast %2 : vector<1x128x128xbf16> to vector<128x128xbf16>
    %c1 = arith.constant 1 : index
    %c0_6 = arith.constant 0 : index
    %c0_7 = arith.constant 0 : index
    %4 = vector.load %arg14[%c1, %c0_6, %c0_7] : memref<5x128x128xbf16, #tpu.memory_space<vmem>>, vector<1x128x128xbf16>
    %5 = vector.shape_cast %4 : vector<1x128x128xbf16> to vector<128x128xbf16>
    %c2 = arith.constant 2 : index
    %c0_8 = arith.constant 0 : index
    %c0_9 = arith.constant 0 : index
    %6 = vector.load %arg14[%c2, %c0_8, %c0_9] : memref<5x128x128xbf16, #tpu.memory_space<vmem>>, vector<1x128x128xbf16>
    %7 = vector.shape_cast %6 : vector<1x128x128xbf16> to vector<128x128xbf16>
    %c3 = arith.constant 3 : index
    %c0_10 = arith.constant 0 : index
    %c0_11 = arith.constant 0 : index
    %8 = vector.load %arg14[%c3, %c0_10, %c0_11] : memref<5x128x128xbf16, #tpu.memory_space<vmem>>, vector<1x128x128xbf16>
    %9 = vector.shape_cast %8 : vector<1x128x128xbf16> to vector<128x128xbf16>
    %c4 = arith.constant 4 : index
    %c0_12 = arith.constant 0 : index
    %c0_13 = arith.constant 0 : index
    %10 = vector.load %arg14[%c4, %c0_12, %c0_13] : memref<5x128x128xbf16, #tpu.memory_space<vmem>>, vector<1x128x128xbf16>
    %11 = vector.shape_cast %10 : vector<1x128x128xbf16> to vector<128x128xbf16>
    %12 = tpu.concatenate %3, %5, %7, %9, %11 in 1 : vector<128x128xbf16>, vector<128x128xbf16>, vector<128x128xbf16>, vector<128x128xbf16>, vector<128x128xbf16> -> vector<128x640xbf16>
    %c0_14 = arith.constant 0 : index
    %c0_15 = arith.constant 0 : index
    %13 = vector.load %arg6[%c0_14, %c0_15] : memref<640x128xbf16, #tpu.memory_space<vmem>>, vector<640x128xbf16>
    %cst = arith.constant dense<0.000000e+00> : vector<128x128xf32>
    %14 = tpu.matmul %12, %13, %cst {dimension_numbers = #tpu.dot_dimension_numbers<[1], [0], [0], [1], [0, 0, 1, 1], [], []>} : vector<128x640xbf16>, vector<640x128xbf16>, vector<128x128xf32> -> vector<128x128xf32>
    %c0_16 = arith.constant 0 : index
    %c0_17 = arith.constant 0 : index
    %15 = vector.load %arg7[%c0_16, %c0_17] : memref<1x128xf32, #tpu.memory_space<vmem>>, vector<1x128xf32>
    %16 = vector.broadcast %15 : vector<1x128xf32> to vector<128x128xf32>
    %17 = arith.addf %14, %16 : vector<128x128xf32>
    %cst_18 = arith.constant 0.000000e+00 : f32
    %18 = vector.broadcast %cst_18 : f32 to vector<128x128xf32>
    %19 = arith.maximumf %17, %18 : vector<128x128xf32>
    %20 = arith.truncf %19 : vector<128x128xf32> to vector<128x128xbf16>
    %c0_19 = arith.constant 0 : index
    %c0_20 = arith.constant 0 : index
    %21 = vector.load %arg8[%c0_19, %c0_20] : memref<128x128xbf16, #tpu.memory_space<vmem>>, vector<128x128xbf16>
    %cst_21 = arith.constant dense<0.000000e+00> : vector<128x128xf32>
    %22 = tpu.matmul %20, %21, %cst_21 {dimension_numbers = #tpu.dot_dimension_numbers<[1], [0], [0], [1], [0, 0, 1, 1], [], []>} : vector<128x128xbf16>, vector<128x128xbf16>, vector<128x128xf32> -> vector<128x128xf32>
    %c0_22 = arith.constant 0 : index
    %c0_23 = arith.constant 0 : index
    %23 = vector.load %arg9[%c0_22, %c0_23] : memref<1x128xf32, #tpu.memory_space<vmem>>, vector<1x128xf32>
    %24 = vector.broadcast %23 : vector<1x128xf32> to vector<128x128xf32>
    %25 = arith.addf %22, %24 : vector<128x128xf32>
    %cst_24 = arith.constant 0.000000e+00 : f32
    %26 = vector.broadcast %cst_24 : f32 to vector<128x128xf32>
    %27 = arith.maximumf %25, %26 : vector<128x128xf32>
    %28 = arith.truncf %27 : vector<128x128xf32> to vector<128x128xbf16>
    %c0_25 = arith.constant 0 : index
    %c0_26 = arith.constant 0 : index
    %29 = vector.load %arg10[%c0_25, %c0_26] : memref<128x128xbf16, #tpu.memory_space<vmem>>, vector<128x128xbf16>
    %cst_27 = arith.constant dense<0.000000e+00> : vector<128x128xf32>
    %30 = tpu.matmul %28, %29, %cst_27 {dimension_numbers = #tpu.dot_dimension_numbers<[1], [0], [0], [1], [0, 0, 1, 1], [], []>} : vector<128x128xbf16>, vector<128x128xbf16>, vector<128x128xf32> -> vector<128x128xf32>
    %c0_28 = arith.constant 0 : index
    %c0_29 = arith.constant 0 : index
    %31 = vector.load %arg11[%c0_28, %c0_29] : memref<1x128xf32, #tpu.memory_space<vmem>>, vector<1x128xf32>
    %32 = vector.broadcast %31 : vector<1x128xf32> to vector<128x128xf32>
    %33 = arith.addf %30, %32 : vector<128x128xf32>
    %cst_30 = arith.constant dense<0xFF800000> : vector<128xf32>
    %34 = vector.multi_reduction <maximumf>, %33, %cst_30 [1] : vector<128x128xf32> to vector<128xf32>
    %35 = vector.shape_cast %34 : vector<128xf32> to vector<128x1xf32>
    %36 = vector.broadcast %35 : vector<128x1xf32> to vector<128x128xf32>
    %37 = arith.subf %33, %36 : vector<128x128xf32>
    %38 = math.exp %37 : vector<128x128xf32>
    %cst_31 = arith.constant dense<0.000000e+00> : vector<128xf32>
    %39 = vector.multi_reduction <add>, %38, %cst_31 [1] : vector<128x128xf32> to vector<128xf32>
    %40 = vector.shape_cast %39 : vector<128xf32> to vector<128x1xf32>
    %41 = math.log %40 : vector<128x1xf32>
    %42 = vector.broadcast %41 : vector<128x1xf32> to vector<128x128xf32>
    %43 = arith.subf %37, %42 : vector<128x128xf32>
    %c0_32 = arith.constant 0 : index
    %c0_33 = arith.constant 0 : index
    %44 = vector.load %arg12[%c0_32, %c0_33] : memref<128x128xf32, #tpu.memory_space<vmem>>, vector<128x128xf32>
    tpu.vector_store %arg12[%c0_32, %c0_33], %43 {strides = array<i32>} : memref<128x128xf32, #tpu.memory_space<vmem>>, vector<128x128xf32>,
    return
  }
  func.func @transform_0(%arg0: i32) -> (i32, i32, i32) {
    %c0_i32 = arith.constant 0 : i32
    %c0_i32_0 = arith.constant 0 : i32
    %c0_i32_1 = arith.constant 0 : i32
    return %c0_i32, %arg0, %c0_i32_0 : i32, i32, i32
  }
  func.func @transform_1(%arg0: i32) -> (i32, i32, i32) {
    %c0_i32 = arith.constant 0 : i32
    %c0_i32_0 = arith.constant 0 : i32
    %c0_i32_1 = arith.constant 0 : i32
    %c0_i32_2 = arith.constant 0 : i32
    return %c0_i32, %c0_i32_0, %c0_i32_1 : i32, i32, i32
  }
  func.func @transform_2(%arg0: i32) -> (i32, i32) {
    %c0_i32 = arith.constant 0 : i32
    %c0_i32_0 = arith.constant 0 : i32
    %c0_i32_1 = arith.constant 0 : i32
    return %c0_i32, %c0_i32_0 : i32, i32
  }
  func.func @transform_3(%arg0: i32) -> (i32, i32, i32) {
    %c0_i32 = arith.constant 0 : i32
    %c0_i32_0 = arith.constant 0 : i32
    %c0_i32_1 = arith.constant 0 : i32
    %c0_i32_2 = arith.constant 0 : i32
    return %c0_i32, %c0_i32_0, %c0_i32_1 : i32, i32, i32
  }
  func.func @transform_4(%arg0: i32) -> (i32, i32) {
    %c0_i32 = arith.constant 0 : i32
    %c0_i32_0 = arith.constant 0 : i32
    %c0_i32_1 = arith.constant 0 : i32
    return %c0_i32, %c0_i32_0 : i32, i32
  }
  func.func @transform_5(%arg0: i32) -> (i32, i32) {
    %c0_i32 = arith.constant 0 : i32
    %c0_i32_0 = arith.constant 0 : i32
    %c0_i32_1 = arith.constant 0 : i32
    return %c0_i32, %c0_i32_0 : i32, i32
  }
  func.func @transform_6(%arg0: i32) -> (i32, i32) {
    %c0_i32 = arith.constant 0 : i32
    %c0_i32_0 = arith.constant 0 : i32
    %c0_i32_1 = arith.constant 0 : i32
    return %c0_i32, %c0_i32_0 : i32, i32
  }
  func.func @transform_7(%arg0: i32) -> (i32, i32) {
    %c0_i32 = arith.constant 0 : i32
    %c0_i32_0 = arith.constant 0 : i32
    %c0_i32_1 = arith.constant 0 : i32
    return %c0_i32, %c0_i32_0 : i32, i32
  }
  func.func @transform_8(%arg0: i32) -> (i32, i32) {
    %c0_i32 = arith.constant 0 : i32
    %c0_i32_0 = arith.constant 0 : i32
    %c0_i32_1 = arith.constant 0 : i32
    return %c0_i32, %c0_i32_0 : i32, i32
  }
  func.func @transform_9(%arg0: i32) -> (i32, i32) {
    %c0_i32 = arith.constant 0 : i32
    %c0_i32_0 = arith.constant 0 : i32
    %c0_i32_1 = arith.constant 0 : i32
    return %c0_i32, %c0_i32_0 : i32, i32
  }
  func.func @transform_10(%arg0: i32) -> (i32, i32) {
    %c0_i32 = arith.constant 0 : i32
    %c0_i32_0 = arith.constant 0 : i32
    %c0_i32_1 = arith.constant 0 : i32
    return %c0_i32, %c0_i32_0 : i32, i32
  }
  func.func @transform_11(%arg0: i32) -> (i32, i32) {
    %c0_i32 = arith.constant 0 : i32
    %c0_i32_0 = arith.constant 0 : i32
    return %arg0, %c0_i32 : i32, i32
  }
}

</mosaic_0001>

<bundles_post_ra>
// kernel: convolutional_forward.1
= control target key start
LH: loop header
LB: loop body
LE: loop exit
PB: predicated region body
PF: predicated region fallthrough
CT: control target
= control target key end

     0   :  { %s8240_s17 = smov 0   ;;  %s11766_s0 = inlined_call_operand.vmem [shape: bf16[32,128,96], index: 0, kind: input, shape index: {}]   ;;  %s11767_s1 = inlined_call_operand.vmem [shape: bf16[5,96,256], index: 1, kind: input, shape index: {}]   ;;  %s11768_s2 = inlined_call_operand.vmem [shape: f32[1,128], index: 2, kind: input, shape index: {}]   ;;  %s11769_s3 = inlined_call_operand.vmem [shape: bf16[5,128,256], index: 3, kind: input, shape index: {}]   ;;  %s11770_s4 = inlined_call_operand.vmem [shape: f32[1,128], index: 4, kind: input, shape index: {}]   ;;  %s11771_s5 = inlined_call_operand.vmem [shape: bf16[640,128], index: 5, kind: input, shape index: {}]   ;;  %s11772_s6 = inlined_call_operand.vmem [shape: f32[1,128], index: 6, kind: input, shape index: {}]   ;;  %s11773_s7 = inlined_call_operand.vmem [shape: bf16[128,128], index: 7, kind: input, shape index: {}]   ;;  %s11774_s8 = inlined_call_operand.vmem [shape: f32[1,128], index: 8, kind: input, shape index: {}]   ;;  %s11775_s9 = inlined_call_operand.vmem [shape: bf16[128,128], index: 9, kind: input, shape index: {}]   ;;  %s11776_s10 = inlined_call_operand.vmem [shape: f32[1,128], index: 10, kind: input, shape index: {}]   ;;  %s11777_s11 = inlined_call_operand.vmem [shape: f32[128,128], index: 11, kind: output, shape index: {}]  }
   0x1 LB: > { %v5914_v0 = vld [vmem:[%s11767_s1 + $0xb0] sm:$0xf]  ;;  %v7639_v1 = vld [vmem:[%s11767_s1 + $0xb4] sm:$0xf0]  ;;  %v7638_v2 = vld [vmem:[%s11767_s1 + $0xb4] sm:$0xf]  ;;  %s8174_s17 = sphi %s8240_s17, %s44_s17  }
   0x2   : > { %v8254_v3 = vor.u32 %v7639_v1, %v5914_v0  ;;  %v5916_v4 = vld [vmem:[%s11767_s1 + $0xb8] sm:$0xf0]  ;;  %v6010_v5 = vld [vmem:[%s11767_s1 + $0x50] sm:$0xf]  ;;  %v7618_v6 = vld [vmem:[%s11767_s1 + $0x54] sm:$0xf0] }
   0x3   : > { %v8265_v7 = vor.u32 %v7638_v2, %v5916_v4  ;;  %v8267_v8 = vor.u32 %v7618_v6, %v6010_v5  ;;  %v7617_v9 = vld [vmem:[%s11767_s1 + $0x54] sm:$0xf]  ;;  %v6012_v10 = vld [vmem:[%s11767_s1 + $0x58] sm:$0xf0]  ;;  %v5906_v11 = vld [vmem:[%s11767_s1 + $0xa0] sm:$0xf] }
   0x4   : > { %237 = vmatpush.bf16.msra.mxu0 %v8254_v3  ;;  %v8279_v12 = vor.u32 %v7617_v9, %v6012_v10  ;;  %v7637_v13 = vld [vmem:[%s11767_s1 + $0xa4] sm:$0xf0]  ;;  %v7636_v14 = vld [vmem:[%s11767_s1 + $0xa4] sm:$0xf]  ;;  %v5908_v15 = vld [vmem:[%s11767_s1 + $0xa8] sm:$0xf0] }
   0x5   : > { %286 = vmatpush.bf16.msra.mxu1 %v8265_v7  ;;  %459 = vmatpush.bf16.msra.mxu2 %v8267_v8  ;;  %v8292_v16 = vor.u32 %v7637_v13, %v5906_v11  ;;  %v8294_v17 = vor.u32 %v7636_v14, %v5908_v15  ;;  %v6002_v18 = vld [vmem:[%s11767_s1 + $0x40] sm:$0xf]  ;;  %v7616_v19 = vld [vmem:[%s11767_s1 + $0x44] sm:$0xf0]  ;;  %v7615_v20 = vld [vmem:[%s11767_s1 + $0x44] sm:$0xf] }
   0x6   : > { %508 = vmatpush.bf16.msra.mxu3 %v8279_v12  ;;  %v8306_v21 = vor.u32 %v7616_v19, %v6002_v18  ;;  %v6004_v22 = vld [vmem:[%s11767_s1 + $0x48] sm:$0xf0]  ;;  %v5898_v23 = vld [vmem:[%s11767_s1 + $0x90] sm:$0xf]  ;;  %v7635_v24 = vld [vmem:[%s11767_s1 + $0x94] sm:$0xf0] }
   0x7   : > { %v8317_v25 = vor.u32 %v7615_v20, %v6004_v22  ;;  %v7634_v26 = vld [vmem:[%s11767_s1 + $0x94] sm:$0xf]  ;;  %v5900_v27 = vld [vmem:[%s11767_s1 + $0x98] sm:$0xf0]  ;;  %v5994_v28 = vld [vmem:[%s11767_s1 + $0x30] sm:$0xf]  ;;  %v8329_v29 = vor.u32 %v7635_v24, %v5898_v23 }
   0x8   : > { %238 = vmatpush.bf16.msra.mxu0 %v8292_v16  ;;  %v7614_v30 = vld [vmem:[%s11767_s1 + $0x34] sm:$0xf0]  ;;  %v7613_v31 = vld [vmem:[%s11767_s1 + $0x34] sm:$0xf]  ;;  %v5996_v32 = vld [vmem:[%s11767_s1 + $0x38] sm:$0xf0]  ;;  %v8342_v33 = vor.u32 %v7634_v26, %v5900_v27 }
   0x9   : > { %287 = vmatpush.bf16.msra.mxu1 %v8294_v17  ;;  %460 = vmatpush.bf16.msra.mxu2 %v8306_v21  ;;  %v8344_v34 = vor.u32 %v7614_v30, %v5994_v28  ;;  %v5890_v35 = vld [vmem:[%s11767_s1 + $0x80] sm:$0xf]  ;;  %v7633_v36 = vld [vmem:[%s11767_s1 + $0x84] sm:$0xf0]  ;;  %v7632_v37 = vld [vmem:[%s11767_s1 + $0x84] sm:$0xf]  ;;  %v8356_v38 = vor.u32 %v7613_v31, %v5996_v32 }
   0xa   : > { %509 = vmatpush.bf16.msra.mxu3 %v8317_v25  ;;  %v5892_v39 = vld [vmem:[%s11767_s1 + $0x88] sm:$0xf0]  ;;  %v5986_v40 = vld [vmem:[%s11767_s1 + $0x20] sm:$0xf]  ;;  %v7612_v41 = vld [vmem:[%s11767_s1 + $0x24] sm:$0xf0]  ;;  %v8374_v44 = vor.u32 %v7633_v36, %v5890_v35 }
   0xb   : > { %v7611_v42 = vld [vmem:[%s11767_s1 + $0x24] sm:$0xf]  ;;  %v5988_v43 = vld [vmem:[%s11767_s1 + $0x28] sm:$0xf0]  ;;  %v8378_v45 = vor.u32 %v7632_v37, %v5892_v39  ;;  %v8380_v46 = vor.u32 %v7612_v41, %v5986_v40  ;;  %v5882_v47 = vld [vmem:[%s11767_s1 + $0x70] sm:$0xf] }
   0xc   : > { %239 = vmatpush.bf16.msra.mxu0 %v8329_v29  ;;  %v7631_v48 = vld [vmem:[%s11767_s1 + $0x74] sm:$0xf0]  ;;  %v7630_v49 = vld [vmem:[%s11767_s1 + $0x74] sm:$0xf]  ;;  %v8392_v50 = vor.u32 %v7611_v42, %v5988_v43  ;;  %v5884_v51 = vld [vmem:[%s11767_s1 + $0x78] sm:$0xf0] }
   0xd   : > { %288 = vmatpush.bf16.msra.mxu1 %v8342_v33  ;;  %461 = vmatpush.bf16.msra.mxu2 %v8344_v34  ;;  %v5978_v52 = vld [vmem:[%s11767_s1 + $0x10] sm:$0xf]  ;;  %v7610_v53 = vld [vmem:[%s11767_s1 + $0x14] sm:$0xf0]  ;;  %v7609_v54 = vld [vmem:[%s11767_s1 + $0x14] sm:$0xf]  ;;  %v8410_v56 = vor.u32 %v7631_v48, %v5882_v47  ;;  %v8420_v59 = vor.u32 %v7630_v49, %v5884_v51 }
   0xe   : > { %510 = vmatpush.bf16.msra.mxu3 %v8356_v38  ;;  %v5980_v55 = vld [vmem:[%s11767_s1 + $0x18] sm:$0xf0]  ;;  %v5874_v57 = vld [vmem:[%s11767_s1 + $0x60] sm:$0xf]  ;;  %v7629_v58 = vld [vmem:[%s11767_s1 + $0x64] sm:$0xf0]  ;;  %v8422_v60 = vor.u32 %v7610_v53, %v5978_v52 }
   0xf   : > { %v7628_v61 = vld [vmem:[%s11767_s1 + $0x64] sm:$0xf]  ;;  %v5876_v62 = vld [vmem:[%s11767_s1 + $0x68] sm:$0xf0]  ;;  %s7598_s15 = sshll.u32 %s8174_s17, 7  ;;  %v8432_v63 = vor.u32 %v7609_v54, %v5980_v55  ;;  %v8458_v9 = vor.u32 %v7629_v58, %v5874_v57  ;;  %vm210_vm0 = vcmask 785408  }
  0x10   : > { %240 = vmatpush.bf16.msra.mxu0 %v8374_v44  ;;  %v5970_v0 = vld [vmem:[%s11767_s1] sm:$0xf]  ;;  %v7608_v1 = vld [vmem:[%s11767_s1 + $0x4] sm:$0xf0]  ;;  %v7607_v2 = vld [vmem:[%s11767_s1 + $0x4] sm:$0xf]  ;;  %s8446_s25 = scalar_lea.vmem %s11766_s0, %s7598_s15  ;;  %v8468_v13 = vor.u32 %v7628_v61, %v5876_v62 }
  0x11   : > { %289 = vmatpush.bf16.msra.mxu1 %v8378_v45  ;;  %462 = vmatpush.bf16.msra.mxu2 %v8380_v46  ;;  %v5972_v4 = vld [vmem:[%s11767_s1 + $0x8] sm:$0xf0]  ;;  %v6262_v5 = vld [vmem:[%s11767_s1 + $0x170] sm:$0xf]  ;;  %v7681_v6 = vld [vmem:[%s11767_s1 + $0x174] sm:$0xf0]  ;;  %v8470_v14 = vor.u32 %v7608_v1, %v5970_v0 }
  0x12   : > { %511 = vmatpush.bf16.msra.mxu3 %v8392_v50  ;;  %v7680_v10 = vld [vmem:[%s11767_s1 + $0x174] sm:$0xf]  ;;  %v6264_v11 = vld [vmem:[%s11767_s1 + $0x178] sm:$0xf0]  ;;  %v7620_v15 = vld [vmem:[%s8446_s25 + $0x40] sm:$0xff]  ;;  %v8477_v19 = vor.u32 %v7607_v2, %v5972_v4  ;;  %v8480_v22 = vor.u32 %v7681_v6, %v6262_v5  ;;  %s7712_s19 = sshll.u32 %s8174_s17, 6 }
  0x13   : > { %v6136_v18 = vld [vmem:[%s11767_s1 + $0x110] sm:$0xf]  ;;  %v7599_v20 = vld [vmem:[%s8446_s25] sm:$0xff]  ;;  %v7660_v23 = vld [vmem:[%s11767_s1 + $0x114] sm:$0xf0]  ;;  %v8488_v26 = vor.u32 %v7680_v10, %v6264_v11  ;;  %s9679_s20 = scalar_lea.vmem [#allocation2], %s7712_s19 }
  0x14   : > { %241 = vmatpush.bf16.msra.mxu0 %v8410_v56  ;;  %v7659_v24 = vld [vmem:[%s11767_s1 + $0x114] sm:$0xf]  ;;  %v6138_v27 = vld [vmem:[%s11767_s1 + $0x118] sm:$0xf0]  ;;  %v6254_v28 = vld [vmem:[%s11767_s1 + $0x160] sm:$0xf]  ;;  %v8508_v35 = vor.u32 %v7660_v23, %v6136_v18 }
  0x15   : > { %290 = vmatpush.bf16.msra.mxu1 %v8420_v59  ;;  %463 = vmatpush.bf16.msra.mxu2 %v8422_v60  ;;  %v7679_v30 = vld [vmem:[%s11767_s1 + $0x164] sm:$0xf0]  ;;  %v7678_v31 = vld [vmem:[%s11767_s1 + $0x164] sm:$0xf]  ;;  %v6256_v32 = vld [vmem:[%s11767_s1 + $0x168] sm:$0xf0]  ;;  %v8512_v36 = vor.u32 %v7659_v24, %v6138_v27 }
  0x16   : > { %512 = vmatpush.bf16.msra.mxu3 %v8432_v63  ;;  %v8514_v37 = vor.u32 %v7679_v30, %v6254_v28  ;;  %v6128_v39 = vld [vmem:[%s11767_s1 + $0x100] sm:$0xf]  ;;  %v7658_v40 = vld [vmem:[%s11767_s1 + $0x104] sm:$0xf0]  ;;  %v8524_v41 = vor.u32 %v7678_v31, %v6256_v32  ;;  %v7657_v42 = vld [vmem:[%s11767_s1 + $0x104] sm:$0xf] }
  0x17   : > { %v6130_v43 = vld [vmem:[%s11767_s1 + $0x108] sm:$0xf0]  ;;  %v8536_v47 = vor.u32 %v7658_v40, %v6128_v39  ;;  %v6246_v48 = vld [vmem:[%s11767_s1 + $0x150] sm:$0xf]  ;;  %v7677_v49 = vld [vmem:[%s11767_s1 + $0x154] sm:$0xf0] }
  0x18   : > { %242 = vmatpush.bf16.msra.mxu0 %v8458_v9  ;;  %v7676_v51 = vld [vmem:[%s11767_s1 + $0x154] sm:$0xf]  ;;  %v8549_v52 = vor.u32 %v7657_v42, %v6130_v43  ;;  %v8551_v53 = vor.u32 %v7677_v49, %v6246_v48  ;;  %v6248_v54 = vld [vmem:[%s11767_s1 + $0x158] sm:$0xf0]  ;;  %v6120_v55 = vld [vmem:[%s11767_s1 + $0xf0] sm:$0xf] }
  0x19   : > { %291 = vmatpush.bf16.msra.mxu1 %v8468_v13  ;;  %464 = vmatpush.bf16.msra.mxu2 %v8470_v14  ;;  %v7656_v57 = vld [vmem:[%s11767_s1 + $0xf4] sm:$0xf0]  ;;  %v8563_v58 = vor.u32 %v7676_v51, %v6248_v54  ;;  %v7655_v61 = vld [vmem:[%s11767_s1 + $0xf4] sm:$0xf]  ;;  %v6122_v62 = vld [vmem:[%s11767_s1 + $0xf8] sm:$0xf0] }
  0x1a   : > { %513 = vmatpush.bf16.msra.mxu3 %v8477_v19  ;;  %v8572_v0 = vor.u32 %v7656_v57, %v6120_v55  ;;  %v8576_v1 = vor.u32 %v7655_v61, %v6122_v62  ;;  %v7621_v2 = vld [vmem:[%s8446_s25 + $0x48] sm:$0xff]  ;;  %v7622_v5 = vld [vmem:[%s8446_s25 + $0x50] sm:$0xff]  ;;  %v6238_v10 = vld [vmem:[%s11767_s1 + $0x140] sm:$0xf]  ;;  %s44_s17 = sadd.s32 1, %s8174_s17  }
  0x1b   : > { %5920 = vmatmul.msk.bf16.vlgmr.msra.gmra.mxu0 %vm210_vm0, %v7620_v15  ;;  %v7600_v4 = vld [vmem:[%s8446_s25 + $0x8] sm:$0xff]  ;;  %v7601_v6 = vld [vmem:[%s8446_s25 + $0x10] sm:$0xff]  ;;  %v6112_v23 = vld [vmem:[%s11767_s1 + $0xe0] sm:$0xf]  ;;  %p41_p0 = scmp.ge.s32.totalorder %s44_s17, 14  }
  0x1c   : > { %5928 = vmatmul.msk.bf16.vlgmr.msra.gmra.mxu1 %vm210_vm0, %v7620_v15  ;;  %6016 = vmatmul.msk.bf16.vlgmr.msra.gmra.mxu2 %vm210_vm0, %v7599_v20  ;;  %v7675_v11 = vld [vmem:[%s11767_s1 + $0x144] sm:$0xf0]  ;;  %v7674_v15 = vld [vmem:[%s11767_s1 + $0x144] sm:$0xf]  ;;  %v6114_v31 = vld [vmem:[%s11767_s1 + $0xe8] sm:$0xf0] }
  0x1d   : > { %1001 = vmatpush.bf16.msrb.mxu2 %v8480_v22  ;;  %6024 = vmatmul.msk.bf16.vlgmr.msra.gmra.mxu3 %vm210_vm0, %v7599_v20  ;;  %v8602_v18 = vor.u32 %v7675_v11, %v6238_v10  ;;  %v6240_v20 = vld [vmem:[%s11767_s1 + $0x148] sm:$0xf0]  ;;  %v7654_v24 = vld [vmem:[%s11767_s1 + $0xe4] sm:$0xf0]  ;;  %v7653_v30 = vld [vmem:[%s11767_s1 + $0xe4] sm:$0xf] }
  0x1e   : > { %1050 = vmatpush.bf16.msrb.mxu3 %v8488_v26  ;;  %714 = vmatpush.bf16.msrb.mxu0 %v8508_v35  ;;  %v8613_v27 = vor.u32 %v7674_v15, %v6240_v20  ;;  %v8615_v28 = vor.u32 %v7654_v24, %v6112_v23  ;;  %v8624_v32 = vor.u32 %v7653_v30, %v6114_v31  ;;  %v7623_v39 = vld [vmem:[%s8446_s25 + $0x58] sm:$0xff]  ;;  %v6230_v42 = vld [vmem:[%s11767_s1 + $0x130] sm:$0xf]  ;;  %v7672_v48 = vld [vmem:[%s11767_s1 + $0x134] sm:$0xf]  ;;  %s9774_s21 = smov (%p41_p0), 0  }
  0x1f   : > { %763 = vmatpush.bf16.msrb.mxu1 %v8512_v36  ;;  %v7602_v40 = vld [vmem:[%s8446_s25 + $0x18] sm:$0xff]  ;;  %v6104_v54 = vld [vmem:[%s11767_s1 + $0xd0] sm:$0xf]  ;;  %v7651_v62 = vld [vmem:[%s11767_s1 + $0xd4] sm:$0xf] }
  0x20   : > { %v7673_v43 = vld [vmem:[%s11767_s1 + $0x134] sm:$0xf0]  ;;  %v6232_v51 = vld [vmem:[%s11767_s1 + $0x138] sm:$0xf0]  ;;  %v6222_v10 = vld [vmem:[%s11767_s1 + $0x120] sm:$0xf] }
  0x21   : > { %1002 = vmatpush.bf16.msrb.mxu2 %v8514_v37  ;;  %v8644_v49 = vor.u32 %v7673_v43, %v6230_v42  ;;  %v7652_v55 = vld [vmem:[%s11767_s1 + $0xd4] sm:$0xf0]  ;;  %v8655_v57 = vor.u32 %v7672_v48, %v6232_v51  ;;  %v7671_v11 = vld [vmem:[%s11767_s1 + $0x124] sm:$0xf0]  ;;  %v7670_v15 = vld [vmem:[%s11767_s1 + $0x124] sm:$0xf] }
  0x22   : > { %1051 = vmatpush.bf16.msrb.mxu3 %v8524_v41  ;;  %715 = vmatpush.bf16.msrb.mxu0 %v8536_v47  ;;  %v8657_v61 = vor.u32 %v7652_v55, %v6104_v54  ;;  %v8686_v20 = vor.u32 %v7671_v11, %v6222_v10  ;;  %v6224_v23 = vld [vmem:[%s11767_s1 + $0x128] sm:$0xf0]  ;;  %v6096_v24 = vld [vmem:[%s11767_s1 + $0xc0] sm:$0xf]  ;;  %v7650_v30 = vld [vmem:[%s11767_s1 + $0xc4] sm:$0xf0] }
  0x23   : > { %764 = vmatpush.bf16.msrb.mxu1 %v8549_v52  ;;  %v8697_v31 = vor.u32 %v7670_v15, %v6224_v23  ;;  %v6098_v42 = vld [vmem:[%s11767_s1 + $0xc8] sm:$0xf0]  ;;  %v7699_v54 = vld [vmem:[%s11767_s1 + $0x1c4] sm:$0xf] }
  0x24   : > { %v7625_v48 = vld [vmem:[%s8446_s25 + $0x68] sm:$0xff]  ;;  %v8783_v10 = vld [vmem:[%s8446_s25 + $0xc0] sm:$0xff] }
  0x25   : > { %1003 = vmatpush.bf16.msrb.mxu2 %v8551_v53  ;;  %v7604_v51 = vld [vmem:[%s8446_s25 + $0x28] sm:$0xff]  ;;  %11877 = vst [vmem:[#allocation4_spill] sm:$0xff] %v8783_v10 }
  0x26   : > { %1052 = vmatpush.bf16.msrb.mxu3 %v8563_v58  ;;  %716 = vmatpush.bf16.msrb.mxu0 %v8572_v0 }
  0x27   : > { %765 = vmatpush.bf16.msrb.mxu1 %v8576_v1 }
  0x29   : > { %1004 = vmatpush.bf16.msrb.mxu2 %v8602_v18 }
  0x2a   : > { %1053 = vmatpush.bf16.msrb.mxu3 %v8613_v27  ;;  %717 = vmatpush.bf16.msrb.mxu0 %v8615_v28 }
  0x2b   : > { %5921 = vmatmul.msk.bf16.gmra.mxu0 %vm210_vm0, %v7621_v2  ;;  %766 = vmatpush.bf16.msrb.mxu1 %v8624_v32 }
  0x2c   : > { %5929 = vmatmul.msk.bf16.gmra.mxu1 %vm210_vm0, %v7621_v2  ;;  %6017 = vmatmul.msk.bf16.gmra.mxu2 %vm210_vm0, %v7600_v4  ;;  %v6106_v2 = vld [vmem:[%s11767_s1 + $0xd8] sm:$0xf0] }
  0x2d   : > { %6025 = vmatmul.msk.bf16.gmra.mxu3 %vm210_vm0, %v7600_v4  ;;  %1005 = vmatpush.bf16.msrb.mxu2 %v8644_v49  ;;  %v8666_v4 = vor.u32 %v7651_v62, %v6106_v2  ;;  %v6382_v62 = vld [vmem:[%s11767_s1 + $0x1c8] sm:$0xf0] }
  0x2e   : > { %1054 = vmatpush.bf16.msrb.mxu3 %v8655_v57  ;;  %718 = vmatpush.bf16.msrb.mxu0 %v8657_v61  ;;  %v8775_v2 = vor.u32 %v7699_v54, %v6382_v62  ;;  %v8850_v62 = vld [vmem:[%s8446_s25 + $0x90] sm:$0xff] }
  0x2f   : > { %767 = vmatpush.bf16.msrb.mxu1 %v8666_v4 }
  0x31   : > { %1006 = vmatpush.bf16.msrb.mxu2 %v8686_v20 }
  0x32   : > { %1055 = vmatpush.bf16.msrb.mxu3 %v8697_v31 }
  0x35   : > { %1434 = vmatpush.bf16.msra.mxu2 %v8254_v3  ;;  %v7626_v3 = vld [vmem:[%s8446_s25 + $0x70] sm:$0xff] }
  0x36   : > { %1483 = vmatpush.bf16.msra.mxu3 %v8265_v7  ;;  %v7605_v7 = vld [vmem:[%s8446_s25 + $0x30] sm:$0xff] }
  0x39   : > { %1435 = vmatpush.bf16.msra.mxu2 %v8292_v16  ;;  %v6388_v16 = vld [vmem:[%s11767_s1 + $0x1d0] sm:$0xf] }
  0x3a   : > { %1484 = vmatpush.bf16.msra.mxu3 %v8294_v17  ;;  %v7702_v17 = vld [vmem:[%s11767_s1 + $0x1d4] sm:$0xf0] }
  0x3b   : > { %5922 = vmatmul.msk.bf16.gmra.mxu0 %vm210_vm0, %v7622_v5 }
  0x3c   : > { %5930 = vmatmul.msk.bf16.gmra.mxu1 %vm210_vm0, %v7622_v5  ;;  %6018 = vmatmul.msk.bf16.gmra.mxu2 %vm210_vm0, %v7601_v6  ;;  %v7624_v5 = vld [vmem:[%s8446_s25 + $0x60] sm:$0xff] }
  0x3d   : > { %6026 = vmatmul.msk.bf16.gmra.mxu3 %vm210_vm0, %v7601_v6  ;;  %v7603_v6 = vld [vmem:[%s8446_s25 + $0x20] sm:$0xff]  ;;  %1436 = vmatpush.bf16.msra.mxu2 %v8329_v29  ;;  %v7701_v29 = vld [vmem:[%s11767_s1 + $0x1d4] sm:$0xf] }
  0x3e   : > { %1485 = vmatpush.bf16.msra.mxu3 %v8342_v33  ;;  %v8746_v33 = vor.u32 %v7702_v17, %v6388_v16 }
  0x41   : > { %1437 = vmatpush.bf16.msra.mxu2 %v8374_v44  ;;  %v6390_v44 = vld [vmem:[%s11767_s1 + $0x1d8] sm:$0xf0] }
  0x42   : > { %1486 = vmatpush.bf16.msra.mxu3 %v8378_v45  ;;  %v8751_v45 = vor.u32 %v7701_v29, %v6390_v44  ;;  %v6374_v29 = vld [vmem:[%s11767_s1 + $0x1b8] sm:$0xf0] }
  0x45   : > { %1438 = vmatpush.bf16.msra.mxu2 %v8410_v56  ;;  %v7627_v56 = vld [vmem:[%s8446_s25 + $0x78] sm:$0xff] }
  0x46   : > { %1487 = vmatpush.bf16.msra.mxu3 %v8420_v59  ;;  %v7606_v59 = vld [vmem:[%s8446_s25 + $0x38] sm:$0xff] }
  0x49   : > { %1439 = vmatpush.bf16.msra.mxu2 %v8458_v9  ;;  %v6380_v9 = vld [vmem:[%s11767_s1 + $0x1c0] sm:$0xf] }
  0x4a   : > { %1488 = vmatpush.bf16.msra.mxu3 %v8468_v13  ;;  %v7700_v13 = vld [vmem:[%s11767_s1 + $0x1c4] sm:$0xf0] }
  0x4b   : > { %5923 = vmatmul.msk.bf16.gmra.mxu0 %vm210_vm0, %v7623_v39  ;;  %v8770_v55 = vor.u32 %v7700_v13, %v6380_v9 }
  0x4c   : > { %5931 = vmatmul.msk.bf16.gmra.mxu1 %vm210_vm0, %v7623_v39  ;;  %6019 = vmatmul.msk.bf16.gmra.mxu2 %vm210_vm0, %v7602_v40  ;;  %v8699_v39 = vor.u32 %v7650_v30, %v6096_v24 }
  0x4d   : > { %6027 = vmatmul.msk.bf16.gmra.mxu3 %vm210_vm0, %v7602_v40  ;;  %v7649_v40 = vld [vmem:[%s11767_s1 + $0xc4] sm:$0xf] }
  0x4e   : > { %v8708_v43 = vor.u32 %v7649_v40, %v6098_v42  ;;  %719 = vmatpush.bf16.msrb.mxu0 %v8699_v39 }
  0x50   : > { %768 = vmatpush.bf16.msrb.mxu1 %v8708_v43 }
  0x52   : > { %1288 = vmatpush.bf16.msra.mxu0 %v8746_v33 }
  0x54   : > { %1337 = vmatpush.bf16.msra.mxu1 %v8751_v45 }
  0x56   : > { %1289 = vmatpush.bf16.msra.mxu0 %v8770_v55 }
  0x58   : > { %1338 = vmatpush.bf16.msra.mxu1 %v8775_v2 }
  0x5b   : > { %5924 = vmatmul.msk.bf16.gmra.mxu0 %vm210_vm0, %v7624_v5 }
  0x5c   : > { %5932 = vmatmul.msk.bf16.gmra.mxu1 %vm210_vm0, %v7624_v5  ;;  %6020 = vmatmul.msk.bf16.gmra.mxu2 %vm210_vm0, %v7603_v6  ;;  %v8780_v5 = vld [vmem:[%s8446_s25 + $0x80] sm:$0xff] }
  0x5d   : > { %6028 = vmatmul.msk.bf16.gmra.mxu3 %vm210_vm0, %v7603_v6 }
  0x6b   : > { %5925 = vmatmul.msk.bf16.gmra.mxu0 %vm210_vm0, %v7625_v48 }
  0x6c   : > { %5933 = vmatmul.msk.bf16.gmra.mxu1 %vm210_vm0, %v7625_v48  ;;  %6021 = vmatmul.msk.bf16.gmra.mxu2 %vm210_vm0, %v7604_v51  ;;  %v8804_v48 = vld [vmem:[%s8446_s25 + $0x88] sm:$0xff] }
  0x6d   : > { %6029 = vmatmul.msk.bf16.gmra.mxu3 %vm210_vm0, %v7604_v51 }
  0x7b   : > { %5926 = vmatmul.msk.bf16.gmra.mxu0 %vm210_vm0, %v7626_v3 }
  0x7c   : > { %5934 = vmatmul.msk.bf16.gmra.mxu1 %vm210_vm0, %v7626_v3  ;;  %6022 = vmatmul.msk.bf16.gmra.mxu2 %vm210_vm0, %v7605_v7 }
  0x7d   : > { %6030 = vmatmul.msk.bf16.gmra.mxu3 %vm210_vm0, %v7605_v7  ;;  %v8809_v7 = vld [vmem:[%s8446_s25 + $0xc8] sm:$0xff] }
  0x7e   : > { %11878 = vst [vmem:[#allocation5_spill] sm:$0xff] %v8809_v7 }
  0x8b   : > { %5927 = vmatmul.msk.bf16.gmra.mxu0 %vm210_vm0, %v7627_v56 }
  0x8c   : > { %5935 = vmatmul.msk.bf16.gmra.mxu1 %vm210_vm0, %v7627_v56  ;;  %6023 = vmatmul.msk.bf16.gmra.mxu2 %vm210_vm0, %v7606_v59 }
  0x8d   : > { %6031 = vmatmul.msk.bf16.gmra.mxu3 %vm210_vm0, %v7606_v59 }
  0x98   : > { %v244_v6 = vpop.f32.mrf.mxu0 }
  0x99   : > { %v293_v11 = vpop.f32.mrf.mxu1 }
  0x9b   : > { %6142 = vmatmul.msk.bf16.vlgmr.msrb.gmra.mxu0 %vm210_vm0, %v8780_v5 }
  0x9c   : > { %6150 = vmatmul.msk.bf16.vlgmr.msrb.gmra.mxu1 %vm210_vm0, %v8780_v5  ;;  %6268 = vmatmul.msk.bf16.vlgmr.msrb.gmra.mxu2 %vm210_vm0, %v8783_v10 }
  0x9d   : > { %6276 = vmatmul.msk.bf16.vlgmr.msrb.gmra.mxu3 %vm210_vm0, %v8783_v10  ;;  %1630 = vmatpush.bf16.msrb.mxu2 %v8508_v35 }
  0x9e   : > { %1679 = vmatpush.bf16.msrb.mxu3 %v8512_v36 }
  0x9f   : > { %v466_v15 = vpop.f32.mrf.mxu2 }
  0xa0   : > { %v8795_v23 = vadd.f32 %v466_v15, %v244_v6  ;;  %v515_v24 = vpop.f32.mrf.mxu3  ;;  %v246_v30 = vpop.f32.mrf.mxu0  ;;  %v8855_v15 = vld [vmem:[%s8446_s25 + $0xd0] sm:$0xff] }
  0xa1   : > { %v8797_v40 = vadd.f32 %v515_v24, %v293_v11  ;;  %v295_v42 = vpop.f32.mrf.mxu1  ;;  %1631 = vmatpush.bf16.msrb.mxu2 %v8536_v47  ;;  %v6372_v47 = vld [vmem:[%s11767_s1 + $0x1b0] sm:$0xf]  ;;  %11879 = vst [vmem:[#allocation6_spill] sm:$0xff] %v8855_v15 }
  0xa2   : > { %1680 = vmatpush.bf16.msrb.mxu3 %v8549_v52  ;;  %v7698_v52 = vld [vmem:[%s11767_s1 + $0x1b4] sm:$0xf0] }
  0xa5   : > { %1632 = vmatpush.bf16.msrb.mxu2 %v8572_v0  ;;  %v7697_v0 = vld [vmem:[%s11767_s1 + $0x1b4] sm:$0xf] }
  0xa6   : > { %1681 = vmatpush.bf16.msrb.mxu3 %v8576_v1  ;;  %v8823_v1 = vor.u32 %v7698_v52, %v6372_v47  ;;  %v8831_v44 = vor.u32 %v7697_v0, %v6374_v29  ;;  %v7695_v47 = vld [vmem:[%s11767_s1 + $0x1a4] sm:$0xf]  ;;  %v6366_v0 = vld [vmem:[%s11767_s1 + $0x1a8] sm:$0xf0] }
  0xa7   : > { %v468_v35 = vpop.f32.mrf.mxu2  ;;  %v8885_v29 = vor.u32 %v7695_v47, %v6366_v0  ;;  %v6356_v47 = vld [vmem:[%s11767_s1 + $0x190] sm:$0xf]  ;;  %v7694_v0 = vld [vmem:[%s11767_s1 + $0x194] sm:$0xf0] }
  0xa8   : > { %v8806_v36 = vadd.f32 %v468_v35, %v246_v30  ;;  %v517_v51 = vpop.f32.mrf.mxu3  ;;  %v249_v3 = vpop.f32.mrf.mxu0  ;;  %1290 = vmatpush.bf16.msra.mxu0 %v8823_v1  ;;  %1339 = vmatpush.bf16.msra.mxu1 %v8831_v44 }
  0xa9   : > { %v8811_v16 = vadd.f32 %v517_v51, %v295_v42  ;;  %v298_v17 = vpop.f32.mrf.mxu1  ;;  %1633 = vmatpush.bf16.msrb.mxu2 %v8615_v28 }
  0xaa   : > { %1682 = vmatpush.bf16.msrb.mxu3 %v8624_v32 }
  0xab   : > { %6143 = vmatmul.msk.bf16.gmra.mxu0 %vm210_vm0, %v8804_v48 }
  0xac   : > { %6151 = vmatmul.msk.bf16.gmra.mxu1 %vm210_vm0, %v8804_v48  ;;  %6269 = vmatmul.msk.bf16.gmra.mxu2 %vm210_vm0, %v8809_v7 }
  0xad   : > { %6277 = vmatmul.msk.bf16.gmra.mxu3 %vm210_vm0, %v8809_v7  ;;  %1634 = vmatpush.bf16.msrb.mxu2 %v8657_v61 }
  0xae   : > { %1683 = vmatpush.bf16.msrb.mxu3 %v8666_v4  ;;  %1340 = vmatpush.bf16.msra.mxu1 %v8885_v29 }
  0xaf   : > { %v471_v28 = vpop.f32.mrf.mxu2 }
  0xb0   : > { %v8843_v32 = vadd.f32 %v471_v28, %v249_v3  ;;  %v520_v56 = vpop.f32.mrf.mxu3  ;;  %v251_v59 = vpop.f32.mrf.mxu0  ;;  %v6364_v3 = vld [vmem:[%s11767_s1 + $0x1a0] sm:$0xf] }
  0xb1   : > { %v8845_v9 = vadd.f32 %v520_v56, %v298_v17  ;;  %v300_v13 = vpop.f32.mrf.mxu1  ;;  %1635 = vmatpush.bf16.msrb.mxu2 %v8699_v39  ;;  %v7696_v17 = vld [vmem:[%s11767_s1 + $0x1a4] sm:$0xf0]  ;;  %v8890_v56 = vld [vmem:[%s8446_s25 + $0x98] sm:$0xff] }
  0xb2   : > { %1684 = vmatpush.bf16.msrb.mxu3 %v8708_v43  ;;  %v8880_v52 = vor.u32 %v7696_v17, %v6364_v3  ;;  %11880 = vst [vmem:[#allocation7_spill] sm:$0xff] %v8890_v56 }
  0xb4   : > { %1291 = vmatpush.bf16.msra.mxu0 %v8880_v52 }
  0xb7   : > { %v473_v54 = vpop.f32.mrf.mxu2 }
  0xb8   : > { %v8852_v6 = vadd.f32 %v473_v54, %v251_v59  ;;  %v522_v61 = vpop.f32.mrf.mxu3  ;;  %v254_v11 = vpop.f32.mrf.mxu0 }
  0xb9   : > { %v8857_v4 = vadd.f32 %v522_v61, %v300_v13  ;;  %v303_v24 = vpop.f32.mrf.mxu1  ;;  %v8895_v61 = vld [vmem:[%s8446_s25 + $0xd8] sm:$0xff] }
  0xba   : > { %11881 = vst [vmem:[#allocation8_spill] sm:$0xff] %v8895_v61 }
  0xbb   : > { %6144 = vmatmul.msk.bf16.gmra.mxu0 %vm210_vm0, %v8850_v62 }
  0xbc   : > { %6152 = vmatmul.msk.bf16.gmra.mxu1 %vm210_vm0, %v8850_v62  ;;  %6270 = vmatmul.msk.bf16.gmra.mxu2 %vm210_vm0, %v8855_v15 }
  0xbd   : > { %6278 = vmatmul.msk.bf16.gmra.mxu3 %vm210_vm0, %v8855_v15 }
  0xbf   : > { %v476_v39 = vpop.f32.mrf.mxu2 }
  0xc0   : > { %v8867_v43 = vadd.f32 %v476_v39, %v254_v11  ;;  %v525_v30 = vpop.f32.mrf.mxu3  ;;  %v256_v42 = vpop.f32.mrf.mxu0 }
  0xc1   : > { %v8869_v35 = vadd.f32 %v525_v30, %v303_v24  ;;  %v305_v51 = vpop.f32.mrf.mxu1 }
  0xc7   : > { %v478_v28 = vpop.f32.mrf.mxu2 }
  0xc8   : > { %v8892_v59 = vadd.f32 %v478_v28, %v256_v42  ;;  %v527_v13 = vpop.f32.mrf.mxu3  ;;  %v259_v54 = vpop.f32.mrf.mxu0  ;;  %v7693_v28 = vld [vmem:[%s11767_s1 + $0x194] sm:$0xf] }
  0xc9   : > { %v8897_v11 = vadd.f32 %v527_v13, %v305_v51  ;;  %v308_v24 = vpop.f32.mrf.mxu1  ;;  %v8920_v13 = vor.u32 %v7694_v0, %v6356_v47  ;;  %v8935_v47 = vld [vmem:[%s8446_s25 + $0xe0] sm:$0xff] }
  0xca   : > { %11887 = vst [vmem:[#allocation14_spill] sm:$0xff] %v8935_v47 }
  0xcb   : > { %11882 = vst [vmem:[#allocation9_spill] sm:$0xff] %v8897_v11  ;;  %6145 = vmatmul.msk.bf16.gmra.mxu0 %vm210_vm0, %v8890_v56 }
  0xcc   : > { %6153 = vmatmul.msk.bf16.gmra.mxu1 %vm210_vm0, %v8890_v56  ;;  %6271 = vmatmul.msk.bf16.gmra.mxu2 %vm210_vm0, %v8895_v61 }
  0xcd   : > { %6279 = vmatmul.msk.bf16.gmra.mxu3 %vm210_vm0, %v8895_v61  ;;  %1292 = vmatpush.bf16.msra.mxu0 %v8920_v13 }
  0xcf   : > { %v481_v39 = vpop.f32.mrf.mxu2 }
  0xd0   : > { %v8907_v30 = vadd.f32 %v481_v39, %v259_v54  ;;  %v530_v42 = vpop.f32.mrf.mxu3  ;;  %v261_v51 = vpop.f32.mrf.mxu0  ;;  %v6358_v54 = vld [vmem:[%s11767_s1 + $0x198] sm:$0xf0] }
  0xd1   : > { %v8909_v3 = vadd.f32 %v530_v42, %v308_v24  ;;  %v310_v17 = vpop.f32.mrf.mxu1  ;;  %v8925_v24 = vor.u32 %v7693_v28, %v6358_v54  ;;  %v8930_v42 = vld [vmem:[%s8446_s25 + $0xa0] sm:$0xff] }
  0xd2   : > { %11883 = vst [vmem:[#allocation10_spill] sm:$0xff] %v8907_v30  ;;  %v8957_v30 = vld [vmem:[%s8446_s25 + $0xe8] sm:$0xff] }
  0xd3   : > { %11884 = vst [vmem:[#allocation11_spill] sm:$0xff] %v8909_v3  ;;  %1341 = vmatpush.bf16.msra.mxu1 %v8925_v24 }
  0xd4   : > { %11885 = vst [vmem:[#allocation12_spill] sm:$0xff] %v8930_v42 }
  0xd5   : > { %11890 = vst [vmem:[#allocation17_spill] sm:$0xff] %v8957_v30 }
  0xd7   : > { %v483_v39 = vpop.f32.mrf.mxu2 }
  0xd8   : > { %v8932_v61 = vadd.f32 %v483_v39, %v261_v51  ;;  %v532_v15 = vpop.f32.mrf.mxu3  ;;  %v264_v7 = vpop.f32.mrf.mxu0 }
  0xd9   : > { %v8937_v0 = vadd.f32 %v532_v15, %v310_v17  ;;  %v313_v10 = vpop.f32.mrf.mxu1 }
  0xda   : > { %11886 = vst [vmem:[#allocation13_spill] sm:$0xff] %v8932_v61  ;;  %v8952_v61 = vld [vmem:[%s8446_s25 + $0xa8] sm:$0xff] }
  0xdb   : > { %11888 = vst [vmem:[#allocation15_spill] sm:$0xff] %v8937_v0  ;;  %6146 = vmatmul.msk.bf16.gmra.mxu0 %vm210_vm0, %v8930_v42 }
  0xdc   : > { %6154 = vmatmul.msk.bf16.gmra.mxu1 %vm210_vm0, %v8930_v42  ;;  %6272 = vmatmul.msk.bf16.gmra.mxu2 %vm210_vm0, %v8935_v47  ;;  %11889 = vst [vmem:[#allocation16_spill] sm:$0xff] %v8952_v61 }
  0xdd   : > { %6280 = vmatmul.msk.bf16.gmra.mxu3 %vm210_vm0, %v8935_v47 }
  0xdf   : > { %v486_v51 = vpop.f32.mrf.mxu2 }
  0xe0   : > { %v8947_v28 = vadd.f32 %v486_v51, %v264_v7  ;;  %v535_v54 = vpop.f32.mrf.mxu3  ;;  %v266_v15 = vpop.f32.mrf.mxu0  ;;  %v6348_v7 = vld [vmem:[%s11767_s1 + $0x180] sm:$0xf] }
  0xe1   : > { %v8949_v17 = vadd.f32 %v535_v54, %v313_v10  ;;  %v315_v39 = vpop.f32.mrf.mxu1  ;;  %v7692_v10 = vld [vmem:[%s11767_s1 + $0x184] sm:$0xf0] }
  0xe2   : > { %v8970_v51 = vor.u32 %v7692_v10, %v6348_v7 }
  0xe4   : > { %1293 = vmatpush.bf16.msra.mxu0 %v8970_v51 }
  0xe7   : > { %v488_v0 = vpop.f32.mrf.mxu2 }
  0xe8   : > { %v8954_v56 = vadd.f32 %v488_v0, %v266_v15  ;;  %v537_v42 = vpop.f32.mrf.mxu3  ;;  %v269_v3 = vpop.f32.mrf.mxu0  ;;  %v7691_v0 = vld [vmem:[%s11767_s1 + $0x184] sm:$0xf]  ;;  %1532 = vmatpush.bf16.msrb.mxu0 %v8267_v8 }
  0xe9   : > { %v8959_v11 = vadd.f32 %v537_v42, %v315_v39  ;;  %v318_v47 = vpop.f32.mrf.mxu1  ;;  %v6350_v42 = vld [vmem:[%s11767_s1 + $0x188] sm:$0xf0] }
  0xea   : > { %v8977_v54 = vor.u32 %v7691_v0, %v6350_v42 }
  0xeb   : > { %6147 = vmatmul.msk.bf16.gmra.mxu0 %vm210_vm0, %v8952_v61 }
  0xec   : > { %6155 = vmatmul.msk.bf16.gmra.mxu1 %vm210_vm0, %v8952_v61  ;;  %6273 = vmatmul.msk.bf16.gmra.mxu2 %vm210_vm0, %v8957_v30  ;;  %v8997_v61 = vld [vmem:[%s8446_s25 + $0xb0] sm:$0xff] }
  0xed   : > { %6281 = vmatmul.msk.bf16.gmra.mxu3 %vm210_vm0, %v8957_v30  ;;  %1342 = vmatpush.bf16.msra.mxu1 %v8977_v54  ;;  %11891 = vst [vmem:[#allocation18_spill] sm:$0xff] %v8997_v61 }
  0xee   : > { %1533 = vmatpush.bf16.msrb.mxu0 %v8306_v21 }
  0xef   : > { %v491_v15 = vpop.f32.mrf.mxu2 }
  0xf0   : > { %v8989_v39 = vadd.f32 %v491_v15, %v269_v3  ;;  %v540_v7 = vpop.f32.mrf.mxu3  ;;  %v271_v10 = vpop.f32.mrf.mxu0  ;;  %v9003_v15 = vld [vmem:[%s8446_s25 + $0xf0] sm:$0xff] }
  0xf1   : > { %1581 = vmatpush.bf16.msrb.mxu1 %v8279_v12  ;;  %v8991_v0 = vadd.f32 %v540_v7, %v318_v47  ;;  %v320_v42 = vpop.f32.mrf.mxu1  ;;  %11892 = vst [vmem:[#allocation19_spill] sm:$0xff] %v9003_v15 }
  0xf2   : > { %1534 = vmatpush.bf16.msrb.mxu0 %v8344_v34 }
  0xf5   : > { %1582 = vmatpush.bf16.msrb.mxu1 %v8317_v25 }
  0xf6   : > { %1535 = vmatpush.bf16.msrb.mxu0 %v8380_v46 }
  0xf7   : > { %v493_v30 = vpop.f32.mrf.mxu2 }
  0xf8   : > { %v9000_v8 = vadd.f32 %v493_v30, %v271_v10  ;;  %v542_v12 = vpop.f32.mrf.mxu3  ;;  %v274_v3 = vpop.f32.mrf.mxu0  ;;  %v9026_v10 = vld [vmem:[%s8446_s25 + $0xb8] sm:$0xff] }
  0xf9   : > { %1583 = vmatpush.bf16.msrb.mxu1 %v8356_v38  ;;  %v9005_v47 = vadd.f32 %v542_v12, %v320_v42  ;;  %v323_v7 = vpop.f32.mrf.mxu1  ;;  %11893 = vst [vmem:[#allocation20_spill] sm:$0xff] %v9026_v10 }
  0xfa   : > { %1536 = vmatpush.bf16.msrb.mxu0 %v8422_v60 }
  0xfb   : > { %6148 = vmatmul.msk.bf16.gmra.mxu0 %vm210_vm0, %v8997_v61 }
  0xfc   : > { %6156 = vmatmul.msk.bf16.gmra.mxu1 %vm210_vm0, %v8997_v61  ;;  %6274 = vmatmul.msk.bf16.gmra.mxu2 %vm210_vm0, %v9003_v15 }
  0xfd   : > { %1584 = vmatpush.bf16.msrb.mxu1 %v8392_v50  ;;  %6282 = vmatmul.msk.bf16.gmra.mxu3 %vm210_vm0, %v9003_v15 }
  0xfe   : > { %1537 = vmatpush.bf16.msrb.mxu0 %v8470_v14 }
  0xff   : > { %v496_v21 = vpop.f32.mrf.mxu2 }
 0x100   : > { %v9019_v25 = vadd.f32 %v496_v21, %v274_v3  ;;  %v545_v34 = vpop.f32.mrf.mxu3  ;;  %v276_v38 = vpop.f32.mrf.mxu0 }
 0x101   : > { %1585 = vmatpush.bf16.msrb.mxu1 %v8432_v63  ;;  %v9021_v46 = vadd.f32 %v545_v34, %v323_v7  ;;  %v325_v50 = vpop.f32.mrf.mxu1  ;;  %v9031_v63 = vld [vmem:[%s8446_s25 + $0xf8] sm:$0xff] }
 0x102   : > { %11895 = vst [vmem:[#allocation22_spill] sm:$0xff] %v9031_v63 }
 0x105   : > { %1586 = vmatpush.bf16.msrb.mxu1 %v8477_v19 }
 0x107   : > { %v498_v30 = vpop.f32.mrf.mxu2 }
 0x108   : > { %v9028_v42 = vadd.f32 %v498_v30, %v276_v38  ;;  %v547_v60 = vpop.f32.mrf.mxu3  ;;  %v279_v12 = vpop.f32.mrf.mxu0 }
 0x109   : > { %v9033_v3 = vadd.f32 %v547_v60, %v325_v50  ;;  %v328_v21 = vpop.f32.mrf.mxu1  ;;  %v9048_v60 = vld [vmem:[%s8446_s25 + $0x100] sm:$0xff] }
 0x10a   : > { %11894 = vst [vmem:[#allocation21_spill] sm:$0xff] %v9028_v42 }
 0x10b   : > { %11896 = vst [vmem:[#allocation23_spill] sm:$0xff] %v9033_v3  ;;  %6149 = vmatmul.msk.bf16.gmra.mxu0 %vm210_vm0, %v9026_v10 }
 0x10c   : > { %6157 = vmatmul.msk.bf16.gmra.mxu1 %vm210_vm0, %v9026_v10  ;;  %6275 = vmatmul.msk.bf16.gmra.mxu2 %vm210_vm0, %v9031_v63 }
 0x10d   : > { %6283 = vmatmul.msk.bf16.gmra.mxu3 %vm210_vm0, %v9031_v63 }
 0x10f   : > { %v501_v14 = vpop.f32.mrf.mxu2 }
 0x110   : > { %v9043_v19 = vadd.f32 %v501_v14, %v279_v12  ;;  %v550_v7 = vpop.f32.mrf.mxu3  ;;  %v281_v34 = vpop.f32.mrf.mxu0 }
 0x111   : > { %v9045_v38 = vadd.f32 %v550_v7, %v328_v21  ;;  %v330_v50 = vpop.f32.mrf.mxu1 }
 0x117   : > { %v503_v30 = vpop.f32.mrf.mxu2 }
 0x118   : > { %v9050_v15 = vadd.f32 %v503_v30, %v281_v34  ;;  %v552_v10 = vpop.f32.mrf.mxu3  ;;  %v721_v3 = vpop.f32.mrf.mxu0 }
 0x119   : > { %v9052_v42 = vadd.f32 %v552_v10, %v330_v50  ;;  %v810_v61 = vadd.f32 %v721_v3, %v8795_v23  ;;  %v770_v63 = vpop.f32.mrf.mxu1  ;;  %v9141_v50 = vld [vmem:[%s8446_s25 + $0x118] sm:$0xff] }
 0x11a   : > { %v811_v12 = vadd.f32 %v770_v63, %v8797_v40 }
 0x11b   : > { %6394 = vmatmul.msk.bf16.vlgmr.msra.gmra.mxu0 %vm210_vm0, %v9048_v60 }
 0x11c   : > { %6402 = vmatmul.msk.bf16.vlgmr.msra.gmra.mxu1 %vm210_vm0, %v9048_v60  ;;  %6410 = vmatmul.msk.bf16.vlgmr.msra.gmra.mxu2 %vm210_vm0, %v8780_v5 }
 0x11d   : > { %6418 = vmatmul.msk.bf16.vlgmr.msra.gmra.mxu3 %vm210_vm0, %v8780_v5  ;;  %1974 = vmatpush.bf16.msra.mxu2 %v8746_v33 }
 0x11e   : > { %2023 = vmatpush.bf16.msra.mxu3 %v8751_v45  ;;  %1760 = vmatpush.bf16.msra.mxu0 %v8480_v22 }
 0x11f   : > { %v1008_v23 = vpop.f32.mrf.mxu2  ;;  %1809 = vmatpush.bf16.msra.mxu1 %v8488_v26  ;;  %v9082_v26 = vld [vmem:[%s8446_s25 + $0x108] sm:$0xff] }
 0x120   : > { %v9068_v40 = vadd.f32 %v1008_v23, %v810_v61  ;;  %v1057_v10 = vpop.f32.mrf.mxu3  ;;  %v723_v63 = vpop.f32.mrf.mxu0 }
 0x121   : > { %v9070_v3 = vadd.f32 %v1057_v10, %v811_v12  ;;  %v812_v21 = vadd.f32 %v723_v63, %v8806_v36  ;;  %v772_v14 = vpop.f32.mrf.mxu1  ;;  %1975 = vmatpush.bf16.msra.mxu2 %v8770_v55  ;;  %v11898_v10 = vld [vmem:[#allocation10_spill] sm:$0xff] }
 0x122   : > { %v813_v33 = vadd.f32 %v772_v14, %v8811_v16  ;;  %2024 = vmatpush.bf16.msra.mxu3 %v8775_v2  ;;  %1761 = vmatpush.bf16.msra.mxu0 %v8514_v37  ;;  %v11899_v14 = vld [vmem:[#allocation11_spill] sm:$0xff] }
 0x123   : > { %1810 = vmatpush.bf16.msra.mxu1 %v8524_v41 }
 0x125   : > { %1976 = vmatpush.bf16.msra.mxu2 %v8823_v1 }
 0x126   : > { %2025 = vmatpush.bf16.msra.mxu3 %v8831_v44  ;;  %1762 = vmatpush.bf16.msra.mxu0 %v8551_v53 }
 0x127   : > { %v1010_v22 = vpop.f32.mrf.mxu2  ;;  %1811 = vmatpush.bf16.msra.mxu1 %v8563_v58 }
 0x128   : > { %v9085_v45 = vadd.f32 %v1010_v22, %v812_v21  ;;  %v1059_v55 = vpop.f32.mrf.mxu3  ;;  %v726_v5 = vpop.f32.mrf.mxu0 }
 0x129   : > { %v9087_v2 = vadd.f32 %v1059_v55, %v813_v33  ;;  %v814_v37 = vadd.f32 %v726_v5, %v8843_v32  ;;  %v775_v41 = vpop.f32.mrf.mxu1  ;;  %1977 = vmatpush.bf16.msra.mxu2 %v8880_v52 }
 0x12a   : > { %v815_v36 = vadd.f32 %v775_v41, %v8845_v9  ;;  %2026 = vmatpush.bf16.msra.mxu3 %v8885_v29  ;;  %1763 = vmatpush.bf16.msra.mxu0 %v8602_v18 }
 0x12b   : > { %6395 = vmatmul.msk.bf16.gmra.mxu0 %vm210_vm0, %v9082_v26  ;;  %1812 = vmatpush.bf16.msra.mxu1 %v8613_v27 }
 0x12c   : > { %6403 = vmatmul.msk.bf16.gmra.mxu1 %vm210_vm0, %v9082_v26  ;;  %6411 = vmatmul.msk.bf16.gmra.mxu2 %vm210_vm0, %v8804_v48 }
 0x12d   : > { %6419 = vmatmul.msk.bf16.gmra.mxu3 %vm210_vm0, %v8804_v48  ;;  %1978 = vmatpush.bf16.msra.mxu2 %v8920_v13 }
 0x12e   : > { %2027 = vmatpush.bf16.msra.mxu3 %v8925_v24  ;;  %1764 = vmatpush.bf16.msra.mxu0 %v8644_v49 }
 0x12f   : > { %v1013_v53 = vpop.f32.mrf.mxu2  ;;  %1813 = vmatpush.bf16.msra.mxu1 %v8655_v57  ;;  %v9118_v57 = vld [vmem:[%s8446_s25 + $0x110] sm:$0xff] }
 0x130   : > { %v9107_v58 = vadd.f32 %v1013_v53, %v814_v37  ;;  %v1062_v18 = vpop.f32.mrf.mxu3  ;;  %v728_v27 = vpop.f32.mrf.mxu0 }
 0x131   : > { %v9109_v16 = vadd.f32 %v1062_v18, %v815_v36  ;;  %v816_v1 = vadd.f32 %v728_v27, %v8852_v6  ;;  %v777_v44 = vpop.f32.mrf.mxu1  ;;  %1979 = vmatpush.bf16.msra.mxu2 %v8970_v51  ;;  %v11901_v36 = vld [vmem:[#allocation13_spill] sm:$0xff]  ;;  %v11902_v27 = vld [vmem:[#allocation15_spill] sm:$0xff] }
 0x132   : > { %v817_v48 = vadd.f32 %v777_v44, %v8857_v4  ;;  %2028 = vmatpush.bf16.msra.mxu3 %v8977_v54  ;;  %1765 = vmatpush.bf16.msra.mxu0 %v8686_v20  ;;  %v11897_v54 = vld [vmem:[#allocation9_spill] sm:$0xff] }
 0x133   : > { %1814 = vmatpush.bf16.msra.mxu1 %v8697_v31 }
 0x137   : > { %v1015_v49 = vpop.f32.mrf.mxu2 }
 0x138   : > { %v9120_v32 = vadd.f32 %v1015_v49, %v816_v1  ;;  %v1064_v9 = vpop.f32.mrf.mxu3  ;;  %v731_v52 = vpop.f32.mrf.mxu0 }
 0x139   : > { %v9122_v29 = vadd.f32 %v1064_v9, %v817_v48  ;;  %v818_v6 = vadd.f32 %v731_v52, %v8867_v43  ;;  %v780_v61 = vpop.f32.mrf.mxu1  ;;  %v9164_v48 = vld [vmem:[%s8446_s25 + $0x120] sm:$0xff] }
 0x13a   : > { %v819_v4 = vadd.f32 %v780_v61, %v8869_v35 }
 0x13b   : > { %6396 = vmatmul.msk.bf16.gmra.mxu0 %vm210_vm0, %v9118_v57 }
 0x13c   : > { %6404 = vmatmul.msk.bf16.gmra.mxu1 %vm210_vm0, %v9118_v57  ;;  %6412 = vmatmul.msk.bf16.gmra.mxu2 %vm210_vm0, %v8850_v62 }
 0x13d   : > { %6420 = vmatmul.msk.bf16.gmra.mxu3 %vm210_vm0, %v8850_v62 }
 0x13f   : > { %v1018_v20 = vpop.f32.mrf.mxu2 }
 0x140   : > { %v9134_v31 = vadd.f32 %v1018_v20, %v818_v6  ;;  %v1067_v43 = vpop.f32.mrf.mxu3  ;;  %v733_v13 = vpop.f32.mrf.mxu0 }
 0x141   : > { %v9136_v24 = vadd.f32 %v1067_v43, %v819_v4  ;;  %v820_v35 = vadd.f32 %v733_v13, %v8892_v59  ;;  %v782_v51 = vpop.f32.mrf.mxu1  ;;  %v11900_v59 = vld [vmem:[#allocation7_spill] sm:$0xff]  ;;  %v11903_v43 = vld [vmem:[#allocation12_spill] sm:$0xff] }
 0x142   : > { %v821_v7 = vadd.f32 %v782_v51, %v11897_v54 }
 0x147   : > { %v1020_v34 = vpop.f32.mrf.mxu2 }
 0x148   : > { %v9143_v30 = vadd.f32 %v1020_v34, %v820_v35  ;;  %v1069_v12 = vpop.f32.mrf.mxu3  ;;  %v736_v23 = vpop.f32.mrf.mxu0 }
 0x149   : > { %v9145_v62 = vadd.f32 %v1069_v12, %v821_v7  ;;  %v822_v63 = vadd.f32 %v736_v23, %v11898_v10  ;;  %v785_v21 = vpop.f32.mrf.mxu1  ;;  %v9187_v23 = vld [vmem:[%s8446_s25 + $0x128] sm:$0xff] }
 0x14a   : > { %v823_v33 = vadd.f32 %v785_v21, %v11899_v14 }
 0x14b   : > { %6397 = vmatmul.msk.bf16.gmra.mxu0 %vm210_vm0, %v9141_v50 }
 0x14c   : > { %6405 = vmatmul.msk.bf16.gmra.mxu1 %vm210_vm0, %v9141_v50  ;;  %6413 = vmatmul.msk.bf16.gmra.mxu2 %vm210_vm0, %v11900_v59 }
 0x14d   : > { %6421 = vmatmul.msk.bf16.gmra.mxu3 %vm210_vm0, %v11900_v59 }
 0x14f   : > { %v1023_v22 = vpop.f32.mrf.mxu2 }
 0x150   : > { %v9157_v55 = vadd.f32 %v1023_v22, %v822_v63  ;;  %v1072_v5 = vpop.f32.mrf.mxu3  ;;  %v738_v37 = vpop.f32.mrf.mxu0 }
 0x151   : > { %v9159_v41 = vadd.f32 %v1072_v5, %v823_v33  ;;  %v824_v53 = vadd.f32 %v738_v37, %v11901_v36  ;;  %v787_v18 = vpop.f32.mrf.mxu1 }
 0x152   : > { %v825_v1 = vadd.f32 %v787_v18, %v11902_v27 }
 0x157   : > { %v1025_v44 = vpop.f32.mrf.mxu2 }
 0x158   : > { %v9166_v49 = vadd.f32 %v1025_v44, %v824_v53  ;;  %v1074_v9 = vpop.f32.mrf.mxu3  ;;  %v741_v52 = vpop.f32.mrf.mxu0 }
 0x159   : > { %v9168_v6 = vadd.f32 %v1074_v9, %v825_v1  ;;  %v826_v61 = vadd.f32 %v741_v52, %v8947_v28  ;;  %v790_v4 = vpop.f32.mrf.mxu1  ;;  %v9210_v1 = vld [vmem:[%s8446_s25 + $0x130] sm:$0xff] }
 0x15a   : > { %v827_v20 = vadd.f32 %v790_v4, %v8949_v17 }
 0x15b   : > { %6398 = vmatmul.msk.bf16.gmra.mxu0 %vm210_vm0, %v9164_v48 }
 0x15c   : > { %6406 = vmatmul.msk.bf16.gmra.mxu1 %vm210_vm0, %v9164_v48  ;;  %6414 = vmatmul.msk.bf16.gmra.mxu2 %vm210_vm0, %v11903_v43 }
 0x15d   : > { %6422 = vmatmul.msk.bf16.gmra.mxu3 %vm210_vm0, %v11903_v43 }
 0x15f   : > { %v1028_v13 = vpop.f32.mrf.mxu2 }
 0x160   : > { %v9180_v35 = vadd.f32 %v1028_v13, %v826_v61  ;;  %v1077_v28 = vpop.f32.mrf.mxu3  ;;  %v743_v51 = vpop.f32.mrf.mxu0 }
 0x161   : > { %v9182_v54 = vadd.f32 %v1077_v28, %v827_v20  ;;  %v828_v17 = vadd.f32 %v743_v51, %v8954_v56  ;;  %v792_v7 = vpop.f32.mrf.mxu1  ;;  %v11904_v56 = vld [vmem:[#allocation16_spill] sm:$0xff] }
 0x162   : > { %v829_v34 = vadd.f32 %v792_v7, %v8959_v11 }
 0x167   : > { %v1030_v12 = vpop.f32.mrf.mxu2 }
 0x168   : > { %v9189_v10 = vadd.f32 %v1030_v12, %v828_v17  ;;  %v1079_v63 = vpop.f32.mrf.mxu3  ;;  %v746_v21 = vpop.f32.mrf.mxu0 }
 0x169   : > { %v9191_v14 = vadd.f32 %v1079_v63, %v829_v34  ;;  %v830_v33 = vadd.f32 %v746_v21, %v8989_v39  ;;  %v795_v59 = vpop.f32.mrf.mxu1  ;;  %v11907_v34 = vld [vmem:[#allocation23_spill] sm:$0xff] }
 0x16a   : > { %v831_v22 = vadd.f32 %v795_v59, %v8991_v0  ;;  %v9233_v21 = vld [vmem:[%s8446_s25 + $0x138] sm:$0xff] }
 0x16b   : > { %6399 = vmatmul.msk.bf16.gmra.mxu0 %vm210_vm0, %v9187_v23 }
 0x16c   : > { %6407 = vmatmul.msk.bf16.gmra.mxu1 %vm210_vm0, %v9187_v23  ;;  %6415 = vmatmul.msk.bf16.gmra.mxu2 %vm210_vm0, %v11904_v56 }
 0x16d   : > { %6423 = vmatmul.msk.bf16.gmra.mxu3 %vm210_vm0, %v11904_v56 }
 0x16f   : > { %v1033_v11 = vpop.f32.mrf.mxu2 }
 0x170   : > { %v9203_v5 = vadd.f32 %v1033_v11, %v830_v33  ;;  %v1082_v39 = vpop.f32.mrf.mxu3  ;;  %v748_v37 = vpop.f32.mrf.mxu0 }
 0x171   : > { %v9205_v36 = vadd.f32 %v1082_v39, %v831_v22  ;;  %v832_v0 = vadd.f32 %v748_v37, %v9000_v8  ;;  %v797_v53 = vpop.f32.mrf.mxu1  ;;  %v11905_v8 = vld [vmem:[#allocation18_spill] sm:$0xff] }
 0x172   : > { %v833_v18 = vadd.f32 %v797_v53, %v9005_v47 }
 0x177   : > { %v1035_v27 = vpop.f32.mrf.mxu2 }
 0x178   : > { %v9212_v44 = vadd.f32 %v1035_v27, %v832_v0  ;;  %v1084_v9 = vpop.f32.mrf.mxu3  ;;  %v751_v52 = vpop.f32.mrf.mxu0  ;;  %v11908_v0 = vld [vmem:[#allocation20_spill] sm:$0xff] }
 0x179   : > { %v9214_v61 = vadd.f32 %v1084_v9, %v833_v18  ;;  %v834_v4 = vadd.f32 %v751_v52, %v9019_v25  ;;  %v800_v20 = vpop.f32.mrf.mxu1 }
 0x17a   : > { %v835_v43 = vadd.f32 %v800_v20, %v9021_v46  ;;  %v11906_v46 = vld [vmem:[#allocation21_spill] sm:$0xff] }
 0x17b   : > { %6400 = vmatmul.msk.bf16.gmra.mxu0 %vm210_vm0, %v9210_v1 }
 0x17c   : > { %6408 = vmatmul.msk.bf16.gmra.mxu1 %vm210_vm0, %v9210_v1  ;;  %6416 = vmatmul.msk.bf16.gmra.mxu2 %vm210_vm0, %v11905_v8 }
 0x17d   : > { %6424 = vmatmul.msk.bf16.gmra.mxu3 %vm210_vm0, %v11905_v8 }
 0x17f   : > { %v1038_v47 = vpop.f32.mrf.mxu2 }
 0x180   : > { %v9226_v13 = vadd.f32 %v1038_v47, %v834_v4  ;;  %v1087_v25 = vpop.f32.mrf.mxu3  ;;  %v753_v28 = vpop.f32.mrf.mxu0 }
 0x181   : > { %v9228_v51 = vadd.f32 %v1087_v25, %v835_v43  ;;  %v836_v17 = vadd.f32 %v753_v28, %v11906_v46  ;;  %v802_v7 = vpop.f32.mrf.mxu1 }
 0x182   : > { %v837_v12 = vadd.f32 %v802_v7, %v11907_v34  ;;  %v8080_v7 = vld [vmem:[%s8446_s25 + $0x40] sm:$0xff] }
 0x187   : > { %v1040_v63 = vpop.f32.mrf.mxu2 }
 0x188   : > { %v9235_v33 = vadd.f32 %v1040_v63, %v836_v17  ;;  %v1089_v59 = vpop.f32.mrf.mxu3  ;;  %v756_v22 = vpop.f32.mrf.mxu0 }
 0x189   : > { %v9237_v56 = vadd.f32 %v1089_v59, %v837_v12  ;;  %v838_v11 = vadd.f32 %v756_v22, %v9043_v19  ;;  %v805_v39 = vpop.f32.mrf.mxu1 }
 0x18a   : > { %v839_v37 = vadd.f32 %v805_v39, %v9045_v38 }
 0x18b   : > { %6401 = vmatmul.msk.bf16.gmra.mxu0 %vm210_vm0, %v9233_v21 }
 0x18c   : > { %6409 = vmatmul.msk.bf16.gmra.mxu1 %vm210_vm0, %v9233_v21  ;;  %6417 = vmatmul.msk.bf16.gmra.mxu2 %vm210_vm0, %v11908_v0 }
 0x18d   : > { %6425 = vmatmul.msk.bf16.gmra.mxu3 %vm210_vm0, %v11908_v0 }
 0x18f   : > { %v1043_v53 = vpop.f32.mrf.mxu2 }
 0x190   : > { %v9249_v18 = vadd.f32 %v1043_v53, %v838_v11  ;;  %v1092_v19 = vpop.f32.mrf.mxu3  ;;  %v758_v27 = vpop.f32.mrf.mxu0 }
 0x191   : > { %v9251_v9 = vadd.f32 %v1092_v19, %v839_v37  ;;  %v840_v38 = vadd.f32 %v758_v27, %v9050_v15  ;;  %v807_v52 = vpop.f32.mrf.mxu1  ;;  %v11910_v27 = vld [vmem:[#allocation5_spill] sm:$0xff] }
 0x192   : > { %v841_v4 = vadd.f32 %v807_v52, %v9052_v42  ;;  %v11909_v42 = vld [vmem:[#allocation4_spill] sm:$0xff] }
 0x197   : > { %v1045_v20 = vpop.f32.mrf.mxu2 }
 0x198   : > { %v9255_v43 = vadd.f32 %v1045_v20, %v840_v38  ;;  %v1094_v8 = vpop.f32.mrf.mxu3  ;;  %v1295_v47 = vpop.f32.mrf.mxu0 }
 0x199   : > { %v9257_v25 = vadd.f32 %v1094_v8, %v841_v4  ;;  %v9260_v28 = vadd.f32 %v1295_v47, %v9068_v40  ;;  %v1344_v46 = vpop.f32.mrf.mxu1 }
 0x19a   : > { %v9263_v17 = vadd.f32 %v1344_v46, %v9070_v3 }
 0x19b   : > { %6426 = vmatmul.msk.bf16.vlgmr.msrb.gmra.mxu0 %vm210_vm0, %v8080_v7 }
 0x19c   : > { %6434 = vmatmul.msk.bf16.vlgmr.msrb.gmra.mxu1 %vm210_vm0, %v8080_v7  ;;  %6442 = vmatmul.msk.bf16.vlgmr.msrb.gmra.mxu2 %vm210_vm0, %v11909_v42 }
 0x19d   : > { %6450 = vmatmul.msk.bf16.vlgmr.msrb.gmra.mxu3 %vm210_vm0, %v11909_v42 }
 0x19f   : > { %v9274_v40 = vpop.f32.mrf.mxu2 }
 0x1a0   : > { %v9276_v34 = vpop.f32.mrf.mxu3  ;;  %v1297_v3 = vpop.f32.mrf.mxu0 }
 0x1a1   : > { %v9279_v12 = vadd.f32 %v1297_v3, %v9085_v45  ;;  %v1346_v63 = vpop.f32.mrf.mxu1  ;;  %v8081_v45 = vld [vmem:[%s8446_s25 + $0x48] sm:$0xff] }
 0x1a2   : > { %v9282_v59 = vadd.f32 %v1346_v63, %v9087_v2 }
 0x1a7   : > { %v9286_v11 = vpop.f32.mrf.mxu2 }
 0x1a8   : > { %v9288_v39 = vpop.f32.mrf.mxu3  ;;  %v1300_v37 = vpop.f32.mrf.mxu0 }
 0x1a9   : > { %v9291_v0 = vadd.f32 %v1300_v37, %v9107_v58  ;;  %v1349_v53 = vpop.f32.mrf.mxu1  ;;  %v11912_v37 = vld [vmem:[#allocation6_spill] sm:$0xff] }
 0x1aa   : > { %v9294_v19 = vadd.f32 %v1349_v53, %v9109_v16 }
 0x1ab   : > { %6427 = vmatmul.msk.bf16.gmra.mxu0 %vm210_vm0, %v8081_v45 }
 0x1ac   : > { %6435 = vmatmul.msk.bf16.gmra.mxu1 %vm210_vm0, %v8081_v45  ;;  %6443 = vmatmul.msk.bf16.gmra.mxu2 %vm210_vm0, %v11910_v27 }
 0x1ad   : > { %6451 = vmatmul.msk.bf16.gmra.mxu3 %vm210_vm0, %v11910_v27 }
 0x1af   : > { %v9305_v58 = vpop.f32.mrf.mxu2 }
 0x1b0   : > { %v9307_v38 = vpop.f32.mrf.mxu3  ;;  %v1302_v16 = vpop.f32.mrf.mxu0 }
 0x1b1   : > { %v9310_v52 = vadd.f32 %v1302_v16, %v9120_v32  ;;  %v1351_v4 = vpop.f32.mrf.mxu1  ;;  %v8082_v32 = vld [vmem:[%s8446_s25 + $0x50] sm:$0xff] }
 0x1b2   : > { %v9313_v20 = vadd.f32 %v1351_v4, %v9122_v29 }
 0x1b7   : > { %v9317_v47 = vpop.f32.mrf.mxu2 }
 0x1b8   : > { %v9319_v46 = vpop.f32.mrf.mxu3  ;;  %v1305_v7 = vpop.f32.mrf.mxu0 }
 0x1b9   : > { %v9322_v42 = vadd.f32 %v1305_v7, %v9134_v31  ;;  %v1354_v3 = vpop.f32.mrf.mxu1 }
 0x1ba   : > { %v9325_v63 = vadd.f32 %v1354_v3, %v9136_v24 }
 0x1bb   : > { %6428 = vmatmul.msk.bf16.gmra.mxu0 %vm210_vm0, %v8082_v32 }
 0x1bc   : > { %11911 = vst [vmem:[#allocation9_spill] sm:$0xff] %v9325_v63  ;;  %6436 = vmatmul.msk.bf16.gmra.mxu1 %vm210_vm0, %v8082_v32  ;;  %6444 = vmatmul.msk.bf16.gmra.mxu2 %vm210_vm0, %v11912_v37 }
 0x1bd   : > { %6452 = vmatmul.msk.bf16.gmra.mxu3 %vm210_vm0, %v11912_v37 }
 0x1bf   : > { %v9336_v31 = vpop.f32.mrf.mxu2 }
 0x1c0   : > { %v9338_v53 = vpop.f32.mrf.mxu3  ;;  %v1307_v24 = vpop.f32.mrf.mxu0 }
 0x1c1   : > { %v9341_v45 = vadd.f32 %v1307_v24, %v9143_v30  ;;  %v1356_v27 = vpop.f32.mrf.mxu1  ;;  %v8083_v30 = vld [vmem:[%s8446_s25 + $0x58] sm:$0xff]  ;;  %v11917_v24 = vld [vmem:[#allocation8_spill] sm:$0xff] }
 0x1c2   : > { %v9344_v16 = vadd.f32 %v1356_v27, %v9145_v62 }
 0x1c3   : > { %11913 = vst [vmem:[#allocation10_spill] sm:$0xff] %v9341_v45 }
 0x1c4   : > { %11914 = vst [vmem:[#allocation11_spill] sm:$0xff] %v9344_v16 }
 0x1c7   : > { %v9348_v7 = vpop.f32.mrf.mxu2 }
 0x1c8   : > { %v9350_v3 = vpop.f32.mrf.mxu3  ;;  %v1310_v32 = vpop.f32.mrf.mxu0 }
 0x1c9   : > { %v9353_v37 = vadd.f32 %v1310_v32, %v9157_v55  ;;  %v1359_v29 = vpop.f32.mrf.mxu1 }
 0x1ca   : > { %v9356_v8 = vadd.f32 %v1359_v29, %v9159_v41 }
 0x1cb   : > { %11915 = vst [vmem:[#allocation7_spill] sm:$0xff] %v9353_v37  ;;  %6429 = vmatmul.msk.bf16.gmra.mxu0 %vm210_vm0, %v8083_v30 }
 0x1cc   : > { %11916 = vst [vmem:[#allocation13_spill] sm:$0xff] %v9356_v8  ;;  %6437 = vmatmul.msk.bf16.gmra.mxu1 %vm210_vm0, %v8083_v30  ;;  %6445 = vmatmul.msk.bf16.gmra.mxu2 %vm210_vm0, %v11917_v24 }
 0x1cd   : > { %6453 = vmatmul.msk.bf16.gmra.mxu3 %vm210_vm0, %v11917_v24 }
 0x1cf   : > { %v9367_v55 = vpop.f32.mrf.mxu2 }
 0x1d0   : > { %v9369_v27 = vpop.f32.mrf.mxu3  ;;  %v1312_v41 = vpop.f32.mrf.mxu0 }
 0x1d1   : > { %v9372_v29 = vadd.f32 %v1312_v41, %v9166_v49  ;;  %v1361_v32 = vpop.f32.mrf.mxu1  ;;  %v8084_v49 = vld [vmem:[%s8446_s25 + $0x60] sm:$0xff]  ;;  %v11922_v41 = vld [vmem:[#allocation14_spill] sm:$0xff] }
 0x1d2   : > { %v9375_v62 = vadd.f32 %v1361_v32, %v9168_v6 }
 0x1d3   : > { %11918 = vst [vmem:[#allocation15_spill] sm:$0xff] %v9372_v29 }
 0x1d4   : > { %11919 = vst [vmem:[#allocation12_spill] sm:$0xff] %v9375_v62 }
 0x1d7   : > { %v9379_v4 = vpop.f32.mrf.mxu2 }
 0x1d8   : > { %v9381_v2 = vpop.f32.mrf.mxu3  ;;  %v1315_v24 = vpop.f32.mrf.mxu0 }
 0x1d9   : > { %v9384_v22 = vadd.f32 %v1315_v24, %v9180_v35  ;;  %v1364_v15 = vpop.f32.mrf.mxu1 }
 0x1da   : > { %v9387_v8 = vadd.f32 %v1364_v15, %v9182_v54 }
 0x1db   : > { %11920 = vst [vmem:[#allocation16_spill] sm:$0xff] %v9384_v22  ;;  %6430 = vmatmul.msk.bf16.gmra.mxu0 %vm210_vm0, %v8084_v49 }
 0x1dc   : > { %11921 = vst [vmem:[#allocation18_spill] sm:$0xff] %v9387_v8  ;;  %6438 = vmatmul.msk.bf16.gmra.mxu1 %vm210_vm0, %v8084_v49  ;;  %6446 = vmatmul.msk.bf16.gmra.mxu2 %vm210_vm0, %v11922_v41 }
 0x1dd   : > { %6454 = vmatmul.msk.bf16.gmra.mxu3 %vm210_vm0, %v11922_v41 }
 0x1df   : > { %v9398_v35 = vpop.f32.mrf.mxu2 }
 0x1e0   : > { %v9400_v32 = vpop.f32.mrf.mxu3  ;;  %v1317_v54 = vpop.f32.mrf.mxu0 }
 0x1e1   : > { %v9403_v15 = vadd.f32 %v1317_v54, %v9189_v10  ;;  %v1366_v24 = vpop.f32.mrf.mxu1  ;;  %v8085_v10 = vld [vmem:[%s8446_s25 + $0x68] sm:$0xff] }
 0x1e2   : > { %v9406_v6 = vadd.f32 %v1366_v24, %v9191_v14  ;;  %v11927_v54 = vld [vmem:[#allocation17_spill] sm:$0xff] }
 0x1e3   : > { %11923 = vst [vmem:[#allocation21_spill] sm:$0xff] %v9403_v15 }
 0x1e4   : > { %11924 = vst [vmem:[#allocation23_spill] sm:$0xff] %v9406_v6 }
 0x1e7   : > { %v9410_v30 = vpop.f32.mrf.mxu2 }
 0x1e8   : > { %v9412_v8 = vpop.f32.mrf.mxu3  ;;  %v1320_v41 = vpop.f32.mrf.mxu0 }
 0x1e9   : > { %v9415_v22 = vadd.f32 %v1320_v41, %v9203_v5  ;;  %v1369_v62 = vpop.f32.mrf.mxu1 }
 0x1ea   : > { %v9418_v29 = vadd.f32 %v1369_v62, %v9205_v36 }
 0x1eb   : > { %11925 = vst [vmem:[#allocation20_spill] sm:$0xff] %v9415_v22  ;;  %6431 = vmatmul.msk.bf16.gmra.mxu0 %vm210_vm0, %v8085_v10 }
 0x1ec   : > { %11926 = vst [vmem:[#allocation4_spill] sm:$0xff] %v9418_v29  ;;  %6439 = vmatmul.msk.bf16.gmra.mxu1 %vm210_vm0, %v8085_v10  ;;  %6447 = vmatmul.msk.bf16.gmra.mxu2 %vm210_vm0, %v11927_v54 }
 0x1ed   : > { %6455 = vmatmul.msk.bf16.gmra.mxu3 %vm210_vm0, %v11927_v54 }
 0x1ef   : > { %v9429_v5 = vpop.f32.mrf.mxu2 }
 0x1f0   : > { %v9431_v24 = vpop.f32.mrf.mxu3  ;;  %v1322_v36 = vpop.f32.mrf.mxu0 }
 0x1f1   : > { %v9434_v62 = vadd.f32 %v1322_v36, %v9212_v44  ;;  %v1371_v41 = vpop.f32.mrf.mxu1  ;;  %v8086_v44 = vld [vmem:[%s8446_s25 + $0x70] sm:$0xff]  ;;  %v11932_v36 = vld [vmem:[#allocation19_spill] sm:$0xff] }
 0x1f2   : > { %v9437_v14 = vadd.f32 %v1371_v41, %v9214_v61 }
 0x1f3   : > { %11928 = vst [vmem:[#allocation5_spill] sm:$0xff] %v9434_v62 }
 0x1f4   : > { %11929 = vst [vmem:[#allocation6_spill] sm:$0xff] %v9437_v14 }
 0x1f7   : > { %v9441_v49 = vpop.f32.mrf.mxu2 }
 0x1f8   : > { %v9443_v29 = vpop.f32.mrf.mxu3  ;;  %v1325_v54 = vpop.f32.mrf.mxu0 }
 0x1f9   : > { %v9446_v22 = vadd.f32 %v1325_v54, %v9226_v13  ;;  %v1374_v6 = vpop.f32.mrf.mxu1 }
 0x1fa   : > { %v9449_v15 = vadd.f32 %v1374_v6, %v9228_v51 }
 0x1fb   : > { %11930 = vst [vmem:[#allocation8_spill] sm:$0xff] %v9446_v22  ;;  %6432 = vmatmul.msk.bf16.gmra.mxu0 %vm210_vm0, %v8086_v44 }
 0x1fc   : > { %11931 = vst [vmem:[#allocation14_spill] sm:$0xff] %v9449_v15  ;;  %6440 = vmatmul.msk.bf16.gmra.mxu1 %vm210_vm0, %v8086_v44  ;;  %6448 = vmatmul.msk.bf16.gmra.mxu2 %vm210_vm0, %v11932_v36 }
 0x1fd   : > { %6456 = vmatmul.msk.bf16.gmra.mxu3 %vm210_vm0, %v11932_v36 }
 0x1ff   : > { %v9460_v13 = vpop.f32.mrf.mxu2 }
 0x200   : > { %v9462_v41 = vpop.f32.mrf.mxu3  ;;  %v1327_v51 = vpop.f32.mrf.mxu0 }
 0x201   : > { %v9465_v6 = vadd.f32 %v1327_v51, %v9235_v33  ;;  %v1376_v54 = vpop.f32.mrf.mxu1  ;;  %v8087_v33 = vld [vmem:[%s8446_s25 + $0x78] sm:$0xff]  ;;  %v11937_v51 = vld [vmem:[#allocation22_spill] sm:$0xff] }
 0x202   : > { %v9468_v61 = vadd.f32 %v1376_v54, %v9237_v56 }
 0x203   : > { %11933 = vst [vmem:[#allocation17_spill] sm:$0xff] %v9465_v6 }
 0x204   : > { %11934 = vst [vmem:[#allocation19_spill] sm:$0xff] %v9468_v61 }
 0x207   : > { %v9472_v10 = vpop.f32.mrf.mxu2 }
 0x208   : > { %v9474_v15 = vpop.f32.mrf.mxu3  ;;  %v1330_v36 = vpop.f32.mrf.mxu0 }
 0x209   : > { %v9477_v22 = vadd.f32 %v1330_v36, %v9249_v18  ;;  %v1379_v14 = vpop.f32.mrf.mxu1 }
 0x20a   : > { %v9480_v62 = vadd.f32 %v1379_v14, %v9251_v9 }
 0x20b   : > { %11935 = vst [vmem:[#allocation24_spill] sm:$0xff] %v9477_v22  ;;  %6433 = vmatmul.msk.bf16.gmra.mxu0 %vm210_vm0, %v8087_v33  ;;  %v7704_v22 = vld [vmem:[%s8446_s25 + $0x140] sm:$0xff] }
 0x20c   : > { %11936 = vst [vmem:[#allocation25_spill] sm:$0xff] %v9480_v62  ;;  %6441 = vmatmul.msk.bf16.gmra.mxu1 %vm210_vm0, %v8087_v33  ;;  %6449 = vmatmul.msk.bf16.gmra.mxu2 %vm210_vm0, %v11937_v51 }
 0x20d   : > { %6457 = vmatmul.msk.bf16.gmra.mxu3 %vm210_vm0, %v11937_v51 }
 0x20f   : > { %v9491_v18 = vpop.f32.mrf.mxu2 }
 0x210   : > { %v9493_v54 = vpop.f32.mrf.mxu3  ;;  %v1332_v9 = vpop.f32.mrf.mxu0 }
 0x211   : > { %v9496_v14 = vadd.f32 %v1332_v9, %v9255_v43  ;;  %v1381_v36 = vpop.f32.mrf.mxu1 }
 0x212   : > { %v9499_v44 = vadd.f32 %v1381_v36, %v9257_v25 }
 0x213   : > { %11938 = vst [vmem:[#allocation22_spill] sm:$0xff] %v9496_v14 }
 0x214   : > { %11939 = vst [vmem:[#allocation26_spill] sm:$0xff] %v9499_v44 }
 0x217   : > { %v9503_v56 = vpop.f32.mrf.mxu2 }
 0x218   : > { %v9505_v62 = vpop.f32.mrf.mxu3  ;;  %v1539_v51 = vpop.f32.mrf.mxu0 }
 0x219   : > { %v1588_v61 = vpop.f32.mrf.mxu1  ;;  %v1540_v43 = vadd.f32 %v1539_v51, %v9274_v40  ;;  %v7705_v40 = vld [vmem:[%s8446_s25 + $0x148] sm:$0xff] }
 0x21a   : > { %v1589_v25 = vadd.f32 %v1588_v61, %v9276_v34 }
 0x21b   : > { %6458 = vmatmul.msk.bf16.vlgmr.msra.gmra.mxu0 %vm210_vm0, %v9048_v60 }
 0x21c   : > { %6466 = vmatmul.msk.bf16.vlgmr.msra.gmra.mxu1 %vm210_vm0, %v9048_v60  ;;  %6524 = vmatmul.msk.bf16.vlgmr.msra.gmra.mxu2 %vm210_vm0, %v7704_v22 }
 0x21d   : > { %6532 = vmatmul.msk.bf16.vlgmr.msra.gmra.mxu3 %vm210_vm0, %v7704_v22 }
 0x21f   : > { %v1637_v9 = vpop.f32.mrf.mxu2 }
 0x220   : > { %v9516_v36 = vadd.f32 %v1637_v9, %v1540_v43  ;;  %v1686_v33 = vpop.f32.mrf.mxu3  ;;  %v1541_v44 = vpop.f32.mrf.mxu0 }
 0x221   : > { %v9518_v14 = vadd.f32 %v1686_v33, %v1589_v25  ;;  %v1590_v6 = vpop.f32.mrf.mxu1  ;;  %v1542_v37 = vadd.f32 %v1541_v44, %v9286_v11 }
 0x222   : > { %v1591_v60 = vadd.f32 %v1590_v6, %v9288_v39 }
 0x227   : > { %v1639_v16 = vpop.f32.mrf.mxu2 }
 0x228   : > { %v9522_v45 = vadd.f32 %v1639_v16, %v1542_v37  ;;  %v1688_v22 = vpop.f32.mrf.mxu3  ;;  %v1544_v63 = vpop.f32.mrf.mxu0 }
 0x229   : > { %v9525_v51 = vadd.f32 %v1688_v22, %v1591_v60  ;;  %v1593_v34 = vpop.f32.mrf.mxu1  ;;  %v1545_v11 = vadd.f32 %v1544_v63, %v9305_v58  ;;  %v7706_v58 = vld [vmem:[%s8446_s25 + $0x150] sm:$0xff] }
 0x22a   : > { %v1594_v39 = vadd.f32 %v1593_v34, %v9307_v38 }
 0x22b   : > { %6459 = vmatmul.msk.bf16.gmra.mxu0 %vm210_vm0, %v9082_v26 }
 0x22c   : > { %6467 = vmatmul.msk.bf16.gmra.mxu1 %vm210_vm0, %v9082_v26  ;;  %6525 = vmatmul.msk.bf16.gmra.mxu2 %vm210_vm0, %v7705_v40 }
 0x22d   : > { %6533 = vmatmul.msk.bf16.gmra.mxu3 %vm210_vm0, %v7705_v40 }
 0x22f   : > { %v1642_v16 = vpop.f32.mrf.mxu2 }
 0x230   : > { %v9535_v37 = vadd.f32 %v1642_v16, %v1545_v11  ;;  %v1691_v61 = vpop.f32.mrf.mxu3  ;;  %v1546_v6 = vpop.f32.mrf.mxu0 }
 0x231   : > { %v9537_v44 = vadd.f32 %v1691_v61, %v1594_v39  ;;  %v1595_v33 = vpop.f32.mrf.mxu1  ;;  %v1547_v43 = vadd.f32 %v1546_v6, %v9317_v47 }
 0x232   : > { %v1596_v26 = vadd.f32 %v1595_v33, %v9319_v46 }
 0x237   : > { %v1644_v25 = vpop.f32.mrf.mxu2 }
 0x238   : > { %v9541_v9 = vadd.f32 %v1644_v25, %v1547_v43  ;;  %v1693_v60 = vpop.f32.mrf.mxu3  ;;  %v1549_v22 = vpop.f32.mrf.mxu0 }
 0x239   : > { %v9544_v63 = vadd.f32 %v1693_v60, %v1596_v26  ;;  %v1598_v38 = vpop.f32.mrf.mxu1  ;;  %v1550_v47 = vadd.f32 %v1549_v22, %v9336_v31  ;;  %v7707_v31 = vld [vmem:[%s8446_s25 + $0x158] sm:$0xff] }
 0x23a   : > { %v1599_v46 = vadd.f32 %v1598_v38, %v9338_v53 }
 0x23b   : > { %6460 = vmatmul.msk.bf16.gmra.mxu0 %vm210_vm0, %v9118_v57 }
 0x23c   : > { %6468 = vmatmul.msk.bf16.gmra.mxu1 %vm210_vm0, %v9118_v57  ;;  %6526 = vmatmul.msk.bf16.gmra.mxu2 %vm210_vm0, %v7706_v58 }
 0x23d   : > { %6534 = vmatmul.msk.bf16.gmra.mxu3 %vm210_vm0, %v7706_v58 }
 0x23f   : > { %v1647_v40 = vpop.f32.mrf.mxu2 }
 0x240   : > { %v9554_v34 = vadd.f32 %v1647_v40, %v1550_v47  ;;  %v1696_v11 = vpop.f32.mrf.mxu3  ;;  %v1551_v39 = vpop.f32.mrf.mxu0 }
 0x241   : > { %v9556_v16 = vadd.f32 %v1696_v11, %v1599_v46  ;;  %v1600_v61 = vpop.f32.mrf.mxu1  ;;  %v1552_v6 = vadd.f32 %v1551_v39, %v9348_v7 }
 0x242   : > { %v1601_v57 = vadd.f32 %v1600_v61, %v9350_v3 }
 0x247   : > { %v1649_v33 = vpop.f32.mrf.mxu2 }
 0x248   : > { %v9560_v43 = vadd.f32 %v1649_v33, %v1552_v6  ;;  %v1698_v26 = vpop.f32.mrf.mxu3  ;;  %v1554_v25 = vpop.f32.mrf.mxu0 }
 0x249   : > { %v9563_v60 = vadd.f32 %v1698_v26, %v1601_v57  ;;  %v1603_v53 = vpop.f32.mrf.mxu1  ;;  %v1555_v7 = vadd.f32 %v1554_v25, %v9367_v55  ;;  %v7708_v55 = vld [vmem:[%s8446_s25 + $0x160] sm:$0xff] }
 0x24a   : > { %v1604_v3 = vadd.f32 %v1603_v53, %v9369_v27 }
 0x24b   : > { %6461 = vmatmul.msk.bf16.gmra.mxu0 %vm210_vm0, %v9141_v50 }
 0x24c   : > { %6469 = vmatmul.msk.bf16.gmra.mxu1 %vm210_vm0, %v9141_v50  ;;  %6527 = vmatmul.msk.bf16.gmra.mxu2 %vm210_vm0, %v7707_v31 }
 0x24d   : > { %6535 = vmatmul.msk.bf16.gmra.mxu3 %vm210_vm0, %v7707_v31 }
 0x24f   : > { %v1652_v22 = vpop.f32.mrf.mxu2 }
 0x250   : > { %v9573_v58 = vadd.f32 %v1652_v22, %v1555_v7  ;;  %v1701_v38 = vpop.f32.mrf.mxu3  ;;  %v1556_v47 = vpop.f32.mrf.mxu0 }
 0x251   : > { %v9575_v46 = vadd.f32 %v1701_v38, %v1604_v3  ;;  %v1605_v40 = vpop.f32.mrf.mxu1  ;;  %v1557_v11 = vadd.f32 %v1556_v47, %v9379_v4 }
 0x252   : > { %v1606_v50 = vadd.f32 %v1605_v40, %v9381_v2 }
 0x257   : > { %v1654_v39 = vpop.f32.mrf.mxu2 }
 0x258   : > { %v9579_v61 = vadd.f32 %v1654_v39, %v1557_v11  ;;  %v1703_v6 = vpop.f32.mrf.mxu3  ;;  %v1559_v57 = vpop.f32.mrf.mxu0 }
 0x259   : > { %v9582_v33 = vadd.f32 %v1703_v6, %v1606_v50  ;;  %v1608_v27 = vpop.f32.mrf.mxu1  ;;  %v1560_v2 = vadd.f32 %v1559_v57, %v9398_v35  ;;  %v7709_v35 = vld [vmem:[%s8446_s25 + $0x168] sm:$0xff] }
 0x25a   : > { %v1609_v4 = vadd.f32 %v1608_v27, %v9400_v32 }
 0x25b   : > { %6462 = vmatmul.msk.bf16.gmra.mxu0 %vm210_vm0, %v9164_v48 }
 0x25c   : > { %6470 = vmatmul.msk.bf16.gmra.mxu1 %vm210_vm0, %v9164_v48  ;;  %6528 = vmatmul.msk.bf16.gmra.mxu2 %vm210_vm0, %v7708_v55 }
 0x25d   : > { %6536 = vmatmul.msk.bf16.gmra.mxu3 %vm210_vm0, %v7708_v55 }
 0x25f   : > { %v1657_v26 = vpop.f32.mrf.mxu2 }
 0x260   : > { %v9592_v25 = vadd.f32 %v1657_v26, %v1560_v2  ;;  %v1706_v31 = vpop.f32.mrf.mxu3  ;;  %v1561_v53 = vpop.f32.mrf.mxu0 }
 0x261   : > { %v9594_v7 = vadd.f32 %v1706_v31, %v1609_v4  ;;  %v1610_v3 = vpop.f32.mrf.mxu1  ;;  %v1562_v22 = vadd.f32 %v1561_v53, %v9410_v30 }
 0x262   : > { %v1611_v48 = vadd.f32 %v1610_v3, %v9412_v8 }
 0x267   : > { %v1659_v38 = vpop.f32.mrf.mxu2 }
 0x268   : > { %v9598_v47 = vadd.f32 %v1659_v38, %v1562_v22  ;;  %v1708_v40 = vpop.f32.mrf.mxu3  ;;  %v1564_v11 = vpop.f32.mrf.mxu0 }
 0x269   : > { %v9601_v50 = vadd.f32 %v1708_v40, %v1611_v48  ;;  %v1613_v32 = vpop.f32.mrf.mxu1  ;;  %v1565_v8 = vadd.f32 %v1564_v11, %v9429_v5  ;;  %v7710_v5 = vld [vmem:[%s8446_s25 + $0x170] sm:$0xff] }
 0x26a   : > { %v1614_v30 = vadd.f32 %v1613_v32, %v9431_v24 }
 0x26b   : > { %6463 = vmatmul.msk.bf16.gmra.mxu0 %vm210_vm0, %v9187_v23 }
 0x26c   : > { %6471 = vmatmul.msk.bf16.gmra.mxu1 %vm210_vm0, %v9187_v23  ;;  %6529 = vmatmul.msk.bf16.gmra.mxu2 %vm210_vm0, %v7709_v35 }
 0x26d   : > { %6537 = vmatmul.msk.bf16.gmra.mxu3 %vm210_vm0, %v7709_v35 }
 0x26f   : > { %v1662_v39 = vpop.f32.mrf.mxu2 }
 0x270   : > { %v9611_v6 = vadd.f32 %v1662_v39, %v1565_v8  ;;  %v1711_v57 = vpop.f32.mrf.mxu3  ;;  %v1566_v55 = vpop.f32.mrf.mxu0 }
 0x271   : > { %v9613_v27 = vadd.f32 %v1711_v57, %v1614_v30  ;;  %v1615_v2 = vpop.f32.mrf.mxu1  ;;  %v1567_v4 = vadd.f32 %v1566_v55, %v9441_v49 }
 0x272   : > { %v1616_v23 = vadd.f32 %v1615_v2, %v9443_v29 }
 0x277   : > { %v1664_v26 = vpop.f32.mrf.mxu2 }
 0x278   : > { %v9617_v31 = vadd.f32 %v1664_v26, %v1567_v4  ;;  %v1713_v53 = vpop.f32.mrf.mxu3  ;;  %v1569_v3 = vpop.f32.mrf.mxu0 }
 0x279   : > { %v9620_v22 = vadd.f32 %v1713_v53, %v1616_v23  ;;  %v1618_v24 = vpop.f32.mrf.mxu1  ;;  %v1570_v29 = vadd.f32 %v1569_v3, %v9460_v13  ;;  %v7711_v13 = vld [vmem:[%s8446_s25 + $0x178] sm:$0xff] }
 0x27a   : > { %v1619_v49 = vadd.f32 %v1618_v24, %v9462_v41 }
 0x27b   : > { %6464 = vmatmul.msk.bf16.gmra.mxu0 %vm210_vm0, %v9210_v1 }
 0x27c   : > { %6472 = vmatmul.msk.bf16.gmra.mxu1 %vm210_vm0, %v9210_v1  ;;  %6530 = vmatmul.msk.bf16.gmra.mxu2 %vm210_vm0, %v7710_v5 }
 0x27d   : > { %6538 = vmatmul.msk.bf16.gmra.mxu3 %vm210_vm0, %v7710_v5 }
 0x27f   : > { %v1667_v48 = vpop.f32.mrf.mxu2 }
 0x280   : > { %v9630_v38 = vadd.f32 %v1667_v48, %v1570_v29  ;;  %v1716_v40 = vpop.f32.mrf.mxu3  ;;  %v1571_v11 = vpop.f32.mrf.mxu0 }
 0x281   : > { %v9632_v35 = vadd.f32 %v1716_v40, %v1619_v49  ;;  %v1620_v32 = vpop.f32.mrf.mxu1  ;;  %v1572_v8 = vadd.f32 %v1571_v11, %v9472_v10 }
 0x282   : > { %v1621_v1 = vadd.f32 %v1620_v32, %v9474_v15 }
 0x287   : > { %v1669_v30 = vpop.f32.mrf.mxu2 }
 0x288   : > { %v9636_v39 = vadd.f32 %v1669_v30, %v1572_v8  ;;  %v1718_v57 = vpop.f32.mrf.mxu3  ;;  %v1574_v55 = vpop.f32.mrf.mxu0 }
 0x289   : > { %v9639_v2 = vadd.f32 %v1718_v57, %v1621_v1  ;;  %v1623_v41 = vpop.f32.mrf.mxu1  ;;  %v1575_v15 = vadd.f32 %v1574_v55, %v9491_v18 }
 0x28a   : > { %v1624_v10 = vadd.f32 %v1623_v41, %v9493_v54 }
 0x28b   : > { %6465 = vmatmul.msk.bf16.gmra.mxu0 %vm210_vm0, %v9233_v21 }
 0x28c   : > { %6473 = vmatmul.msk.bf16.gmra.mxu1 %vm210_vm0, %v9233_v21  ;;  %6531 = vmatmul.msk.bf16.gmra.mxu2 %vm210_vm0, %v7711_v13 }
 0x28d   : > { %6539 = vmatmul.msk.bf16.gmra.mxu3 %vm210_vm0, %v7711_v13 }
 0x28f   : > { %v1672_v4 = vpop.f32.mrf.mxu2 }
 0x290   : > { %v9649_v23 = vadd.f32 %v1672_v4, %v1575_v15  ;;  %v1721_v26 = vpop.f32.mrf.mxu3  ;;  %v1576_v53 = vpop.f32.mrf.mxu0 }
 0x291   : > { %v9651_v3 = vadd.f32 %v1721_v26, %v1624_v10  ;;  %v1625_v5 = vpop.f32.mrf.mxu1  ;;  %v1577_v24 = vadd.f32 %v1576_v53, %v9503_v56  ;;  %v9669_v53 = vld [vmem:[%s11768_s2] ss:$0 sm:$0xff] }
 0x292   : > { %v1626_v21 = vadd.f32 %v1625_v5, %v9505_v62  ;;  %v11940_v62 = vmax.f32 %v9260_v28, %v9263_v17  ;;  %v11941_v17 = vmax.f32 %v9279_v12, %v9282_v59  ;;  %v11942_v12 = vmax.f32 %v9291_v0, %v9294_v19 }
 0x297   : > { %v1674_v29 = vpop.f32.mrf.mxu2 }
 0x298   : > { %v9655_v49 = vadd.f32 %v1674_v29, %v1577_v24  ;;  %v1723_v48 = vpop.f32.mrf.mxu3  ;;  %v1767_v40 = vpop.f32.mrf.mxu0 }
 0x299   : > { %v9657_v18 = vadd.f32 %v1723_v48, %v1626_v21  ;;  %v1816_v54 = vpop.f32.mrf.mxu1  ;;  %v1856_v11 = vadd.f32 %v1767_v40, %v9516_v36 }
 0x29a   : > { %v1857_v32 = vadd.f32 %v1816_v54, %v9518_v14 }
 0x29f   : > { %v1981_v8 = vpop.f32.mrf.mxu2 }
 0x2a0   : > { %v2070_v1 = vadd.f32 %v1981_v8, %v1856_v11  ;;  %v2030_v30 = vpop.f32.mrf.mxu3  ;;  %v1769_v57 = vpop.f32.mrf.mxu0 }
 0x2a1   : > { %v2071_v55 = vadd.f32 %v2030_v30, %v1857_v32  ;;  %v1818_v56 = vpop.f32.mrf.mxu1  ;;  %v1858_v15 = vadd.f32 %v1769_v57, %v9522_v45 }
 0x2a2   : > { %v1859_v10 = vadd.f32 %v1818_v56, %v9525_v51 }
 0x2a3   : > { %v2102_v13 = vmax.f32 %v2070_v1, %v2071_v55 }
 0x2a5   : > { %v2118_v41 = vmax.f32 %v11940_v62, %v2102_v13 }
 0x2a7   : > { %v1983_v4 = vpop.f32.mrf.mxu2  ;;  %v2138_v28 = vadd.f32 %v9669_v53, %v2118_v41 }
 0x2a8   : > { %v2072_v36 = vadd.f32 %v1983_v4, %v1858_v15  ;;  %v2032_v26 = vpop.f32.mrf.mxu3  ;;  %v1772_v14 = vpop.f32.mrf.mxu0 }
 0x2a9   : > { %v2073_v5 = vadd.f32 %v2032_v26, %v1859_v10  ;;  %v1821_v24 = vpop.f32.mrf.mxu1  ;;  %v1860_v51 = vadd.f32 %v1772_v14, %v9535_v37  ;;  %v2154_v8 = vmax.f32 %v2138_v28, 0.0  ;;  %v11943_v14 = vmax.f32 %v9310_v52, %v9313_v20  ;;  %v11944_v52 = vld [vmem:[#allocation9_spill] sm:$0xff] }
 0x2aa   : > { %v1861_v48 = vadd.f32 %v1821_v24, %v9537_v44  ;;  %v11945_v20 = vmax.f32 %v9322_v42, %v11944_v52  ;;  %v11953_v52 = vld [vmem:[#allocation12_spill] sm:$0xff] }
 0x2ab   : > { %v2103_v21 = vmax.f32 %v2072_v36, %v2073_v5 }
 0x2ad   : > { %v2119_v45 = vmax.f32 %v11941_v17, %v2103_v21 }
 0x2af   : > { %v2139_v29 = vadd.f32 %v9669_v53, %v2119_v45  ;;  %v1986_v40 = vpop.f32.mrf.mxu2 }
 0x2b0   : > { %v2074_v54 = vadd.f32 %v1986_v40, %v1860_v51  ;;  %v2035_v11 = vpop.f32.mrf.mxu3  ;;  %v1774_v32 = vpop.f32.mrf.mxu0 }
 0x2b1   : > { %v2155_v1 = vmax.f32 %v2139_v29, 0.0  ;;  %v2075_v30 = vadd.f32 %v2035_v11, %v1861_v48  ;;  %v1823_v57 = vpop.f32.mrf.mxu1  ;;  %v1862_v37 = vadd.f32 %v1774_v32, %v9541_v9 }
 0x2b2   : > { %v1863_v44 = vadd.f32 %v1823_v57, %v9544_v63 }
 0x2b3   : > { %v7948_v55 = vpack.c.bf16 %v2155_v1, %v2154_v8  ;;  %v2104_v56 = vmax.f32 %v2074_v54, %v2075_v30 }
 0x2b5   : > { %7949 = vst [vmem:[%s9679_s20] sm:$0xff] %v7948_v55   ;;  %v2120_v59 = vmax.f32 %v11942_v12, %v2104_v56  ;;  %v11946_v12 = vld [vmem:[#allocation10_spill] sm:$0xff] }
 0x2b7   : > { %v1988_v13 = vpop.f32.mrf.mxu2  ;;  %v2140_v26 = vadd.f32 %v9669_v53, %v2120_v59  ;;  %v11947_v59 = vld [vmem:[#allocation11_spill] sm:$0xff] }
 0x2b8   : > { %v2076_v62 = vadd.f32 %v1988_v13, %v1862_v37  ;;  %v2037_v41 = vpop.f32.mrf.mxu3  ;;  %v1777_v15 = vpop.f32.mrf.mxu0  ;;  %v11948_v37 = vmax.f32 %v11946_v12, %v11947_v59  ;;  %v11955_v59 = vld [vmem:[#allocation16_spill] sm:$0xff] }
 0x2b9   : > { %v2077_v10 = vadd.f32 %v2037_v41, %v1863_v44  ;;  %v1826_v4 = vpop.f32.mrf.mxu1  ;;  %v1864_v0 = vadd.f32 %v1777_v15, %v9554_v34  ;;  %v2156_v17 = vmax.f32 %v2140_v26, 0.0 }
 0x2ba   : > { %v1865_v9 = vadd.f32 %v1826_v4, %v9556_v16 }
 0x2bb   : > { %v2105_v36 = vmax.f32 %v2076_v62, %v2077_v10 }
 0x2bd   : > { %v2121_v5 = vmax.f32 %v11943_v14, %v2105_v36 }
 0x2bf   : > { %v2141_v19 = vadd.f32 %v9669_v53, %v2121_v5  ;;  %v1991_v63 = vpop.f32.mrf.mxu2 }
 0x2c0   : > { %v2078_v24 = vadd.f32 %v1991_v63, %v1864_v0  ;;  %v2040_v21 = vpop.f32.mrf.mxu3  ;;  %v1779_v28 = vpop.f32.mrf.mxu0  ;;  %v11949_v0 = vld [vmem:[#allocation7_spill] sm:$0xff] }
 0x2c1   : > { %v2157_v45 = vmax.f32 %v2141_v19, 0.0  ;;  %v2079_v51 = vadd.f32 %v2040_v21, %v1865_v9  ;;  %v1828_v29 = vpop.f32.mrf.mxu1  ;;  %v1866_v34 = vadd.f32 %v1779_v28, %v9560_v43  ;;  %v11950_v19 = vld [vmem:[#allocation13_spill] sm:$0xff] }
 0x2c2   : > { %v1867_v11 = vadd.f32 %v1828_v29, %v9563_v60  ;;  %v11951_v9 = vmax.f32 %v11949_v0, %v11950_v19 }
 0x2c3   : > { %v7953_v48 = vpack.c.bf16 %v2157_v45, %v2156_v17  ;;  %v2106_v40 = vmax.f32 %v2078_v24, %v2079_v51 }
 0x2c5   : > { %8025 = vst [vmem:[%s9679_s20 + $0x8] sm:$0xff] %v7953_v48   ;;  %v2122_v54 = vmax.f32 %v11945_v20, %v2106_v40  ;;  %v11952_v40 = vld [vmem:[#allocation15_spill] sm:$0xff] }
 0x2c6   : > { %v11954_v20 = vmax.f32 %v11952_v40, %v11953_v52 }
 0x2c7   : > { %v1993_v16 = vpop.f32.mrf.mxu2  ;;  %v2142_v56 = vadd.f32 %v9669_v53, %v2122_v54 }
 0x2c8   : > { %v2080_v32 = vadd.f32 %v1993_v16, %v1866_v34  ;;  %v2042_v8 = vpop.f32.mrf.mxu3  ;;  %v1782_v1 = vpop.f32.mrf.mxu0 }
 0x2c9   : > { %v2081_v30 = vadd.f32 %v2042_v8, %v1867_v11  ;;  %v1831_v57 = vpop.f32.mrf.mxu1  ;;  %v1868_v42 = vadd.f32 %v1782_v1, %v9573_v58  ;;  %v2158_v10 = vmax.f32 %v2142_v56, 0.0 }
 0x2ca   : > { %v1869_v60 = vadd.f32 %v1831_v57, %v9575_v46 }
 0x2cb   : > { %v2107_v55 = vmax.f32 %v2080_v32, %v2081_v30 }
 0x2cd   : > { %v2123_v44 = vmax.f32 %v11948_v37, %v2107_v55  ;;  %v11956_v37 = vld [vmem:[#allocation18_spill] sm:$0xff] }
 0x2cf   : > { %v2143_v43 = vadd.f32 %v9669_v53, %v2123_v44  ;;  %v1996_v13 = vpop.f32.mrf.mxu2  ;;  %v11957_v44 = vmax.f32 %v11955_v59, %v11956_v37 }
 0x2d0   : > { %v2082_v62 = vadd.f32 %v1996_v13, %v1868_v42  ;;  %v2045_v41 = vpop.f32.mrf.mxu3  ;;  %v1784_v15 = vpop.f32.mrf.mxu0 }
 0x2d1   : > { %v2159_v4 = vmax.f32 %v2143_v43, 0.0  ;;  %v2083_v36 = vadd.f32 %v2045_v41, %v1869_v60  ;;  %v1833_v26 = vpop.f32.mrf.mxu1  ;;  %v1870_v58 = vadd.f32 %v1784_v15, %v9579_v61 }
 0x2d2   : > { %v1871_v24 = vadd.f32 %v1833_v26, %v9582_v33  ;;  %v11959_v26 = vld [vmem:[#allocation23_spill] sm:$0xff] }
 0x2d3   : > { %v7958_v14 = vpack.c.bf16 %v2159_v4, %v2158_v10  ;;  %v2108_v5 = vmax.f32 %v2082_v62, %v2083_v36  ;;  %v11958_v36 = vld [vmem:[#allocation21_spill] sm:$0xff] }
 0x2d5   : > { %8026 = vst [vmem:[%s9679_s20 + $0x10] sm:$0xff] %v7958_v14   ;;  %v2124_v63 = vmax.f32 %v11951_v9, %v2108_v5  ;;  %v11960_v14 = vmax.f32 %v11958_v36, %v11959_v26 }
 0x2d7   : > { %v1998_v46 = vpop.f32.mrf.mxu2  ;;  %v2144_v48 = vadd.f32 %v9669_v53, %v2124_v63 }
 0x2d8   : > { %v2084_v21 = vadd.f32 %v1998_v46, %v1870_v58  ;;  %v2047_v28 = vpop.f32.mrf.mxu3  ;;  %v1787_v17 = vpop.f32.mrf.mxu0 }
 0x2d9   : > { %v2085_v45 = vadd.f32 %v2047_v28, %v1871_v24  ;;  %v1836_v51 = vpop.f32.mrf.mxu1  ;;  %v1872_v34 = vadd.f32 %v1787_v17, %v9592_v25  ;;  %v2160_v1 = vmax.f32 %v2144_v48, 0.0 }
 0x2da   : > { %v1873_v33 = vadd.f32 %v1836_v51, %v9594_v7  ;;  %v11961_v51 = vld [vmem:[#allocation20_spill] sm:$0xff] }
 0x2db   : > { %v2109_v29 = vmax.f32 %v2084_v21, %v2085_v45 }
 0x2dd   : > { %v2125_v54 = vmax.f32 %v11954_v20, %v2109_v29  ;;  %v11962_v29 = vld [vmem:[#allocation4_spill] sm:$0xff] }
 0x2de   : > { %v11963_v48 = vmax.f32 %v11961_v51, %v11962_v29 }
 0x2df   : > { %v2145_v61 = vadd.f32 %v9669_v53, %v2125_v54  ;;  %v2001_v11 = vpop.f32.mrf.mxu2 }
 0x2e0   : > { %v2086_v16 = vadd.f32 %v2001_v11, %v1872_v34  ;;  %v2050_v32 = vpop.f32.mrf.mxu3  ;;  %v1789_v8 = vpop.f32.mrf.mxu0 }
 0x2e1   : > { %v2161_v30 = vmax.f32 %v2145_v61, 0.0  ;;  %v2087_v57 = vadd.f32 %v2050_v32, %v1873_v33  ;;  %v1838_v55 = vpop.f32.mrf.mxu1  ;;  %v1874_v25 = vadd.f32 %v1789_v8, %v9598_v47  ;;  %v11964_v32 = vld [vmem:[#allocation5_spill] sm:$0xff]  ;;  %v11965_v8 = vld [vmem:[#allocation6_spill] sm:$0xff] }
 0x2e2   : > { %v1875_v43 = vadd.f32 %v1838_v55, %v9601_v50 }
 0x2e3   : > { %v7963_v56 = vpack.c.bf16 %v2161_v30, %v2160_v1  ;;  %v2110_v12 = vmax.f32 %v2086_v16, %v2087_v57  ;;  %v11966_v1 = vmax.f32 %v11964_v32, %v11965_v8  ;;  %v11977_v32 = vld [vmem:[#allocation26_spill] sm:$0xff] }
 0x2e5   : > { %8027 = vst [vmem:[%s9679_s20 + $0x18] sm:$0xff] %v7963_v56   ;;  %v2126_v42 = vmax.f32 %v11957_v44, %v2110_v12 }
 0x2e7   : > { %v2003_v7 = vpop.f32.mrf.mxu2  ;;  %v2146_v4 = vadd.f32 %v9669_v53, %v2126_v42 }
 0x2e8   : > { %v2088_v60 = vadd.f32 %v2003_v7, %v1874_v25  ;;  %v2052_v13 = vpop.f32.mrf.mxu3  ;;  %v1792_v62 = vpop.f32.mrf.mxu0 }
 0x2e9   : > { %v2089_v41 = vadd.f32 %v2052_v13, %v1875_v43  ;;  %v1841_v15 = vpop.f32.mrf.mxu1  ;;  %v1876_v0 = vadd.f32 %v1792_v62, %v9611_v6  ;;  %v2162_v24 = vmax.f32 %v2146_v4, 0.0  ;;  %v11968_v13 = vld [vmem:[#allocation14_spill] sm:$0xff] }
 0x2ea   : > { %v1877_v50 = vadd.f32 %v1841_v15, %v9613_v27 }
 0x2eb   : > { %v2111_v10 = vmax.f32 %v2088_v60, %v2089_v41  ;;  %v11967_v60 = vld [vmem:[#allocation8_spill] sm:$0xff] }
 0x2ec   : > { %v11969_v62 = vmax.f32 %v11967_v60, %v11968_v13 }
 0x2ed   : > { %v2127_v5 = vmax.f32 %v11960_v14, %v2111_v10 }
 0x2ef   : > { %v2147_v47 = vadd.f32 %v9669_v53, %v2127_v5  ;;  %v2006_v19 = vpop.f32.mrf.mxu2 }
 0x2f0   : > { %v2090_v9 = vadd.f32 %v2006_v19, %v1876_v0  ;;  %v2055_v63 = vpop.f32.mrf.mxu3  ;;  %v1794_v58 = vpop.f32.mrf.mxu0 }
 0x2f1   : > { %v2163_v46 = vmax.f32 %v2147_v47, 0.0  ;;  %v2091_v21 = vadd.f32 %v2055_v63, %v1877_v50  ;;  %v1843_v28 = vpop.f32.mrf.mxu1  ;;  %v1878_v6 = vadd.f32 %v1794_v58, %v9617_v31  ;;  %v11970_v47 = vld [vmem:[#allocation17_spill] sm:$0xff]  ;;  %v11971_v50 = vld [vmem:[#allocation19_spill] sm:$0xff] }
 0x2f2   : > { %v1879_v52 = vadd.f32 %v1843_v28, %v9620_v22  ;;  %v11972_v19 = vmax.f32 %v11970_v47, %v11971_v50 }
 0x2f3   : > { %v7968_v17 = vpack.c.bf16 %v2163_v46, %v2162_v24  ;;  %v2112_v45 = vmax.f32 %v2090_v9, %v2091_v21 }
 0x2f5   : > { %8028 = vst [vmem:[%s9679_s20 + $0x20] sm:$0xff] %v7968_v17   ;;  %v2128_v40 = vmax.f32 %v11963_v48, %v2112_v45 }
 0x2f7   : > { %v2008_v27 = vpop.f32.mrf.mxu2  ;;  %v2148_v16 = vadd.f32 %v9669_v53, %v2128_v40  ;;  %v11973_v40 = vld [vmem:[#allocation24_spill] sm:$0xff] }
 0x2f8   : > { %v2092_v20 = vadd.f32 %v2008_v27, %v1878_v6  ;;  %v2057_v54 = vpop.f32.mrf.mxu3  ;;  %v1797_v34 = vpop.f32.mrf.mxu0  ;;  %v11974_v6 = vld [vmem:[#allocation25_spill] sm:$0xff] }
 0x2f9   : > { %v2093_v61 = vadd.f32 %v2057_v54, %v1879_v52  ;;  %v1846_v33 = vpop.f32.mrf.mxu1  ;;  %v1880_v57 = vadd.f32 %v1797_v34, %v9630_v38  ;;  %v2164_v37 = vmax.f32 %v2148_v16, 0.0  ;;  %v11975_v52 = vmax.f32 %v11973_v40, %v11974_v6  ;;  %v11976_v16 = vld [vmem:[#allocation22_spill] sm:$0xff] }
 0x2fa   : > { %v1881_v22 = vadd.f32 %v1846_v33, %v9632_v35  ;;  %v11978_v8 = vmax.f32 %v11976_v16, %v11977_v32 }
 0x2fb   : > { %v2113_v11 = vmax.f32 %v2092_v20, %v2093_v61 }
 0x2fd   : > { %v2129_v30 = vmax.f32 %v11966_v1, %v2113_v11 }
 0x2ff   : > { %v2149_v31 = vadd.f32 %v9669_v53, %v2129_v30  ;;  %v2011_v55 = vpop.f32.mrf.mxu2 }
 0x300   : > { %v2094_v56 = vadd.f32 %v2011_v55, %v1880_v57  ;;  %v2060_v12 = vpop.f32.mrf.mxu3  ;;  %v1799_v59 = vpop.f32.mrf.mxu0 }
 0x301   : > { %v2165_v44 = vmax.f32 %v2149_v31, 0.0  ;;  %v2095_v42 = vadd.f32 %v2060_v12, %v1881_v22  ;;  %v1848_v25 = vpop.f32.mrf.mxu1  ;;  %v1882_v38 = vadd.f32 %v1799_v59, %v9636_v39 }
 0x302   : > { %v1883_v15 = vadd.f32 %v1848_v25, %v9639_v2 }
 0x303   : > { %v7973_v43 = vpack.c.bf16 %v2165_v44, %v2164_v37  ;;  %v2114_v7 = vmax.f32 %v2094_v56, %v2095_v42 }
 0x305   : > { %8029 = vst [vmem:[%s9679_s20 + $0x28] sm:$0xff] %v7973_v43   ;;  %v2130_v41 = vmax.f32 %v11969_v62, %v2114_v7 }
 0x307   : > { %v2013_v35 = vpop.f32.mrf.mxu2  ;;  %v2150_v0 = vadd.f32 %v9669_v53, %v2130_v41 }
 0x308   : > { %v2096_v10 = vadd.f32 %v2013_v35, %v1882_v38  ;;  %v2062_v4 = vpop.f32.mrf.mxu3  ;;  %v1802_v26 = vpop.f32.mrf.mxu0 }
 0x309   : > { %v2097_v36 = vadd.f32 %v2062_v4, %v1883_v15  ;;  %v1851_v14 = vpop.f32.mrf.mxu1  ;;  %v1884_v63 = vadd.f32 %v1802_v26, %v9649_v23  ;;  %v2166_v21 = vmax.f32 %v2150_v0, 0.0 }
 0x30a   : > { %v1885_v2 = vadd.f32 %v1851_v14, %v9651_v3 }
 0x30b   : > { %v2115_v5 = vmax.f32 %v2096_v10, %v2097_v36 }
 0x30d   : > { %v2131_v9 = vmax.f32 %v11972_v19, %v2115_v5 }
 0x30f   : > { %v2151_v39 = vadd.f32 %v9669_v53, %v2131_v9  ;;  %v2016_v58 = vpop.f32.mrf.mxu2 }
 0x310   : > { %v2098_v24 = vadd.f32 %v2016_v58, %v1884_v63  ;;  %v2065_v46 = vpop.f32.mrf.mxu3  ;;  %v1804_v29 = vpop.f32.mrf.mxu0 }
 0x311   : > { %v2167_v28 = vmax.f32 %v2151_v39, 0.0  ;;  %v2099_v17 = vadd.f32 %v2065_v46, %v1885_v2  ;;  %v1853_v48 = vpop.f32.mrf.mxu1  ;;  %v1886_v27 = vadd.f32 %v1804_v29, %v9655_v49 }
 0x312   : > { %v1887_v3 = vadd.f32 %v1853_v48, %v9657_v18 }
 0x313   : > { %v7978_v45 = vpack.c.bf16 %v2167_v28, %v2166_v21  ;;  %v2116_v51 = vmax.f32 %v2098_v24, %v2099_v17 }
 0x315   : > { %8030 = vst [vmem:[%s9679_s20 + $0x30] sm:$0xff] %v7978_v45   ;;  %v2132_v23 = vmax.f32 %v11975_v52, %v2116_v51 }
 0x317   : > { %v2018_v20 = vpop.f32.mrf.mxu2  ;;  %v2152_v11 = vadd.f32 %v9669_v53, %v2132_v23 }
 0x318   : > { %v2100_v54 = vadd.f32 %v2018_v20, %v1886_v27  ;;  %v2067_v34 = vpop.f32.mrf.mxu3 }
 0x319   : > { %v2101_v61 = vadd.f32 %v2067_v34, %v1887_v3  ;;  %v2168_v57 = vmax.f32 %v2152_v11, 0.0 }
 0x31b   : > { %v2117_v33 = vmax.f32 %v2100_v54, %v2101_v61 }
 0x31d   : > { %v2133_v1 = vmax.f32 %v11978_v8, %v2117_v33 }
 0x31f   : > { %v2153_v30 = vadd.f32 %v9669_v53, %v2133_v1 }
 0x321   : > { %v2169_v31 = vmax.f32 %v2153_v30, 0.0  ;;  %43 = sbr.rel (!%p41_p0) target bundleno = 1 (0x1), region = 104 }
 0x323   : > { %v7983_v22 = vpack.c.bf16 %v2169_v31, %v2168_v57 }
 0x325   : > { %8031 = vst [vmem:[%s9679_s20 + $0x38] sm:$0xff] %v7983_v22  }
 0x326 LB: > { %v6669_v49 = vld [vmem:[%s11769_s3 + $0xf0] sm:$0xf]  ;;  %v7763_v18 = vld [vmem:[%s11769_s3 + $0xf4] sm:$0xf0]  ;;  %v7762_v53 = vld [vmem:[%s11769_s3 + $0xf4] sm:$0xf]  ;;  %s8178_s21 = sphi %s9774_s21, %s2210_s21  }
 0x327   : > { %v9788_v55 = vor.u32 %v7763_v18, %v6669_v49  ;;  %v6671_v56 = vld [vmem:[%s11769_s3 + $0xf8] sm:$0xf0]  ;;  %v6765_v12 = vld [vmem:[%s11769_s3 + $0x70] sm:$0xf]  ;;  %v7738_v59 = vld [vmem:[%s11769_s3 + $0x74] sm:$0xf0] }
 0x328   : > { %v9799_v37 = vor.u32 %v7762_v53, %v6671_v56  ;;  %v9801_v44 = vor.u32 %v7738_v59, %v6765_v12  ;;  %v7737_v42 = vld [vmem:[%s11769_s3 + $0x74] sm:$0xf]  ;;  %v6767_v25 = vld [vmem:[%s11769_s3 + $0x78] sm:$0xf0]  ;;  %v6661_v43 = vld [vmem:[%s11769_s3 + $0xe0] sm:$0xf] }
 0x329   : > { %2412 = vmatpush.bf16.msra.mxu0 %v9788_v55  ;;  %v9813_v7 = vor.u32 %v7737_v42, %v6767_v25  ;;  %v7761_v60 = vld [vmem:[%s11769_s3 + $0xe4] sm:$0xf0]  ;;  %v7760_v13 = vld [vmem:[%s11769_s3 + $0xe4] sm:$0xf]  ;;  %v6663_v62 = vld [vmem:[%s11769_s3 + $0xe8] sm:$0xf0] }
 0x32a   : > { %2461 = vmatpush.bf16.msra.mxu1 %v9799_v37  ;;  %2638 = vmatpush.bf16.msra.mxu2 %v9801_v44  ;;  %v9826_v41 = vor.u32 %v7761_v60, %v6661_v43  ;;  %v9828_v38 = vor.u32 %v7760_v13, %v6663_v62  ;;  %v6757_v15 = vld [vmem:[%s11769_s3 + $0x60] sm:$0xf]  ;;  %v7736_v35 = vld [vmem:[%s11769_s3 + $0x64] sm:$0xf0]  ;;  %v7735_v10 = vld [vmem:[%s11769_s3 + $0x64] sm:$0xf] }
 0x32b   : > { %2687 = vmatpush.bf16.msra.mxu3 %v9813_v7  ;;  %v9840_v4 = vor.u32 %v7736_v35, %v6757_v15  ;;  %v6759_v36 = vld [vmem:[%s11769_s3 + $0x68] sm:$0xf0]  ;;  %v6653_v26 = vld [vmem:[%s11769_s3 + $0xd0] sm:$0xf]  ;;  %v7759_v14 = vld [vmem:[%s11769_s3 + $0xd4] sm:$0xf0] }
 0x32c   : > { %v9851_v5 = vor.u32 %v7735_v10, %v6759_v36  ;;  %v7758_v0 = vld [vmem:[%s11769_s3 + $0xd4] sm:$0xf]  ;;  %v6655_v47 = vld [vmem:[%s11769_s3 + $0xd8] sm:$0xf0]  ;;  %v6749_v50 = vld [vmem:[%s11769_s3 + $0x50] sm:$0xf]  ;;  %v9863_v19 = vor.u32 %v7759_v14, %v6653_v26 }
 0x32d   : > { %2413 = vmatpush.bf16.msra.mxu0 %v9826_v41  ;;  %v7734_v9 = vld [vmem:[%s11769_s3 + $0x54] sm:$0xf0]  ;;  %v7733_v63 = vld [vmem:[%s11769_s3 + $0x54] sm:$0xf]  ;;  %v6751_v39 = vld [vmem:[%s11769_s3 + $0x58] sm:$0xf0]  ;;  %v9876_v2 = vor.u32 %v7758_v0, %v6655_v47 }
 0x32e   : > { %2462 = vmatpush.bf16.msra.mxu1 %v9828_v38  ;;  %2639 = vmatpush.bf16.msra.mxu2 %v9840_v4  ;;  %v9878_v58 = vor.u32 %v7734_v9, %v6749_v50  ;;  %v6645_v24 = vld [vmem:[%s11769_s3 + $0xc0] sm:$0xf]  ;;  %v7757_v46 = vld [vmem:[%s11769_s3 + $0xc4] sm:$0xf0]  ;;  %v7756_v21 = vld [vmem:[%s11769_s3 + $0xc4] sm:$0xf]  ;;  %v9890_v28 = vor.u32 %v7733_v63, %v6751_v39 }
 0x32f   : > { %2688 = vmatpush.bf16.msra.mxu3 %v9851_v5  ;;  %v6647_v17 = vld [vmem:[%s11769_s3 + $0xc8] sm:$0xf0]  ;;  %v6741_v45 = vld [vmem:[%s11769_s3 + $0x40] sm:$0xf]  ;;  %v7732_v51 = vld [vmem:[%s11769_s3 + $0x44] sm:$0xf0]  ;;  %v9908_v40 = vor.u32 %v7757_v46, %v6645_v24 }
 0x330   : > { %v7731_v29 = vld [vmem:[%s11769_s3 + $0x44] sm:$0xf]  ;;  %v6743_v48 = vld [vmem:[%s11769_s3 + $0x48] sm:$0xf0]  ;;  %v9912_v6 = vor.u32 %v7756_v21, %v6647_v17  ;;  %v9914_v52 = vor.u32 %v7732_v51, %v6741_v45  ;;  %v6637_v23 = vld [vmem:[%s11769_s3 + $0xb0] sm:$0xf] }
 0x331   : > { %2414 = vmatpush.bf16.msra.mxu0 %v9863_v19  ;;  %v7755_v27 = vld [vmem:[%s11769_s3 + $0xb4] sm:$0xf0]  ;;  %v7754_v3 = vld [vmem:[%s11769_s3 + $0xb4] sm:$0xf]  ;;  %v9926_v20 = vor.u32 %v7731_v29, %v6743_v48  ;;  %v6639_v54 = vld [vmem:[%s11769_s3 + $0xb8] sm:$0xf0] }
 0x332   : > { %2463 = vmatpush.bf16.msra.mxu1 %v9876_v2  ;;  %2640 = vmatpush.bf16.msra.mxu2 %v9878_v58  ;;  %v6733_v34 = vld [vmem:[%s11769_s3 + $0x30] sm:$0xf]  ;;  %v7730_v61 = vld [vmem:[%s11769_s3 + $0x34] sm:$0xf0]  ;;  %v7729_v33 = vld [vmem:[%s11769_s3 + $0x34] sm:$0xf]  ;;  %v9944_v16 = vor.u32 %v7755_v27, %v6637_v23  ;;  %v9948_v32 = vor.u32 %v7754_v3, %v6639_v54 }
 0x333   : > { %2689 = vmatpush.bf16.msra.mxu3 %v9890_v28  ;;  %v6735_v11 = vld [vmem:[%s11769_s3 + $0x38] sm:$0xf0]  ;;  %v9950_v8 = vor.u32 %v7730_v61, %v6733_v34  ;;  %v6629_v1 = vld [vmem:[%s11769_s3 + $0xa0] sm:$0xf]  ;;  %v7753_v30 = vld [vmem:[%s11769_s3 + $0xa4] sm:$0xf0] }
 0x334   : > { %v7752_v57 = vld [vmem:[%s11769_s3 + $0xa4] sm:$0xf]  ;;  %v9962_v31 = vor.u32 %v7729_v33, %v6735_v11  ;;  %v6631_v22 = vld [vmem:[%s11769_s3 + $0xa8] sm:$0xf0]  ;;  %v6725_v49 = vld [vmem:[%s11769_s3 + $0x20] sm:$0xf]  ;;  %v9980_v12 = vor.u32 %v7753_v30, %v6629_v1 }
 0x335   : > { %2415 = vmatpush.bf16.msra.mxu0 %v9908_v40  ;;  %v7728_v18 = vld [vmem:[%s11769_s3 + $0x24] sm:$0xf0]  ;;  %v7727_v53 = vld [vmem:[%s11769_s3 + $0x24] sm:$0xf]  ;;  %v6727_v56 = vld [vmem:[%s11769_s3 + $0x28] sm:$0xf0]  ;;  %v9984_v59 = vor.u32 %v7752_v57, %v6631_v22 }
 0x336   : > { %2464 = vmatpush.bf16.msra.mxu1 %v9912_v6  ;;  %2641 = vmatpush.bf16.msra.mxu2 %v9914_v52  ;;  %v9986_v42 = vor.u32 %v7728_v18, %v6725_v49  ;;  %v6621_v25 = vld [vmem:[%s11769_s3 + $0x90] sm:$0xf]  ;;  %v7751_v43 = vld [vmem:[%s11769_s3 + $0x94] sm:$0xf0]  ;;  %v7750_v60 = vld [vmem:[%s11769_s3 + $0x94] sm:$0xf]  ;;  %v9998_v13 = vor.u32 %v7727_v53, %v6727_v56 }
 0x337   : > { %2690 = vmatpush.bf16.msra.mxu3 %v9926_v20  ;;  %v6623_v62 = vld [vmem:[%s11769_s3 + $0x98] sm:$0xf0]  ;;  %v6717_v15 = vld [vmem:[%s11769_s3 + $0x10] sm:$0xf]  ;;  %v7726_v35 = vld [vmem:[%s11769_s3 + $0x14] sm:$0xf0]  ;;  %v10017_v26 = vor.u32 %v7751_v43, %v6621_v25 }
 0x338   : > { %v7725_v10 = vld [vmem:[%s11769_s3 + $0x14] sm:$0xf]  ;;  %v6719_v36 = vld [vmem:[%s11769_s3 + $0x18] sm:$0xf0]  ;;  %s7714_s1 = sshll.u32 %s8178_s21, 7  ;;  %v10027_v47 = vor.u32 %v7750_v60, %v6623_v62  ;;  %v10029_v50 = vor.u32 %v7726_v35, %v6717_v15 }
 0x339   : > { %2416 = vmatpush.bf16.msra.mxu0 %v9944_v16  ;;  %v6613_v14 = vld [vmem:[%s11769_s3 + $0x80] sm:$0xf]  ;;  %v7749_v0 = vld [vmem:[%s11769_s3 + $0x84] sm:$0xf0]  ;;  %v7748_v9 = vld [vmem:[%s11769_s3 + $0x84] sm:$0xf]  ;;  %v10041_v24 = vor.u32 %v7725_v10, %v6719_v36 }
 0x33a   : > { %2465 = vmatpush.bf16.msra.mxu1 %v9948_v32  ;;  %2642 = vmatpush.bf16.msra.mxu2 %v9950_v8  ;;  %v6615_v63 = vld [vmem:[%s11769_s3 + $0x88] sm:$0xf0]  ;;  %v6709_v39 = vld [vmem:[%s11769_s3] sm:$0xf]  ;;  %v7724_v46 = vld [vmem:[%s11769_s3 + $0x4] sm:$0xf0]  ;;  %v10059_v29 = vor.u32 %v7749_v0, %v6613_v14 }
 0x33b   : > { %2691 = vmatpush.bf16.msra.mxu3 %v9962_v31  ;;  %v7723_v21 = vld [vmem:[%s11769_s3 + $0x4] sm:$0xf]  ;;  %v6711_v17 = vld [vmem:[%s11769_s3 + $0x8] sm:$0xf0]  ;;  %v7025_v45 = vld [vmem:[%s11769_s3 + $0x1f0] sm:$0xf]  ;;  %v10069_v27 = vor.u32 %v7748_v9, %v6615_v63  ;;  %v10071_v3 = vor.u32 %v7724_v46, %v6709_v39 }
 0x33c   : > { %v7813_v51 = vld [vmem:[%s11769_s3 + $0x1f4] sm:$0xf0]  ;;  %v7812_v48 = vld [vmem:[%s11769_s3 + $0x1f4] sm:$0xf]  ;;  %v7027_v23 = vld [vmem:[%s11769_s3 + $0x1f8] sm:$0xf0]  ;;  %v10080_v61 = vor.u32 %v7723_v21, %v6711_v17 }
 0x33d   : > { %2417 = vmatpush.bf16.msra.mxu0 %v9980_v12  ;;  %s10073_s12 = scalar_lea.vmem [#allocation2], %s7714_s1  ;;  %v6895_v34 = vld [vmem:[%s11769_s3 + $0x170] sm:$0xf]  ;;  %v10082_v33 = vor.u32 %v7813_v51, %v7025_v45  ;;  %v7788_v11 = vld [vmem:[%s11769_s3 + $0x174] sm:$0xf0]  ;;  %v10090_v30 = vor.u32 %v7812_v48, %v7027_v23  ;;  %s7848_s1 = sshll.u32 %s8178_s21, 6 }
 0x33e   : > { %2466 = vmatpush.bf16.msra.mxu1 %v9984_v59  ;;  %2643 = vmatpush.bf16.msra.mxu2 %v9986_v42  ;;  %v7740_v54 = vld [vmem:[%s10073_s12 + $0x40] sm:$0xff]  ;;  %v7787_v1 = vld [vmem:[%s11769_s3 + $0x174] sm:$0xf]  ;;  %v6897_v57 = vld [vmem:[%s11769_s3 + $0x178] sm:$0xf0]  ;;  %v10111_v25 = vor.u32 %v7788_v11, %v6895_v34  ;;  %s11250_s18 = scalar_lea.vmem [#allocation3], %s7848_s1 }
 0x33f   : > { %2692 = vmatpush.bf16.msra.mxu3 %v9998_v13  ;;  %v7017_v22 = vld [vmem:[%s11769_s3 + $0x1e0] sm:$0xf]  ;;  %v7811_v49 = vld [vmem:[%s11769_s3 + $0x1e4] sm:$0xf0]  ;;  %v7810_v53 = vld [vmem:[%s11769_s3 + $0x1e4] sm:$0xf]  ;;  %v10115_v43 = vor.u32 %v7787_v1, %v6897_v57 }
 0x340   : > { %v7715_v18 = vld [vmem:[%s10073_s12] sm:$0xff]  ;;  %v7019_v56 = vld [vmem:[%s11769_s3 + $0x1e8] sm:$0xf0]  ;;  %v10117_v60 = vor.u32 %v7811_v49, %v7017_v22  ;;  %v7786_v15 = vld [vmem:[%s11769_s3 + $0x164] sm:$0xf0]  ;;  %s2210_s21 = sadd.s32 1, %s8178_s21  }
 0x341   : > { %2418 = vmatpush.bf16.msra.mxu0 %v10017_v26  ;;  %v6887_v62 = vld [vmem:[%s11769_s3 + $0x160] sm:$0xf]  ;;  %v10126_v35 = vor.u32 %v7810_v53, %v7019_v56  ;;  %v7785_v10 = vld [vmem:[%s11769_s3 + $0x164] sm:$0xf]  ;;  %v6889_v36 = vld [vmem:[%s11769_s3 + $0x168] sm:$0xf0] }
 0x342   : > { %2467 = vmatpush.bf16.msra.mxu1 %v10027_v47  ;;  %2644 = vmatpush.bf16.msra.mxu2 %v10029_v50  ;;  %v10135_v14 = vor.u32 %v7786_v15, %v6887_v62  ;;  %v7009_v0 = vld [vmem:[%s11769_s3 + $0x1d0] sm:$0xf]  ;;  %v7809_v9 = vld [vmem:[%s11769_s3 + $0x1d4] sm:$0xf0]  ;;  %v7808_v63 = vld [vmem:[%s11769_s3 + $0x1d4] sm:$0xf]  ;;  %v10148_v39 = vor.u32 %v7785_v10, %v6889_v36 }
 0x343   : > { %2693 = vmatpush.bf16.msra.mxu3 %v10041_v24  ;;  %v10150_v46 = vor.u32 %v7809_v9, %v7009_v0  ;;  %v7011_v21 = vld [vmem:[%s11769_s3 + $0x1d8] sm:$0xf0]  ;;  %v6879_v17 = vld [vmem:[%s11769_s3 + $0x150] sm:$0xf]  ;;  %v7784_v45 = vld [vmem:[%s11769_s3 + $0x154] sm:$0xf0] }
 0x344   : > { %v10162_v51 = vor.u32 %v7808_v63, %v7011_v21  ;;  %v7783_v48 = vld [vmem:[%s11769_s3 + $0x154] sm:$0xf]  ;;  %v6881_v23 = vld [vmem:[%s11769_s3 + $0x158] sm:$0xf0]  ;;  %v7741_v11 = vld [vmem:[%s10073_s12 + $0x48] sm:$0xff]  ;;  %p2207_p1 = scmp.ge.s32.totalorder %s2210_s21, 5  }
 0x345   : > { %2419 = vmatpush.bf16.msra.mxu0 %v10059_v29  ;;  %v10175_v34 = vor.u32 %v7783_v48, %v6881_v23  ;;  %v7716_v1 = vld [vmem:[%s10073_s12 + $0x8] sm:$0xff]  ;;  %v7001_v57 = vld [vmem:[%s11769_s3 + $0x1c0] sm:$0xf]  ;;  %v7806_v49 = vld [vmem:[%s11769_s3 + $0x1c4] sm:$0xf] }
 0x346   : > { %2468 = vmatpush.bf16.msra.mxu1 %v10069_v27  ;;  %2645 = vmatpush.bf16.msra.mxu2 %v10071_v3  ;;  %v7807_v22 = vld [vmem:[%s11769_s3 + $0x1c4] sm:$0xf0]  ;;  %v7003_v53 = vld [vmem:[%s11769_s3 + $0x1c8] sm:$0xf0]  ;;  %v6871_v56 = vld [vmem:[%s11769_s3 + $0x140] sm:$0xf] }
 0x347   : > { %2694 = vmatpush.bf16.msra.mxu3 %v10080_v61  ;;  %v7782_v62 = vld [vmem:[%s11769_s3 + $0x144] sm:$0xf0]  ;;  %v10202_v15 = vor.u32 %v7806_v49, %v7003_v53  ;;  %v7781_v36 = vld [vmem:[%s11769_s3 + $0x144] sm:$0xf]  ;;  %v6873_v0 = vld [vmem:[%s11769_s3 + $0x148] sm:$0xf0] }
 0x348   : > { %2420 = vmatmul.bf16.vlgmr.msra.gmra.mxu0 %v7740_v54  ;;  %v10204_v10 = vor.u32 %v7782_v62, %v6871_v56  ;;  %v10213_v9 = vor.u32 %v7781_v36, %v6873_v0  ;;  %v7742_v63 = vld [vmem:[%s10073_s12 + $0x50] sm:$0xff]  ;;  %v6865_v56 = vld [vmem:[%s11769_s3 + $0x138] sm:$0xf0] }
 0x349   : > { %2469 = vmatmul.bf16.vlgmr.msra.gmra.mxu1 %v7740_v54  ;;  %2646 = vmatmul.bf16.vlgmr.msra.gmra.mxu2 %v7715_v18  ;;  %v10171_v54 = vor.u32 %v7784_v45, %v6879_v17  ;;  %v7717_v21 = vld [vmem:[%s10073_s12 + $0x10] sm:$0xff]  ;;  %v7805_v45 = vld [vmem:[%s11769_s3 + $0x1b4] sm:$0xf0] }
 0x34a   : > { %3196 = vmatpush.bf16.msrb.mxu2 %v10082_v33  ;;  %2695 = vmatmul.bf16.vlgmr.msra.gmra.mxu3 %v7715_v18  ;;  %v10191_v18 = vor.u32 %v7807_v22, %v7001_v57  ;;  %v6993_v17 = vld [vmem:[%s11769_s3 + $0x1b0] sm:$0xf]  ;;  %v7804_v48 = vld [vmem:[%s11769_s3 + $0x1b4] sm:$0xf]  ;;  %v7780_v57 = vld [vmem:[%s11769_s3 + $0x134] sm:$0xf0] }
 0x34b   : > { %3245 = vmatpush.bf16.msrb.mxu3 %v10090_v30  ;;  %2901 = vmatpush.bf16.msrb.mxu0 %v10111_v25  ;;  %v10229_v23 = vor.u32 %v7805_v45, %v6993_v17  ;;  %v7779_v53 = vld [vmem:[%s11769_s3 + $0x134] sm:$0xf]  ;;  %v7743_v36 = vld [vmem:[%s10073_s12 + $0x58] sm:$0xff]  ;;  %v7802_v17 = vld [vmem:[%s11769_s3 + $0x1a4] sm:$0xf] }
 0x34c   : > { %2950 = vmatpush.bf16.msrb.mxu1 %v10115_v43  ;;  %v10251_v62 = vor.u32 %v7779_v53, %v6865_v56  ;;  %v7718_v0 = vld [vmem:[%s10073_s12 + $0x18] sm:$0xff]  ;;  %v7777_v56 = vld [vmem:[%s11769_s3 + $0x124] sm:$0xf] }
 0x34d   : > { %11979 = vst [vmem:[#allocation27_spill] sm:$0xff] %v10229_v23 }
 0x34e   : > { %3197 = vmatpush.bf16.msrb.mxu2 %v10117_v60 }
 0x34f   : > { %3246 = vmatpush.bf16.msrb.mxu3 %v10126_v35  ;;  %2902 = vmatpush.bf16.msrb.mxu0 %v10135_v14 }
 0x350   : > { %2951 = vmatpush.bf16.msrb.mxu1 %v10148_v39 }
 0x352   : > { %3198 = vmatpush.bf16.msrb.mxu2 %v10150_v46 }
 0x353   : > { %3247 = vmatpush.bf16.msrb.mxu3 %v10162_v51  ;;  %2903 = vmatpush.bf16.msrb.mxu0 %v10171_v54 }
 0x354   : > { %2952 = vmatpush.bf16.msrb.mxu1 %v10175_v34 }
 0x356   : > { %3199 = vmatpush.bf16.msrb.mxu2 %v10191_v18 }
 0x357   : > { %3248 = vmatpush.bf16.msrb.mxu3 %v10202_v15  ;;  %2904 = vmatpush.bf16.msrb.mxu0 %v10204_v10 }
 0x358   : > { %2425 = vmatmul.bf16.gmra.mxu0 %v7741_v11  ;;  %2953 = vmatpush.bf16.msrb.mxu1 %v10213_v9 }
 0x359   : > { %2474 = vmatmul.bf16.gmra.mxu1 %v7741_v11  ;;  %2651 = vmatmul.bf16.gmra.mxu2 %v7716_v1  ;;  %v6995_v11 = vld [vmem:[%s11769_s3 + $0x1b8] sm:$0xf0] }
 0x35a   : > { %2700 = vmatmul.bf16.gmra.mxu3 %v7716_v1  ;;  %v6863_v1 = vld [vmem:[%s11769_s3 + $0x130] sm:$0xf]  ;;  %v10240_v22 = vor.u32 %v7804_v48, %v6995_v11  ;;  %3200 = vmatpush.bf16.msrb.mxu2 %v10229_v23  ;;  %v6987_v48 = vld [vmem:[%s11769_s3 + $0x1a8] sm:$0xf0]  ;;  %v6855_v11 = vld [vmem:[%s11769_s3 + $0x120] sm:$0xf] }
 0x35b   : > { %v10242_v49 = vor.u32 %v7780_v57, %v6863_v1  ;;  %v7778_v1 = vld [vmem:[%s11769_s3 + $0x124] sm:$0xf0]  ;;  %v10278_v57 = vor.u32 %v7802_v17, %v6987_v48  ;;  %v6977_v17 = vld [vmem:[%s11769_s3 + $0x190] sm:$0xf]  ;;  %v7801_v48 = vld [vmem:[%s11769_s3 + $0x194] sm:$0xf0] }
 0x35c   : > { %11980 = vst [vmem:[#allocation28_spill] sm:$0xff] %v10240_v22  ;;  %3249 = vmatpush.bf16.msrb.mxu3 %v10240_v22  ;;  %2954 = vmatpush.bf16.msrb.mxu1 %v10251_v62  ;;  %v10280_v53 = vor.u32 %v7778_v1, %v6855_v11  ;;  %v7800_v11 = vld [vmem:[%s11769_s3 + $0x194] sm:$0xf]  ;;  %v10305_v1 = vor.u32 %v7801_v48, %v6977_v17  ;;  %v6849_v48 = vld [vmem:[%s11769_s3 + $0x118] sm:$0xf0] }
 0x35d   : > { %2905 = vmatpush.bf16.msrb.mxu0 %v10242_v49  ;;  %11982 = vst [vmem:[#allocation30_spill] sm:$0xff] %v10278_v57  ;;  %v7775_v17 = vld [vmem:[%s11769_s3 + $0x114] sm:$0xf] }
 0x35e   : > { %11983 = vst [vmem:[#allocation31_spill] sm:$0xff] %v10305_v1 }
 0x360   : > { %3250 = vmatpush.bf16.msrb.mxu3 %v10278_v57 }
 0x361   : > { %2906 = vmatpush.bf16.msrb.mxu0 %v10280_v53 }
 0x368   : > { %2430 = vmatmul.bf16.gmra.mxu0 %v7742_v63 }
 0x369   : > { %2479 = vmatmul.bf16.gmra.mxu1 %v7742_v63  ;;  %2656 = vmatmul.bf16.gmra.mxu2 %v7717_v21  ;;  %v6985_v63 = vld [vmem:[%s11769_s3 + $0x1a0] sm:$0xf] }
 0x36a   : > { %2705 = vmatmul.bf16.gmra.mxu3 %v7717_v21  ;;  %v7803_v21 = vld [vmem:[%s11769_s3 + $0x1a4] sm:$0xf0] }
 0x36b   : > { %v10267_v45 = vor.u32 %v7803_v21, %v6985_v63  ;;  %v7744_v63 = vld [vmem:[%s10073_s12 + $0x60] sm:$0xff] }
 0x36c   : > { %v7719_v21 = vld [vmem:[%s10073_s12 + $0x20] sm:$0xff] }
 0x36d   : > { %11981 = vst [vmem:[#allocation29_spill] sm:$0xff] %v10267_v45  ;;  %3201 = vmatpush.bf16.msrb.mxu2 %v10267_v45  ;;  %v10327_v45 = vor.u32 %v7775_v17, %v6849_v48  ;;  %v7798_v17 = vld [vmem:[%s11769_s3 + $0x184] sm:$0xf] }
 0x371   : > { %3202 = vmatpush.bf16.msrb.mxu2 %v10305_v1 }
 0x378   : > { %2435 = vmatmul.bf16.gmra.mxu0 %v7743_v36 }
 0x379   : > { %2484 = vmatmul.bf16.gmra.mxu1 %v7743_v36  ;;  %2661 = vmatmul.bf16.gmra.mxu2 %v7718_v0  ;;  %v6857_v36 = vld [vmem:[%s11769_s3 + $0x128] sm:$0xf0] }
 0x37a   : > { %2710 = vmatmul.bf16.gmra.mxu3 %v7718_v0  ;;  %v10289_v0 = vor.u32 %v7777_v56, %v6857_v36  ;;  %v6979_v56 = vld [vmem:[%s11769_s3 + $0x198] sm:$0xf0]  ;;  %v6847_v36 = vld [vmem:[%s11769_s3 + $0x110] sm:$0xf] }
 0x37c   : > { %2955 = vmatpush.bf16.msrb.mxu1 %v10289_v0 }
 0x380   : > { %2956 = vmatpush.bf16.msrb.mxu1 %v10327_v45 }
 0x388   : > { %2440 = vmatmul.bf16.gmra.mxu0 %v7744_v63 }
 0x389   : > { %2489 = vmatmul.bf16.gmra.mxu1 %v7744_v63  ;;  %2666 = vmatmul.bf16.gmra.mxu2 %v7719_v21  ;;  %v7776_v63 = vld [vmem:[%s11769_s3 + $0x114] sm:$0xf0] }
 0x38a   : > { %2715 = vmatmul.bf16.gmra.mxu3 %v7719_v21  ;;  %v10316_v21 = vor.u32 %v7800_v11, %v6979_v56  ;;  %v10318_v57 = vor.u32 %v7776_v63, %v6847_v36  ;;  %v7745_v11 = vld [vmem:[%s10073_s12 + $0x68] sm:$0xff]  ;;  %v6969_v36 = vld [vmem:[%s11769_s3 + $0x180] sm:$0xf] }
 0x38b   : > { %v7720_v56 = vld [vmem:[%s10073_s12 + $0x28] sm:$0xff] }
 0x38c   : > { %11984 = vst [vmem:[#allocation32_spill] sm:$0xff] %v10316_v21  ;;  %3251 = vmatpush.bf16.msrb.mxu3 %v10316_v21  ;;  %2907 = vmatpush.bf16.msrb.mxu0 %v10318_v57  ;;  %v7799_v63 = vld [vmem:[%s11769_s3 + $0x184] sm:$0xf0] }
 0x38d   : > { %v10343_v48 = vor.u32 %v7799_v63, %v6969_v36  ;;  %v7774_v21 = vld [vmem:[%s11769_s3 + $0x104] sm:$0xf0]  ;;  %v7773_v36 = vld [vmem:[%s11769_s3 + $0x104] sm:$0xf]  ;;  %v6841_v63 = vld [vmem:[%s11769_s3 + $0x108] sm:$0xf0] }
 0x38e   : > { %v10365_v23 = vor.u32 %v7773_v36, %v6841_v63 }
 0x38f   : > { %3203 = vmatpush.bf16.msrb.mxu2 %v10343_v48 }
 0x390   : > { %2957 = vmatpush.bf16.msrb.mxu1 %v10365_v23 }
 0x393   : > { %3637 = vmatpush.bf16.msra.mxu2 %v9788_v55  ;;  %v7155_v55 = vld [vmem:[%s11769_s3 + $0x270] sm:$0xf] }
 0x397   : > { %3638 = vmatpush.bf16.msra.mxu2 %v9826_v41  ;;  %v7837_v41 = vld [vmem:[%s11769_s3 + $0x274] sm:$0xf] }
 0x398   : > { %2445 = vmatmul.bf16.gmra.mxu0 %v7745_v11 }
 0x399   : > { %2494 = vmatmul.bf16.gmra.mxu1 %v7745_v11  ;;  %2671 = vmatmul.bf16.gmra.mxu2 %v7720_v56  ;;  %v6971_v11 = vld [vmem:[%s11769_s3 + $0x188] sm:$0xf0] }
 0x39a   : > { %2720 = vmatmul.bf16.gmra.mxu3 %v7720_v56  ;;  %v6839_v56 = vld [vmem:[%s11769_s3 + $0x100] sm:$0xf]  ;;  %v10354_v1 = vor.u32 %v7798_v17, %v6971_v11  ;;  %v7721_v17 = vld [vmem:[%s10073_s12 + $0x30] sm:$0xff] }
 0x39b   : > { %v10356_v22 = vor.u32 %v7774_v21, %v6839_v56  ;;  %v7746_v21 = vld [vmem:[%s10073_s12 + $0x70] sm:$0xff]  ;;  %3639 = vmatpush.bf16.msra.mxu2 %v9863_v19  ;;  %v7157_v19 = vld [vmem:[%s11769_s3 + $0x278] sm:$0xf0]  ;;  %v10430_v11 = vld [vmem:[%s10073_s12 + $0xc0] sm:$0xff] }
 0x39c   : > { %11985 = vst [vmem:[#allocation33_spill] sm:$0xff] %v10354_v1  ;;  %3252 = vmatpush.bf16.msrb.mxu3 %v10354_v1 }
 0x39d   : > { %2908 = vmatpush.bf16.msrb.mxu0 %v10356_v22  ;;  %11986 = vst [vmem:[#allocation34_spill] sm:$0xff] %v10430_v11 }
 0x39f   : > { %3640 = vmatpush.bf16.msra.mxu2 %v9908_v40  ;;  %v7747_v40 = vld [vmem:[%s10073_s12 + $0x78] sm:$0xff] }
 0x3a0   : > { %3686 = vmatpush.bf16.msra.mxu3 %v9799_v37  ;;  %v7838_v37 = vld [vmem:[%s11769_s3 + $0x274] sm:$0xf0] }
 0x3a3   : > { %3641 = vmatpush.bf16.msra.mxu2 %v9944_v16  ;;  %v7147_v16 = vld [vmem:[%s11769_s3 + $0x260] sm:$0xf] }
 0x3a4   : > { %3687 = vmatpush.bf16.msra.mxu3 %v9828_v38  ;;  %v10389_v38 = vor.u32 %v7838_v37, %v7155_v55 }
 0x3a6   : > { %3491 = vmatpush.bf16.msra.mxu0 %v10389_v38 }
 0x3a7   : > { %3642 = vmatpush.bf16.msra.mxu2 %v9980_v12  ;;  %v7835_v12 = vld [vmem:[%s11769_s3 + $0x264] sm:$0xf] }
 0x3a8   : > { %2450 = vmatmul.bf16.gmra.mxu0 %v7746_v21  ;;  %3688 = vmatpush.bf16.msra.mxu3 %v9876_v2  ;;  %v10395_v2 = vor.u32 %v7837_v41, %v7157_v19  ;;  %v7139_v41 = vld [vmem:[%s11769_s3 + $0x250] sm:$0xf]  ;;  %v7834_v19 = vld [vmem:[%s11769_s3 + $0x254] sm:$0xf0] }
 0x3a9   : > { %2499 = vmatmul.bf16.gmra.mxu1 %v7746_v21  ;;  %2676 = vmatmul.bf16.gmra.mxu2 %v7721_v17 }
 0x3aa   : > { %2725 = vmatmul.bf16.gmra.mxu3 %v7721_v17  ;;  %3540 = vmatpush.bf16.msra.mxu1 %v10395_v2 }
 0x3ab   : > { %3643 = vmatpush.bf16.msra.mxu2 %v10017_v26  ;;  %v7149_v26 = vld [vmem:[%s11769_s3 + $0x268] sm:$0xf0] }
 0x3ac   : > { %3689 = vmatpush.bf16.msra.mxu3 %v9912_v6  ;;  %v7722_v6 = vld [vmem:[%s10073_s12 + $0x38] sm:$0xff] }
 0x3af   : > { %3644 = vmatpush.bf16.msra.mxu2 %v10059_v29  ;;  %v10427_v29 = vld [vmem:[%s10073_s12 + $0x80] sm:$0xff] }
 0x3b0   : > { %3690 = vmatpush.bf16.msra.mxu3 %v9948_v32  ;;  %v7836_v32 = vld [vmem:[%s11769_s3 + $0x264] sm:$0xf0] }
 0x3b4   : > { %3691 = vmatpush.bf16.msra.mxu3 %v9984_v59  ;;  %v10417_v59 = vor.u32 %v7836_v32, %v7147_v16 }
 0x3b6   : > { %3492 = vmatpush.bf16.msra.mxu0 %v10417_v59 }
 0x3b8   : > { %2455 = vmatmul.bf16.gmra.mxu0 %v7747_v40  ;;  %3692 = vmatpush.bf16.msra.mxu3 %v10027_v47  ;;  %v10422_v47 = vor.u32 %v7835_v12, %v7149_v26 }
 0x3b9   : > { %2504 = vmatmul.bf16.gmra.mxu1 %v7747_v40  ;;  %2681 = vmatmul.bf16.gmra.mxu2 %v7722_v6  ;;  %v7141_v40 = vld [vmem:[%s11769_s3 + $0x258] sm:$0xf0] }
 0x3ba   : > { %2730 = vmatmul.bf16.gmra.mxu3 %v7722_v6  ;;  %3541 = vmatpush.bf16.msra.mxu1 %v10422_v47 }
 0x3bc   : > { %3693 = vmatpush.bf16.msra.mxu3 %v10069_v27 }
 0x3c5   : > { %v2421_v27 = vpop.f32.mrf.mxu0 }
 0x3c6   : > { %v2470_v56 = vpop.f32.mrf.mxu1 }
 0x3c8   : > { %2909 = vmatmul.bf16.vlgmr.msrb.gmra.mxu0 %v10427_v29 }
 0x3c9   : > { %2958 = vmatmul.bf16.vlgmr.msrb.gmra.mxu1 %v10427_v29  ;;  %3204 = vmatmul.bf16.vlgmr.msrb.gmra.mxu2 %v10430_v11 }
 0x3ca   : > { %3253 = vmatmul.bf16.vlgmr.msrb.gmra.mxu3 %v10430_v11  ;;  %3833 = vmatpush.bf16.msrb.mxu2 %v10111_v25  ;;  %v7833_v25 = vld [vmem:[%s11769_s3 + $0x254] sm:$0xf]  ;;  %v10583_v11 = vld [vmem:[%s10073_s12 + $0xa0] sm:$0xff] }
 0x3cb   : > { %3882 = vmatpush.bf16.msrb.mxu3 %v10115_v43  ;;  %v10452_v43 = vor.u32 %v7834_v19, %v7139_v41  ;;  %v10458_v6 = vor.u32 %v7833_v25, %v7141_v40  ;;  %v7133_v41 = vld [vmem:[%s11769_s3 + $0x248] sm:$0xf0]  ;;  %11996 = vst [vmem:[#allocation44_spill] sm:$0xff] %v10583_v11 }
 0x3cc   : > { %v2647_v36 = vpop.f32.mrf.mxu2 }
 0x3cd   : > { %v10438_v63 = vadd.f32 %v2647_v36, %v2421_v27  ;;  %v2696_v21 = vpop.f32.mrf.mxu3  ;;  %v2423_v17 = vpop.f32.mrf.mxu0  ;;  %3493 = vmatpush.bf16.msra.mxu0 %v10452_v43  ;;  %3542 = vmatpush.bf16.msra.mxu1 %v10458_v6  ;;  %v10470_v27 = vld [vmem:[%s10073_s12 + $0xc8] sm:$0xff] }
 0x3ce   : > { %v10440_v55 = vadd.f32 %v2696_v21, %v2470_v56  ;;  %v2472_v37 = vpop.f32.mrf.mxu1  ;;  %3834 = vmatpush.bf16.msrb.mxu2 %v10135_v14  ;;  %v10465_v14 = vld [vmem:[%s10073_s12 + $0x88] sm:$0xff]  ;;  %11987 = vst [vmem:[#allocation35_spill] sm:$0xff] %v10470_v27 }
 0x3cf   : > { %3883 = vmatpush.bf16.msrb.mxu3 %v10148_v39 }
 0x3d2   : > { %3835 = vmatpush.bf16.msrb.mxu2 %v10171_v54 }
 0x3d3   : > { %3884 = vmatpush.bf16.msrb.mxu3 %v10175_v34 }
 0x3d4   : > { %v2649_v16 = vpop.f32.mrf.mxu2 }
 0x3d5   : > { %v10467_v32 = vadd.f32 %v2649_v16, %v2423_v17  ;;  %v2698_v12 = vpop.f32.mrf.mxu3  ;;  %v2426_v26 = vpop.f32.mrf.mxu0  ;;  %v7131_v17 = vld [vmem:[%s11769_s3 + $0x240] sm:$0xf] }
 0x3d6   : > { %v10472_v39 = vadd.f32 %v2698_v12, %v2472_v37  ;;  %v2475_v56 = vpop.f32.mrf.mxu1  ;;  %3836 = vmatpush.bf16.msrb.mxu2 %v10204_v10  ;;  %v7832_v37 = vld [vmem:[%s11769_s3 + $0x244] sm:$0xf0] }
 0x3d7   : > { %3885 = vmatpush.bf16.msrb.mxu3 %v10213_v9 }
 0x3d8   : > { %2914 = vmatmul.bf16.gmra.mxu0 %v10465_v14 }
 0x3d9   : > { %2963 = vmatmul.bf16.gmra.mxu1 %v10465_v14  ;;  %3209 = vmatmul.bf16.gmra.mxu2 %v10470_v27 }
 0x3da   : > { %3258 = vmatmul.bf16.gmra.mxu3 %v10470_v27  ;;  %3837 = vmatpush.bf16.msrb.mxu2 %v10242_v49  ;;  %v7831_v49 = vld [vmem:[%s11769_s3 + $0x244] sm:$0xf]  ;;  %v7828_v27 = vld [vmem:[%s11769_s3 + $0x224] sm:$0xf0] }
 0x3db   : > { %3886 = vmatpush.bf16.msrb.mxu3 %v10251_v62  ;;  %v10496_v62 = vor.u32 %v7832_v37, %v7131_v17  ;;  %v10502_v19 = vor.u32 %v7831_v49, %v7133_v41  ;;  %v7829_v17 = vld [vmem:[%s11769_s3 + $0x234] sm:$0xf]  ;;  %v7125_v49 = vld [vmem:[%s11769_s3 + $0x238] sm:$0xf0] }
 0x3dc   : > { %v2652_v54 = vpop.f32.mrf.mxu2  ;;  %v10542_v41 = vor.u32 %v7829_v17, %v7125_v49 }
 0x3dd   : > { %v10482_v34 = vadd.f32 %v2652_v54, %v2426_v26  ;;  %v2701_v36 = vpop.f32.mrf.mxu3  ;;  %v2428_v21 = vpop.f32.mrf.mxu0  ;;  %3494 = vmatpush.bf16.msra.mxu0 %v10496_v62  ;;  %3543 = vmatpush.bf16.msra.mxu1 %v10502_v19  ;;  %v10514_v26 = vld [vmem:[%s10073_s12 + $0xd0] sm:$0xff] }
 0x3de   : > { %v10484_v10 = vadd.f32 %v2701_v36, %v2475_v56  ;;  %v2477_v9 = vpop.f32.mrf.mxu1  ;;  %3838 = vmatpush.bf16.msrb.mxu2 %v10280_v53  ;;  %v10509_v53 = vld [vmem:[%s10073_s12 + $0x90] sm:$0xff]  ;;  %11989 = vst [vmem:[#allocation37_spill] sm:$0xff] %v10514_v26 }
 0x3df   : > { %3887 = vmatpush.bf16.msrb.mxu3 %v10289_v0  ;;  %11988 = vst [vmem:[#allocation36_spill] sm:$0xff] %v10509_v53 }
 0x3e1   : > { %3544 = vmatpush.bf16.msra.mxu1 %v10542_v41 }
 0x3e2   : > { %3839 = vmatpush.bf16.msrb.mxu2 %v10318_v57 }
 0x3e3   : > { %3888 = vmatpush.bf16.msrb.mxu3 %v10327_v45 }
 0x3e4   : > { %v2654_v25 = vpop.f32.mrf.mxu2 }
 0x3e5   : > { %v10511_v40 = vadd.f32 %v2654_v25, %v2428_v21  ;;  %v2703_v16 = vpop.f32.mrf.mxu3  ;;  %v2431_v12 = vpop.f32.mrf.mxu0 }
 0x3e6   : > { %v10516_v0 = vadd.f32 %v2703_v16, %v2477_v9  ;;  %v2480_v56 = vpop.f32.mrf.mxu1  ;;  %3840 = vmatpush.bf16.msrb.mxu2 %v10356_v22  ;;  %v7830_v9 = vld [vmem:[%s11769_s3 + $0x234] sm:$0xf0] }
 0x3e7   : > { %3889 = vmatpush.bf16.msrb.mxu3 %v10365_v23  ;;  %v7123_v23 = vld [vmem:[%s11769_s3 + $0x230] sm:$0xf]  ;;  %v10547_v16 = vld [vmem:[%s10073_s12 + $0x98] sm:$0xff] }
 0x3e8   : > { %2919 = vmatmul.bf16.gmra.mxu0 %v10509_v53  ;;  %v10537_v37 = vor.u32 %v7830_v9, %v7123_v23  ;;  %11990 = vst [vmem:[#allocation38_spill] sm:$0xff] %v10547_v16 }
 0x3e9   : > { %2968 = vmatmul.bf16.gmra.mxu1 %v10509_v53  ;;  %3214 = vmatmul.bf16.gmra.mxu2 %v10514_v26  ;;  %v10624_v53 = vld [vmem:[%s10073_s12 + $0xe8] sm:$0xff] }
 0x3ea   : > { %3263 = vmatmul.bf16.gmra.mxu3 %v10514_v26  ;;  %3495 = vmatpush.bf16.msra.mxu0 %v10537_v37  ;;  %12004 = vst [vmem:[#allocation52_spill] sm:$0xff] %v10624_v53 }
 0x3ec   : > { %v2657_v45 = vpop.f32.mrf.mxu2 }
 0x3ed   : > { %v10524_v57 = vadd.f32 %v2657_v45, %v2431_v12  ;;  %v2706_v54 = vpop.f32.mrf.mxu3  ;;  %v2433_v36 = vpop.f32.mrf.mxu0 }
 0x3ee   : > { %v10526_v21 = vadd.f32 %v2706_v54, %v2480_v56  ;;  %v2482_v22 = vpop.f32.mrf.mxu1  ;;  %v10552_v54 = vld [vmem:[%s10073_s12 + $0xd8] sm:$0xff] }
 0x3ef   : > { %11992 = vst [vmem:[#allocation40_spill] sm:$0xff] %v10552_v54 }
 0x3f4   : > { %v2659_v25 = vpop.f32.mrf.mxu2 }
 0x3f5   : > { %v10549_v12 = vadd.f32 %v2659_v25, %v2433_v36  ;;  %v2708_v56 = vpop.f32.mrf.mxu3  ;;  %v2436_v45 = vpop.f32.mrf.mxu0 }
 0x3f6   : > { %v10554_v23 = vadd.f32 %v2708_v56, %v2482_v22  ;;  %v2485_v9 = vpop.f32.mrf.mxu1  ;;  %v7115_v56 = vld [vmem:[%s11769_s3 + $0x220] sm:$0xf] }
 0x3f7   : > { %11991 = vst [vmem:[#allocation39_spill] sm:$0xff] %v10549_v12 }
 0x3f8   : > { %11993 = vst [vmem:[#allocation41_spill] sm:$0xff] %v10554_v23  ;;  %2924 = vmatmul.bf16.gmra.mxu0 %v10547_v16  ;;  %v10588_v23 = vld [vmem:[%s10073_s12 + $0xe0] sm:$0xff] }
 0x3f9   : > { %2973 = vmatmul.bf16.gmra.mxu1 %v10547_v16  ;;  %3219 = vmatmul.bf16.gmra.mxu2 %v10552_v54  ;;  %11998 = vst [vmem:[#allocation46_spill] sm:$0xff] %v10588_v23 }
 0x3fa   : > { %3268 = vmatmul.bf16.gmra.mxu3 %v10552_v54  ;;  %v7827_v54 = vld [vmem:[%s11769_s3 + $0x224] sm:$0xf] }
 0x3fc   : > { %v2662_v17 = vpop.f32.mrf.mxu2 }
 0x3fd   : > { %v10560_v49 = vadd.f32 %v2662_v17, %v2436_v45  ;;  %v2711_v36 = vpop.f32.mrf.mxu3  ;;  %v2438_v25 = vpop.f32.mrf.mxu0  ;;  %v10573_v45 = vor.u32 %v7828_v27, %v7115_v56 }
 0x3fe   : > { %v10562_v26 = vadd.f32 %v2711_v36, %v2485_v9  ;;  %v2487_v22 = vpop.f32.mrf.mxu1  ;;  %v7117_v9 = vld [vmem:[%s11769_s3 + $0x228] sm:$0xf0] }
 0x3ff   : > { %11994 = vst [vmem:[#allocation42_spill] sm:$0xff] %v10560_v49  ;;  %v10578_v17 = vor.u32 %v7827_v54, %v7117_v9  ;;  %3496 = vmatpush.bf16.msra.mxu0 %v10573_v45 }
 0x400   : > { %11995 = vst [vmem:[#allocation43_spill] sm:$0xff] %v10562_v26 }
 0x401   : > { %3545 = vmatpush.bf16.msra.mxu1 %v10578_v17 }
 0x404   : > { %v2664_v36 = vpop.f32.mrf.mxu2 }
 0x405   : > { %v10585_v16 = vadd.f32 %v2664_v36, %v2438_v25  ;;  %v2713_v26 = vpop.f32.mrf.mxu3  ;;  %v2441_v49 = vpop.f32.mrf.mxu0 }
 0x406   : > { %v10590_v27 = vadd.f32 %v2713_v26, %v2487_v22  ;;  %v2490_v56 = vpop.f32.mrf.mxu1  ;;  %v7107_v22 = vld [vmem:[%s11769_s3 + $0x210] sm:$0xf] }
 0x407   : > { %11997 = vst [vmem:[#allocation45_spill] sm:$0xff] %v10585_v16 }
 0x408   : > { %11999 = vst [vmem:[#allocation47_spill] sm:$0xff] %v10590_v27  ;;  %2929 = vmatmul.bf16.gmra.mxu0 %v10583_v11 }
 0x409   : > { %2978 = vmatmul.bf16.gmra.mxu1 %v10583_v11  ;;  %3224 = vmatmul.bf16.gmra.mxu2 %v10588_v23  ;;  %v7826_v11 = vld [vmem:[%s11769_s3 + $0x214] sm:$0xf0] }
 0x40a   : > { %3273 = vmatmul.bf16.gmra.mxu3 %v10588_v23  ;;  %v7825_v23 = vld [vmem:[%s11769_s3 + $0x214] sm:$0xf] }
 0x40c   : > { %v2667_v54 = vpop.f32.mrf.mxu2 }
 0x40d   : > { %v10596_v9 = vadd.f32 %v2667_v54, %v2441_v49  ;;  %v2716_v25 = vpop.f32.mrf.mxu3  ;;  %v2443_v36 = vpop.f32.mrf.mxu0  ;;  %v10609_v49 = vor.u32 %v7826_v11, %v7107_v22 }
 0x40e   : > { %v10598_v16 = vadd.f32 %v2716_v25, %v2490_v56  ;;  %v2492_v26 = vpop.f32.mrf.mxu1  ;;  %v7109_v56 = vld [vmem:[%s11769_s3 + $0x218] sm:$0xf0] }
 0x40f   : > { %12000 = vst [vmem:[#allocation48_spill] sm:$0xff] %v10596_v9  ;;  %v10614_v54 = vor.u32 %v7825_v23, %v7109_v56  ;;  %3497 = vmatpush.bf16.msra.mxu0 %v10609_v49 }
 0x410   : > { %12001 = vst [vmem:[#allocation49_spill] sm:$0xff] %v10598_v16  ;;  %v10619_v16 = vld [vmem:[%s10073_s12 + $0xa8] sm:$0xff] }
 0x411   : > { %3546 = vmatpush.bf16.msra.mxu1 %v10614_v54  ;;  %12002 = vst [vmem:[#allocation50_spill] sm:$0xff] %v10619_v16 }
 0x414   : > { %v2669_v25 = vpop.f32.mrf.mxu2 }
 0x415   : > { %v10621_v9 = vadd.f32 %v2669_v25, %v2443_v36  ;;  %v2718_v27 = vpop.f32.mrf.mxu3  ;;  %v2446_v12 = vpop.f32.mrf.mxu0 }
 0x416   : > { %v10626_v11 = vadd.f32 %v2718_v27, %v2492_v26  ;;  %v2495_v22 = vpop.f32.mrf.mxu1  ;;  %v7099_v27 = vld [vmem:[%s11769_s3 + $0x200] sm:$0xf]  ;;  %v7824_v26 = vld [vmem:[%s11769_s3 + $0x204] sm:$0xf0] }
 0x417   : > { %12003 = vst [vmem:[#allocation51_spill] sm:$0xff] %v10621_v9 }
 0x418   : > { %12005 = vst [vmem:[#allocation53_spill] sm:$0xff] %v10626_v11  ;;  %2934 = vmatmul.bf16.gmra.mxu0 %v10619_v16 }
 0x419   : > { %2983 = vmatmul.bf16.gmra.mxu1 %v10619_v16  ;;  %3229 = vmatmul.bf16.gmra.mxu2 %v10624_v53  ;;  %v10657_v16 = vld [vmem:[%s10073_s12 + $0xb0] sm:$0xff] }
 0x41a   : > { %3278 = vmatmul.bf16.gmra.mxu3 %v10624_v53 }
 0x41c   : > { %v2672_v23 = vpop.f32.mrf.mxu2 }
 0x41d   : > { %v10632_v56 = vadd.f32 %v2672_v23, %v2446_v12  ;;  %v2721_v36 = vpop.f32.mrf.mxu3  ;;  %v2448_v25 = vpop.f32.mrf.mxu0  ;;  %v7823_v12 = vld [vmem:[%s11769_s3 + $0x204] sm:$0xf]  ;;  %v10645_v23 = vor.u32 %v7824_v26, %v7099_v27 }
 0x41e   : > { %v10634_v9 = vadd.f32 %v2721_v36, %v2495_v22  ;;  %v2497_v1 = vpop.f32.mrf.mxu1  ;;  %v7101_v22 = vld [vmem:[%s11769_s3 + $0x208] sm:$0xf0] }
 0x41f   : > { %12006 = vst [vmem:[#allocation54_spill] sm:$0xff] %v10632_v56  ;;  %v10650_v36 = vor.u32 %v7823_v12, %v7101_v22  ;;  %3498 = vmatpush.bf16.msra.mxu0 %v10645_v23  ;;  %v10662_v56 = vld [vmem:[%s10073_s12 + $0xf0] sm:$0xff] }
 0x420   : > { %12007 = vst [vmem:[#allocation55_spill] sm:$0xff] %v10634_v9 }
 0x421   : > { %3547 = vmatpush.bf16.msra.mxu1 %v10650_v36 }
 0x423   : > { %3735 = vmatpush.bf16.msrb.mxu0 %v9801_v44 }
 0x424   : > { %v2674_v53 = vpop.f32.mrf.mxu2 }
 0x425   : > { %3784 = vmatpush.bf16.msrb.mxu1 %v9813_v7  ;;  %v10659_v9 = vadd.f32 %v2674_v53, %v2448_v25  ;;  %v2723_v27 = vpop.f32.mrf.mxu3  ;;  %v2451_v26 = vpop.f32.mrf.mxu0  ;;  %v10683_v25 = vld [vmem:[%s10073_s12 + $0xb8] sm:$0xff] }
 0x426   : > { %v10664_v11 = vadd.f32 %v2723_v27, %v2497_v1  ;;  %v2500_v12 = vpop.f32.mrf.mxu1 }
 0x427   : > { %3736 = vmatpush.bf16.msrb.mxu0 %v9840_v4 }
 0x428   : > { %2939 = vmatmul.bf16.gmra.mxu0 %v10657_v16 }
 0x429   : > { %3785 = vmatpush.bf16.msrb.mxu1 %v9851_v5  ;;  %3234 = vmatmul.bf16.gmra.mxu2 %v10662_v56 }
 0x42a   : > { %2988 = vmatmul.bf16.gmra.mxu1 %v10657_v16  ;;  %3283 = vmatmul.bf16.gmra.mxu3 %v10662_v56 }
 0x42b   : > { %3737 = vmatpush.bf16.msrb.mxu0 %v9878_v58 }
 0x42c   : > { %v2677_v44 = vpop.f32.mrf.mxu2 }
 0x42d   : > { %3786 = vmatpush.bf16.msrb.mxu1 %v9890_v28  ;;  %v10674_v7 = vadd.f32 %v2677_v44, %v2451_v26  ;;  %v2726_v4 = vpop.f32.mrf.mxu3  ;;  %v2453_v1 = vpop.f32.mrf.mxu0  ;;  %v10688_v26 = vld [vmem:[%s10073_s12 + $0xf8] sm:$0xff] }
 0x42e   : > { %v10676_v5 = vadd.f32 %v2726_v4, %v2500_v12  ;;  %v2502_v53 = vpop.f32.mrf.mxu1 }
 0x42f   : > { %3738 = vmatpush.bf16.msrb.mxu0 %v9914_v52 }
 0x431   : > { %3787 = vmatpush.bf16.msrb.mxu1 %v9926_v20 }
 0x433   : > { %3739 = vmatpush.bf16.msrb.mxu0 %v9950_v8 }
 0x434   : > { %v2679_v58 = vpop.f32.mrf.mxu2 }
 0x435   : > { %3788 = vmatpush.bf16.msrb.mxu1 %v9962_v31  ;;  %v10685_v28 = vadd.f32 %v2679_v58, %v2453_v1  ;;  %v2728_v22 = vpop.f32.mrf.mxu3  ;;  %v2456_v27 = vpop.f32.mrf.mxu0  ;;  %v10707_v1 = vld [vmem:[%s10073_s12 + $0x100] sm:$0xff] }
 0x436   : > { %v10690_v12 = vadd.f32 %v2728_v22, %v2502_v53  ;;  %v2505_v44 = vpop.f32.mrf.mxu1 }
 0x437   : > { %3740 = vmatpush.bf16.msrb.mxu0 %v9986_v42 }
 0x438   : > { %2944 = vmatmul.bf16.gmra.mxu0 %v10683_v25 }
 0x439   : > { %3789 = vmatpush.bf16.msrb.mxu1 %v9998_v13  ;;  %3239 = vmatmul.bf16.gmra.mxu2 %v10688_v26 }
 0x43a   : > { %2993 = vmatmul.bf16.gmra.mxu1 %v10683_v25  ;;  %3288 = vmatmul.bf16.gmra.mxu3 %v10688_v26 }
 0x43b   : > { %3741 = vmatpush.bf16.msrb.mxu0 %v10029_v50 }
 0x43c   : > { %v2682_v52 = vpop.f32.mrf.mxu2 }
 0x43d   : > { %3790 = vmatpush.bf16.msrb.mxu1 %v10041_v24  ;;  %v10700_v20 = vadd.f32 %v2682_v52, %v2456_v27  ;;  %v2731_v8 = vpop.f32.mrf.mxu3  ;;  %v2458_v31 = vpop.f32.mrf.mxu0 }
 0x43e   : > { %v10702_v42 = vadd.f32 %v2731_v8, %v2505_v44  ;;  %v2507_v13 = vpop.f32.mrf.mxu1 }
 0x43f   : > { %3742 = vmatpush.bf16.msrb.mxu0 %v10071_v3 }
 0x441   : > { %3791 = vmatpush.bf16.msrb.mxu1 %v10080_v61 }
 0x444   : > { %v2684_v4 = vpop.f32.mrf.mxu2 }
 0x445   : > { %v10709_v53 = vadd.f32 %v2684_v4, %v2458_v31  ;;  %v2733_v50 = vpop.f32.mrf.mxu3  ;;  %v2910_v58 = vpop.f32.mrf.mxu0 }
 0x446   : > { %v10711_v24 = vadd.f32 %v2733_v50, %v2507_v13  ;;  %v2999_v22 = vadd.f32 %v2910_v58, %v10438_v63  ;;  %v2959_v27 = vpop.f32.mrf.mxu1  ;;  %v10772_v13 = vld [vmem:[%s10073_s12 + $0x110] sm:$0xff] }
 0x447   : > { %v3000_v44 = vadd.f32 %v2959_v27, %v10440_v55 }
 0x448   : > { %3499 = vmatmul.bf16.vlgmr.msra.gmra.mxu0 %v10707_v1 }
 0x449   : > { %3645 = vmatmul.bf16.vlgmr.msra.gmra.mxu2 %v10427_v29  ;;  %3963 = vmatpush.bf16.msra.mxu0 %v10082_v33 }
 0x44a   : > { %3548 = vmatmul.bf16.vlgmr.msra.gmra.mxu1 %v10707_v1  ;;  %3694 = vmatmul.bf16.vlgmr.msra.gmra.mxu3 %v10427_v29 }
 0x44b   : > { %4161 = vmatpush.bf16.msra.mxu2 %v10389_v38  ;;  %4210 = vmatpush.bf16.msra.mxu3 %v10395_v2 }
 0x44c   : > { %v3205_v3 = vpop.f32.mrf.mxu2  ;;  %4012 = vmatpush.bf16.msra.mxu1 %v10090_v30  ;;  %v10737_v30 = vld [vmem:[%s10073_s12 + $0x108] sm:$0xff] }
 0x44d   : > { %v10723_v61 = vadd.f32 %v3205_v3, %v2999_v22  ;;  %v3254_v63 = vpop.f32.mrf.mxu3  ;;  %v2912_v55 = vpop.f32.mrf.mxu0  ;;  %3964 = vmatpush.bf16.msra.mxu0 %v10117_v60  ;;  %v12015_v22 = vld [vmem:[#allocation36_spill] sm:$0xff] }
 0x44e   : > { %v10725_v52 = vadd.f32 %v3254_v63, %v3000_v44  ;;  %v3001_v8 = vadd.f32 %v2912_v55, %v10467_v32  ;;  %v2961_v31 = vpop.f32.mrf.mxu1  ;;  %v12017_v63 = vld [vmem:[#allocation41_spill] sm:$0xff] }
 0x44f   : > { %4162 = vmatpush.bf16.msra.mxu2 %v10417_v59  ;;  %v3002_v38 = vadd.f32 %v2961_v31, %v10472_v39  ;;  %4211 = vmatpush.bf16.msra.mxu3 %v10422_v47  ;;  %v10796_v31 = vld [vmem:[%s10073_s12 + $0x118] sm:$0xff] }
 0x450   : > { %4013 = vmatpush.bf16.msra.mxu1 %v10126_v35 }
 0x451   : > { %3965 = vmatpush.bf16.msra.mxu0 %v10150_v46  ;;  %v12008_v46 = vld [vmem:[#allocation27_spill] sm:$0xff] }
 0x453   : > { %4163 = vmatpush.bf16.msra.mxu2 %v10452_v43  ;;  %4212 = vmatpush.bf16.msra.mxu3 %v10458_v6  ;;  %v12009_v6 = vld [vmem:[#allocation28_spill] sm:$0xff] }
 0x454   : > { %v3207_v33 = vpop.f32.mrf.mxu2  ;;  %4014 = vmatpush.bf16.msra.mxu1 %v10162_v51 }
 0x455   : > { %v10740_v2 = vadd.f32 %v3207_v33, %v3001_v8  ;;  %v3256_v59 = vpop.f32.mrf.mxu3  ;;  %v2915_v29 = vpop.f32.mrf.mxu0  ;;  %3966 = vmatpush.bf16.msra.mxu0 %v10191_v18 }
 0x456   : > { %v10742_v47 = vadd.f32 %v3256_v59, %v3002_v38  ;;  %v3003_v60 = vadd.f32 %v2915_v29, %v10482_v34  ;;  %v2964_v35 = vpop.f32.mrf.mxu1 }
 0x457   : > { %4164 = vmatpush.bf16.msra.mxu2 %v10496_v62  ;;  %v3004_v43 = vadd.f32 %v2964_v35, %v10484_v10  ;;  %4213 = vmatpush.bf16.msra.mxu3 %v10502_v19  ;;  %v12010_v62 = vld [vmem:[#allocation29_spill] sm:$0xff]  ;;  %v12011_v19 = vld [vmem:[#allocation30_spill] sm:$0xff] }
 0x458   : > { %3504 = vmatmul.bf16.gmra.mxu0 %v10737_v30  ;;  %4015 = vmatpush.bf16.msra.mxu1 %v10202_v15 }
 0x459   : > { %3650 = vmatmul.bf16.gmra.mxu2 %v10465_v14  ;;  %3967 = vmatpush.bf16.msra.mxu0 %v12008_v46  ;;  %v12019_v46 = vld [vmem:[#allocation43_spill] sm:$0xff] }
 0x45a   : > { %3553 = vmatmul.bf16.gmra.mxu1 %v10737_v30  ;;  %3699 = vmatmul.bf16.gmra.mxu3 %v10465_v14 }
 0x45b   : > { %4165 = vmatpush.bf16.msra.mxu2 %v10537_v37  ;;  %4214 = vmatpush.bf16.msra.mxu3 %v10542_v41  ;;  %v12012_v37 = vld [vmem:[#allocation31_spill] sm:$0xff] }
 0x45c   : > { %v3210_v51 = vpop.f32.mrf.mxu2  ;;  %4016 = vmatpush.bf16.msra.mxu1 %v12009_v6  ;;  %v12020_v6 = vld [vmem:[#allocation38_spill] sm:$0xff] }
 0x45d   : > { %v10758_v18 = vadd.f32 %v3210_v51, %v3003_v60  ;;  %v3259_v32 = vpop.f32.mrf.mxu3  ;;  %v2917_v15 = vpop.f32.mrf.mxu0  ;;  %3968 = vmatpush.bf16.msra.mxu0 %v12010_v62  ;;  %v12018_v60 = vld [vmem:[#allocation42_spill] sm:$0xff]  ;;  %v12021_v62 = vld [vmem:[#allocation45_spill] sm:$0xff] }
 0x45e   : > { %v10760_v39 = vadd.f32 %v3259_v32, %v3004_v43  ;;  %v3005_v34 = vadd.f32 %v2917_v15, %v10511_v40  ;;  %v2966_v10 = vpop.f32.mrf.mxu1  ;;  %v12013_v40 = vld [vmem:[#allocation32_spill] sm:$0xff] }
 0x45f   : > { %4166 = vmatpush.bf16.msra.mxu2 %v10573_v45  ;;  %v3006_v14 = vadd.f32 %v2966_v10, %v10516_v0  ;;  %4215 = vmatpush.bf16.msra.mxu3 %v10578_v17 }
 0x460   : > { %4017 = vmatpush.bf16.msra.mxu1 %v12011_v19 }
 0x461   : > { %3969 = vmatpush.bf16.msra.mxu0 %v12012_v37 }
 0x463   : > { %4167 = vmatpush.bf16.msra.mxu2 %v10609_v49  ;;  %4216 = vmatpush.bf16.msra.mxu3 %v10614_v54  ;;  %v12014_v54 = vld [vmem:[#allocation33_spill] sm:$0xff] }
 0x464   : > { %v3212_v41 = vpop.f32.mrf.mxu2  ;;  %4018 = vmatpush.bf16.msra.mxu1 %v12013_v40 }
 0x465   : > { %v10775_v45 = vadd.f32 %v3212_v41, %v3005_v34  ;;  %v3261_v0 = vpop.f32.mrf.mxu3  ;;  %v2920_v4 = vpop.f32.mrf.mxu0  ;;  %3970 = vmatpush.bf16.msra.mxu0 %v10343_v48  ;;  %v12022_v41 = vld [vmem:[#allocation47_spill] sm:$0xff] }
 0x466   : > { %v10777_v17 = vadd.f32 %v3261_v0, %v3006_v14  ;;  %v3007_v50 = vadd.f32 %v2920_v4, %v10524_v57  ;;  %v2969_v58 = vpop.f32.mrf.mxu1  ;;  %v10815_v4 = vld [vmem:[%s10073_s12 + $0x120] sm:$0xff] }
 0x467   : > { %4168 = vmatpush.bf16.msra.mxu2 %v10645_v23  ;;  %v3008_v49 = vadd.f32 %v2969_v58, %v10526_v21  ;;  %4217 = vmatpush.bf16.msra.mxu3 %v10650_v36  ;;  %v12016_v36 = vld [vmem:[#allocation39_spill] sm:$0xff] }
 0x468   : > { %3509 = vmatmul.bf16.gmra.mxu0 %v10772_v13  ;;  %4019 = vmatpush.bf16.msra.mxu1 %v12014_v54 }
 0x469   : > { %3655 = vmatmul.bf16.gmra.mxu2 %v12015_v22 }
 0x46a   : > { %3558 = vmatmul.bf16.gmra.mxu1 %v10772_v13  ;;  %3704 = vmatmul.bf16.gmra.mxu3 %v12015_v22  ;;  %v12023_v22 = vld [vmem:[#allocation48_spill] sm:$0xff] }
 0x46c   : > { %v3215_v57 = vpop.f32.mrf.mxu2 }
 0x46d   : > { %v10789_v27 = vadd.f32 %v3215_v57, %v3007_v50  ;;  %v3264_v23 = vpop.f32.mrf.mxu3  ;;  %v2922_v21 = vpop.f32.mrf.mxu0 }
 0x46e   : > { %v10791_v44 = vadd.f32 %v3264_v23, %v3008_v49  ;;  %v3009_v3 = vadd.f32 %v2922_v21, %v12016_v36  ;;  %v2971_v48 = vpop.f32.mrf.mxu1  ;;  %v12024_v21 = vld [vmem:[#allocation49_spill] sm:$0xff] }
 0x46f   : > { %v3010_v55 = vadd.f32 %v2971_v48, %v12017_v63 }
 0x474   : > { %v3217_v8 = vpop.f32.mrf.mxu2 }
 0x475   : > { %v10798_v38 = vadd.f32 %v3217_v8, %v3009_v3  ;;  %v3266_v33 = vpop.f32.mrf.mxu3  ;;  %v2925_v59 = vpop.f32.mrf.mxu0  ;;  %v12025_v3 = vld [vmem:[#allocation44_spill] sm:$0xff] }
 0x476   : > { %v10800_v29 = vadd.f32 %v3266_v33, %v3010_v55  ;;  %v3011_v35 = vadd.f32 %v2925_v59, %v12018_v60  ;;  %v2974_v43 = vpop.f32.mrf.mxu1  ;;  %v12026_v59 = vld [vmem:[#allocation51_spill] sm:$0xff] }
 0x477   : > { %v3012_v51 = vadd.f32 %v2974_v43, %v12019_v46  ;;  %v12027_v43 = vld [vmem:[#allocation53_spill] sm:$0xff] }
 0x478   : > { %3514 = vmatmul.bf16.gmra.mxu0 %v10796_v31 }
 0x479   : > { %3660 = vmatmul.bf16.gmra.mxu2 %v12020_v6 }
 0x47a   : > { %3563 = vmatmul.bf16.gmra.mxu1 %v10796_v31  ;;  %3709 = vmatmul.bf16.gmra.mxu3 %v12020_v6  ;;  %v10834_v6 = vld [vmem:[%s10073_s12 + $0x128] sm:$0xff] }
 0x47c   : > { %v3220_v32 = vpop.f32.mrf.mxu2 }
 0x47d   : > { %v10808_v15 = vadd.f32 %v3220_v32, %v3011_v35  ;;  %v3269_v34 = vpop.f32.mrf.mxu3  ;;  %v2927_v10 = vpop.f32.mrf.mxu0 }
 0x47e   : > { %v10810_v14 = vadd.f32 %v3269_v34, %v3012_v51  ;;  %v3013_v19 = vadd.f32 %v2927_v10, %v12021_v62  ;;  %v2976_v37 = vpop.f32.mrf.mxu1 }
 0x47f   : > { %v3014_v40 = vadd.f32 %v2976_v37, %v12022_v41 }
 0x484   : > { %v3222_v0 = vpop.f32.mrf.mxu2 }
 0x485   : > { %v10817_v50 = vadd.f32 %v3222_v0, %v3013_v19  ;;  %v3271_v58 = vpop.f32.mrf.mxu3  ;;  %v2930_v49 = vpop.f32.mrf.mxu0  ;;  %v12028_v19 = vld [vmem:[#allocation54_spill] sm:$0xff] }
 0x486   : > { %v10819_v54 = vadd.f32 %v3271_v58, %v3014_v40  ;;  %v3015_v57 = vadd.f32 %v2930_v49, %v12023_v22  ;;  %v2979_v23 = vpop.f32.mrf.mxu1  ;;  %v12029_v40 = vld [vmem:[#allocation55_spill] sm:$0xff]  ;;  %v12030_v58 = vld [vmem:[#allocation50_spill] sm:$0xff] }
 0x487   : > { %v3016_v36 = vadd.f32 %v2979_v23, %v12024_v21 }
 0x488   : > { %3519 = vmatmul.bf16.gmra.mxu0 %v10815_v4 }
 0x489   : > { %3665 = vmatmul.bf16.gmra.mxu2 %v12025_v3 }
 0x48a   : > { %3568 = vmatmul.bf16.gmra.mxu1 %v10815_v4  ;;  %3714 = vmatmul.bf16.gmra.mxu3 %v12025_v3 }
 0x48c   : > { %v3225_v48 = vpop.f32.mrf.mxu2 }
 0x48d   : > { %v10827_v63 = vadd.f32 %v3225_v48, %v3015_v57  ;;  %v3274_v55 = vpop.f32.mrf.mxu3  ;;  %v2932_v8 = vpop.f32.mrf.mxu0 }
 0x48e   : > { %v10829_v33 = vadd.f32 %v3274_v55, %v3016_v36  ;;  %v3017_v60 = vadd.f32 %v2932_v8, %v12026_v59  ;;  %v2981_v35 = vpop.f32.mrf.mxu1  ;;  %v10853_v8 = vld [vmem:[%s10073_s12 + $0x130] sm:$0xff] }
 0x48f   : > { %v3018_v46 = vadd.f32 %v2981_v35, %v12027_v43 }
 0x494   : > { %v3227_v51 = vpop.f32.mrf.mxu2 }
 0x495   : > { %v10836_v32 = vadd.f32 %v3227_v51, %v3017_v60  ;;  %v3276_v34 = vpop.f32.mrf.mxu3  ;;  %v2935_v10 = vpop.f32.mrf.mxu0 }
 0x496   : > { %v10838_v62 = vadd.f32 %v3276_v34, %v3018_v46  ;;  %v3019_v37 = vadd.f32 %v2935_v10, %v12028_v19  ;;  %v2984_v41 = vpop.f32.mrf.mxu1 }
 0x497   : > { %v3020_v0 = vadd.f32 %v2984_v41, %v12029_v40 }
 0x498   : > { %3524 = vmatmul.bf16.gmra.mxu0 %v10834_v6 }
 0x499   : > { %3670 = vmatmul.bf16.gmra.mxu2 %v12030_v58 }
 0x49a   : > { %3573 = vmatmul.bf16.gmra.mxu1 %v10834_v6  ;;  %3719 = vmatmul.bf16.gmra.mxu3 %v12030_v58 }
 0x49c   : > { %v3230_v49 = vpop.f32.mrf.mxu2 }
 0x49d   : > { %v10846_v22 = vadd.f32 %v3230_v49, %v3019_v37  ;;  %v3279_v57 = vpop.f32.mrf.mxu3  ;;  %v2937_v23 = vpop.f32.mrf.mxu0 }
 0x49e   : > { %v10848_v21 = vadd.f32 %v3279_v57, %v3020_v0  ;;  %v3021_v36 = vadd.f32 %v2937_v23, %v10659_v9  ;;  %v2986_v3 = vpop.f32.mrf.mxu1  ;;  %v10872_v0 = vld [vmem:[%s10073_s12 + $0x138] sm:$0xff] }
 0x49f   : > { %v3022_v48 = vadd.f32 %v2986_v3, %v10664_v11 }
 0x4a4   : > { %v3232_v55 = vpop.f32.mrf.mxu2 }
 0x4a5   : > { %v10855_v59 = vadd.f32 %v3232_v55, %v3021_v36  ;;  %v3281_v60 = vpop.f32.mrf.mxu3  ;;  %v2940_v35 = vpop.f32.mrf.mxu0 }
 0x4a6   : > { %v10857_v43 = vadd.f32 %v3281_v60, %v3022_v48  ;;  %v3023_v46 = vadd.f32 %v2940_v35, %v10674_v7 }
 0x4a7   : > { %v2989_v51 = vpop.f32.mrf.mxu1 }
 0x4a8   : > { %v3024_v34 = vadd.f32 %v2989_v51, %v10676_v5  ;;  %3529 = vmatmul.bf16.gmra.mxu0 %v10853_v8 }
 0x4a9   : > { %3675 = vmatmul.bf16.gmra.mxu2 %v10657_v16 }
 0x4aa   : > { %3578 = vmatmul.bf16.gmra.mxu1 %v10853_v8  ;;  %3724 = vmatmul.bf16.gmra.mxu3 %v10657_v16 }
 0x4ac   : > { %v3235_v9 = vpop.f32.mrf.mxu2 }
 0x4ad   : > { %v10865_v11 = vadd.f32 %v3235_v9, %v3023_v46  ;;  %v3284_v10 = vpop.f32.mrf.mxu3  ;;  %v2942_v19 = vpop.f32.mrf.mxu0 }
 0x4ae   : > { %v10867_v37 = vadd.f32 %v3284_v10, %v3024_v34  ;;  %v3025_v7 = vadd.f32 %v2942_v19, %v10685_v28 }
 0x4af   : > { %v2991_v41 = vpop.f32.mrf.mxu1 }
 0x4b0   : > { %v3026_v5 = vadd.f32 %v2991_v41, %v10690_v12  ;;  %v8089_v41 = vld [vmem:[%s10073_s12 + $0x40] sm:$0xff] }
 0x4b4   : > { %v3237_v40 = vpop.f32.mrf.mxu2 }
 0x4b5   : > { %v10874_v58 = vadd.f32 %v3237_v40, %v3025_v7  ;;  %v3286_v49 = vpop.f32.mrf.mxu3  ;;  %v2945_v57 = vpop.f32.mrf.mxu0 }
 0x4b6   : > { %v10876_v16 = vadd.f32 %v3286_v49, %v3026_v5  ;;  %v3027_v23 = vadd.f32 %v2945_v57, %v10700_v20 }
 0x4b7   : > { %v2994_v36 = vpop.f32.mrf.mxu1 }
 0x4b8   : > { %v3028_v3 = vadd.f32 %v2994_v36, %v10702_v42  ;;  %3534 = vmatmul.bf16.gmra.mxu0 %v10872_v0 }
 0x4b9   : > { %3680 = vmatmul.bf16.gmra.mxu2 %v10683_v25 }
 0x4ba   : > { %3583 = vmatmul.bf16.gmra.mxu1 %v10872_v0  ;;  %3729 = vmatmul.bf16.gmra.mxu3 %v10683_v25 }
 0x4bc   : > { %v3240_v28 = vpop.f32.mrf.mxu2 }
 0x4bd   : > { %v10884_v12 = vadd.f32 %v3240_v28, %v3027_v23  ;;  %v3289_v48 = vpop.f32.mrf.mxu3  ;;  %v2947_v55 = vpop.f32.mrf.mxu0 }
 0x4be   : > { %v10886_v60 = vadd.f32 %v3289_v48, %v3028_v3  ;;  %v3029_v20 = vadd.f32 %v2947_v55, %v10709_v53 }
 0x4bf   : > { %v2996_v35 = vpop.f32.mrf.mxu1 }
 0x4c0   : > { %v3030_v42 = vadd.f32 %v2996_v35, %v10711_v24  ;;  %v12031_v24 = vld [vmem:[#allocation34_spill] sm:$0xff]  ;;  %v12032_v35 = vld [vmem:[#allocation35_spill] sm:$0xff] }
 0x4c4   : > { %v3242_v46 = vpop.f32.mrf.mxu2 }
 0x4c5   : > { %v10890_v51 = vadd.f32 %v3242_v46, %v3029_v20  ;;  %v3291_v34 = vpop.f32.mrf.mxu3  ;;  %v3500_v9 = vpop.f32.mrf.mxu0 }
 0x4c6   : > { %v10892_v10 = vadd.f32 %v3291_v34, %v3030_v42  ;;  %v10895_v25 = vadd.f32 %v3500_v9, %v10723_v61 }
 0x4c7   : > { %v3549_v19 = vpop.f32.mrf.mxu1 }
 0x4c8   : > { %v10898_v7 = vadd.f32 %v3549_v19, %v10725_v52  ;;  %3743 = vmatmul.bf16.vlgmr.msrb.gmra.mxu0 %v8089_v41 }
 0x4c9   : > { %3841 = vmatmul.bf16.vlgmr.msrb.gmra.mxu2 %v12031_v24 }
 0x4ca   : > { %3792 = vmatmul.bf16.vlgmr.msrb.gmra.mxu1 %v8089_v41  ;;  %3890 = vmatmul.bf16.vlgmr.msrb.gmra.mxu3 %v12031_v24 }
 0x4cc   : > { %v10905_v5 = vpop.f32.mrf.mxu2 }
 0x4cd   : > { %v10907_v40 = vpop.f32.mrf.mxu3  ;;  %v3502_v61 = vpop.f32.mrf.mxu0 }
 0x4ce   : > { %v10910_v49 = vadd.f32 %v3502_v61, %v10740_v2  ;;  %v8090_v2 = vld [vmem:[%s10073_s12 + $0x48] sm:$0xff] }
 0x4cf   : > { %v3551_v52 = vpop.f32.mrf.mxu1 }
 0x4d0   : > { %v10913_v57 = vadd.f32 %v3551_v52, %v10742_v47 }
 0x4d4   : > { %v10917_v36 = vpop.f32.mrf.mxu2 }
 0x4d5   : > { %v10919_v3 = vpop.f32.mrf.mxu3  ;;  %v3505_v28 = vpop.f32.mrf.mxu0 }
 0x4d6   : > { %v10922_v48 = vadd.f32 %v3505_v28, %v10758_v18 }
 0x4d7   : > { %v3554_v55 = vpop.f32.mrf.mxu1 }
 0x4d8   : > { %v10925_v20 = vadd.f32 %v3554_v55, %v10760_v39  ;;  %3748 = vmatmul.bf16.gmra.mxu0 %v8090_v2 }
 0x4d9   : > { %3846 = vmatmul.bf16.gmra.mxu2 %v12032_v35 }
 0x4da   : > { %3797 = vmatmul.bf16.gmra.mxu1 %v8090_v2  ;;  %3895 = vmatmul.bf16.gmra.mxu3 %v12032_v35  ;;  %v12034_v2 = vld [vmem:[#allocation37_spill] sm:$0xff] }
 0x4dc   : > { %v10932_v42 = vpop.f32.mrf.mxu2 }
 0x4dd   : > { %v10934_v46 = vpop.f32.mrf.mxu3  ;;  %v3507_v18 = vpop.f32.mrf.mxu0 }
 0x4de   : > { %v10937_v34 = vadd.f32 %v3507_v18, %v10775_v45  ;;  %v8091_v45 = vld [vmem:[%s10073_s12 + $0x50] sm:$0xff] }
 0x4df   : > { %v3556_v39 = vpop.f32.mrf.mxu1 }
 0x4e0   : > { %v10940_v9 = vadd.f32 %v3556_v39, %v10777_v17 }
 0x4e4   : > { %v10944_v41 = vpop.f32.mrf.mxu2 }
 0x4e5   : > { %v10946_v24 = vpop.f32.mrf.mxu3  ;;  %v3510_v61 = vpop.f32.mrf.mxu0 }
 0x4e6   : > { %v10949_v52 = vadd.f32 %v3510_v61, %v10789_v27 }
 0x4e7   : > { %v3559_v28 = vpop.f32.mrf.mxu1 }
 0x4e8   : > { %v10952_v55 = vadd.f32 %v3559_v28, %v10791_v44  ;;  %3753 = vmatmul.bf16.gmra.mxu0 %v8091_v45 }
 0x4e9   : > { %3851 = vmatmul.bf16.gmra.mxu2 %v12034_v2 }
 0x4ea   : > { %12033 = vst [vmem:[#allocation27_spill] sm:$0xff] %v10952_v55  ;;  %3802 = vmatmul.bf16.gmra.mxu1 %v8091_v45  ;;  %3900 = vmatmul.bf16.gmra.mxu3 %v12034_v2 }
 0x4ec   : > { %v10959_v35 = vpop.f32.mrf.mxu2 }
 0x4ed   : > { %v10961_v18 = vpop.f32.mrf.mxu3  ;;  %v3512_v27 = vpop.f32.mrf.mxu0 }
 0x4ee   : > { %v10964_v39 = vadd.f32 %v3512_v27, %v10798_v38  ;;  %v8092_v38 = vld [vmem:[%s10073_s12 + $0x58] sm:$0xff]  ;;  %v12039_v27 = vld [vmem:[#allocation40_spill] sm:$0xff] }
 0x4ef   : > { %v3561_v44 = vpop.f32.mrf.mxu1 }
 0x4f0   : > { %12035 = vst [vmem:[#allocation28_spill] sm:$0xff] %v10964_v39  ;;  %v10967_v61 = vadd.f32 %v3561_v44, %v10800_v29 }
 0x4f2   : > { %12036 = vst [vmem:[#allocation29_spill] sm:$0xff] %v10967_v61 }
 0x4f4   : > { %v10971_v45 = vpop.f32.mrf.mxu2 }
 0x4f5   : > { %v10973_v17 = vpop.f32.mrf.mxu3  ;;  %v3515_v2 = vpop.f32.mrf.mxu0 }
 0x4f6   : > { %v10976_v19 = vadd.f32 %v3515_v2, %v10808_v15 }
 0x4f7   : > { %v3564_v47 = vpop.f32.mrf.mxu1 }
 0x4f8   : > { %12037 = vst [vmem:[#allocation30_spill] sm:$0xff] %v10976_v19  ;;  %v10979_v23 = vadd.f32 %v3564_v47, %v10810_v14  ;;  %3758 = vmatmul.bf16.gmra.mxu0 %v8092_v38 }
 0x4f9   : > { %3856 = vmatmul.bf16.gmra.mxu2 %v12039_v27 }
 0x4fa   : > { %12038 = vst [vmem:[#allocation31_spill] sm:$0xff] %v10979_v23  ;;  %3807 = vmatmul.bf16.gmra.mxu1 %v8092_v38  ;;  %3905 = vmatmul.bf16.gmra.mxu3 %v12039_v27 }
 0x4fc   : > { %v10986_v44 = vpop.f32.mrf.mxu2 }
 0x4fd   : > { %v10988_v28 = vpop.f32.mrf.mxu3  ;;  %v3517_v15 = vpop.f32.mrf.mxu0 }
 0x4fe   : > { %v10991_v2 = vadd.f32 %v3517_v15, %v10817_v50  ;;  %v8093_v50 = vld [vmem:[%s10073_s12 + $0x60] sm:$0xff]  ;;  %v12044_v15 = vld [vmem:[#allocation46_spill] sm:$0xff] }
 0x4ff   : > { %v3566_v14 = vpop.f32.mrf.mxu1 }
 0x500   : > { %12040 = vst [vmem:[#allocation32_spill] sm:$0xff] %v10991_v2  ;;  %v10994_v47 = vadd.f32 %v3566_v14, %v10819_v54 }
 0x502   : > { %12041 = vst [vmem:[#allocation33_spill] sm:$0xff] %v10994_v47 }
 0x504   : > { %v10998_v29 = vpop.f32.mrf.mxu2 }
 0x505   : > { %v11000_v53 = vpop.f32.mrf.mxu3  ;;  %v3520_v27 = vpop.f32.mrf.mxu0 }
 0x506   : > { %v11003_v23 = vadd.f32 %v3520_v27, %v10827_v63 }
 0x507   : > { %v3569_v19 = vpop.f32.mrf.mxu1 }
 0x508   : > { %12042 = vst [vmem:[#allocation36_spill] sm:$0xff] %v11003_v23  ;;  %v11006_v61 = vadd.f32 %v3569_v19, %v10829_v33  ;;  %3763 = vmatmul.bf16.gmra.mxu0 %v8093_v50 }
 0x509   : > { %3861 = vmatmul.bf16.gmra.mxu2 %v12044_v15 }
 0x50a   : > { %12043 = vst [vmem:[#allocation39_spill] sm:$0xff] %v11006_v61  ;;  %3812 = vmatmul.bf16.gmra.mxu1 %v8093_v50  ;;  %3910 = vmatmul.bf16.gmra.mxu3 %v12044_v15 }
 0x50c   : > { %v11013_v14 = vpop.f32.mrf.mxu2 }
 0x50d   : > { %v11015_v38 = vpop.f32.mrf.mxu3  ;;  %v3522_v63 = vpop.f32.mrf.mxu0 }
 0x50e   : > { %v11018_v27 = vadd.f32 %v3522_v63, %v10836_v32  ;;  %v8094_v32 = vld [vmem:[%s10073_s12 + $0x68] sm:$0xff] }
 0x50f   : > { %v3571_v33 = vpop.f32.mrf.mxu1  ;;  %v12049_v63 = vld [vmem:[#allocation52_spill] sm:$0xff] }
 0x510   : > { %12045 = vst [vmem:[#allocation41_spill] sm:$0xff] %v11018_v27  ;;  %v11021_v19 = vadd.f32 %v3571_v33, %v10838_v62 }
 0x512   : > { %12046 = vst [vmem:[#allocation42_spill] sm:$0xff] %v11021_v19 }
 0x514   : > { %v11025_v54 = vpop.f32.mrf.mxu2 }
 0x515   : > { %v11027_v61 = vpop.f32.mrf.mxu3  ;;  %v3525_v15 = vpop.f32.mrf.mxu0 }
 0x516   : > { %v11030_v23 = vadd.f32 %v3525_v15, %v10846_v22 }
 0x517   : > { %v3574_v47 = vpop.f32.mrf.mxu1 }
 0x518   : > { %12047 = vst [vmem:[#allocation43_spill] sm:$0xff] %v11030_v23  ;;  %v11033_v2 = vadd.f32 %v3574_v47, %v10848_v21  ;;  %3768 = vmatmul.bf16.gmra.mxu0 %v8094_v32 }
 0x519   : > { %3866 = vmatmul.bf16.gmra.mxu2 %v12049_v63 }
 0x51a   : > { %12048 = vst [vmem:[#allocation38_spill] sm:$0xff] %v11033_v2  ;;  %3817 = vmatmul.bf16.gmra.mxu1 %v8094_v32  ;;  %3915 = vmatmul.bf16.gmra.mxu3 %v12049_v63 }
 0x51c   : > { %v11040_v33 = vpop.f32.mrf.mxu2 }
 0x51d   : > { %v11042_v50 = vpop.f32.mrf.mxu3  ;;  %v3527_v22 = vpop.f32.mrf.mxu0 }
 0x51e   : > { %v11045_v15 = vadd.f32 %v3527_v22, %v10855_v59  ;;  %v8095_v59 = vld [vmem:[%s10073_s12 + $0x70] sm:$0xff] }
 0x51f   : > { %v3576_v21 = vpop.f32.mrf.mxu1 }
 0x520   : > { %12050 = vst [vmem:[#allocation45_spill] sm:$0xff] %v11045_v15  ;;  %v11048_v47 = vadd.f32 %v3576_v21, %v10857_v43 }
 0x522   : > { %12051 = vst [vmem:[#allocation47_spill] sm:$0xff] %v11048_v47 }
 0x524   : > { %v11052_v62 = vpop.f32.mrf.mxu2 }
 0x525   : > { %v11054_v2 = vpop.f32.mrf.mxu3  ;;  %v3530_v63 = vpop.f32.mrf.mxu0 }
 0x526   : > { %v11057_v23 = vadd.f32 %v3530_v63, %v10865_v11 }
 0x527   : > { %v3579_v19 = vpop.f32.mrf.mxu1 }
 0x528   : > { %12052 = vst [vmem:[#allocation48_spill] sm:$0xff] %v11057_v23  ;;  %v11060_v27 = vadd.f32 %v3579_v19, %v10867_v37  ;;  %3773 = vmatmul.bf16.gmra.mxu0 %v8095_v59 }
 0x529   : > { %3871 = vmatmul.bf16.gmra.mxu2 %v10662_v56 }
 0x52a   : > { %12053 = vst [vmem:[#allocation49_spill] sm:$0xff] %v11060_v27  ;;  %3822 = vmatmul.bf16.gmra.mxu1 %v8095_v59  ;;  %3920 = vmatmul.bf16.gmra.mxu3 %v10662_v56 }
 0x52c   : > { %v11067_v22 = vpop.f32.mrf.mxu2 }
 0x52d   : > { %v11069_v21 = vpop.f32.mrf.mxu3  ;;  %v3532_v11 = vpop.f32.mrf.mxu0 }
 0x52e   : > { %v11072_v63 = vadd.f32 %v3532_v11, %v10874_v58  ;;  %v8096_v58 = vld [vmem:[%s10073_s12 + $0x78] sm:$0xff] }
 0x52f   : > { %v3581_v37 = vpop.f32.mrf.mxu1 }
 0x530   : > { %12054 = vst [vmem:[#allocation44_spill] sm:$0xff] %v11072_v63  ;;  %v11075_v19 = vadd.f32 %v3581_v37, %v10876_v16 }
 0x532   : > { %12055 = vst [vmem:[#allocation51_spill] sm:$0xff] %v11075_v19 }
 0x534   : > { %v11079_v43 = vpop.f32.mrf.mxu2 }
 0x535   : > { %v11081_v32 = vpop.f32.mrf.mxu3  ;;  %v3535_v56 = vpop.f32.mrf.mxu0 }
 0x536   : > { %v11084_v27 = vadd.f32 %v3535_v56, %v10884_v12 }
 0x537   : > { %v3584_v23 = vpop.f32.mrf.mxu1 }
 0x538   : > { %12056 = vst [vmem:[#allocation53_spill] sm:$0xff] %v11084_v27  ;;  %v11087_v47 = vadd.f32 %v3584_v23, %v10886_v60  ;;  %3778 = vmatmul.bf16.gmra.mxu0 %v8096_v58 }
 0x539   : > { %3876 = vmatmul.bf16.gmra.mxu2 %v10688_v26 }
 0x53a   : > { %12057 = vst [vmem:[#allocation54_spill] sm:$0xff] %v11087_v47  ;;  %3827 = vmatmul.bf16.gmra.mxu1 %v8096_v58  ;;  %3925 = vmatmul.bf16.gmra.mxu3 %v10688_v26  ;;  %v7840_v47 = vld [vmem:[%s10073_s12 + $0x140] sm:$0xff] }
 0x53c   : > { %v11094_v11 = vpop.f32.mrf.mxu2 }
 0x53d   : > { %v11096_v37 = vpop.f32.mrf.mxu3  ;;  %v3537_v12 = vpop.f32.mrf.mxu0 }
 0x53e   : > { %v11099_v56 = vadd.f32 %v3537_v12, %v10890_v51 }
 0x53f   : > { %v3586_v60 = vpop.f32.mrf.mxu1 }
 0x540   : > { %12058 = vst [vmem:[#allocation55_spill] sm:$0xff] %v11099_v56  ;;  %v11102_v23 = vadd.f32 %v3586_v60, %v10892_v10 }
 0x542   : > { %12059 = vst [vmem:[#allocation50_spill] sm:$0xff] %v11102_v23 }
 0x544   : > { %v11106_v58 = vpop.f32.mrf.mxu2 }
 0x545   : > { %v11108_v59 = vpop.f32.mrf.mxu3  ;;  %v3744_v26 = vpop.f32.mrf.mxu0 }
 0x546   : > { %v3745_v51 = vadd.f32 %v3744_v26, %v10905_v5  ;;  %v7841_v5 = vld [vmem:[%s10073_s12 + $0x148] sm:$0xff] }
 0x547   : > { %v3793_v27 = vpop.f32.mrf.mxu1 }
 0x548   : > { %3971 = vmatmul.bf16.vlgmr.msra.gmra.mxu0 %v10707_v1  ;;  %v3794_v10 = vadd.f32 %v3793_v27, %v10907_v40 }
 0x549   : > { %4169 = vmatmul.bf16.vlgmr.msra.gmra.mxu2 %v7840_v47 }
 0x54a   : > { %4020 = vmatmul.bf16.vlgmr.msra.gmra.mxu1 %v10707_v1  ;;  %4218 = vmatmul.bf16.vlgmr.msra.gmra.mxu3 %v7840_v47 }
 0x54c   : > { %v3842_v12 = vpop.f32.mrf.mxu2 }
 0x54d   : > { %v11115_v60 = vadd.f32 %v3842_v12, %v3745_v51  ;;  %v3891_v16 = vpop.f32.mrf.mxu3  ;;  %v3746_v23 = vpop.f32.mrf.mxu0 }
 0x54e   : > { %v11117_v56 = vadd.f32 %v3891_v16, %v3794_v10  ;;  %v3747_v63 = vadd.f32 %v3746_v23, %v10917_v36 }
 0x54f   : > { %v3795_v19 = vpop.f32.mrf.mxu1 }
 0x550   : > { %v3796_v15 = vadd.f32 %v3795_v19, %v10919_v3 }
 0x554   : > { %v3844_v1 = vpop.f32.mrf.mxu2 }
 0x555   : > { %v11121_v39 = vadd.f32 %v3844_v1, %v3747_v63  ;;  %v3893_v47 = vpop.f32.mrf.mxu3  ;;  %v3749_v55 = vpop.f32.mrf.mxu0 }
 0x556   : > { %v11124_v26 = vadd.f32 %v3893_v47, %v3796_v15  ;;  %v3750_v36 = vadd.f32 %v3749_v55, %v10932_v42  ;;  %v7842_v42 = vld [vmem:[%s10073_s12 + $0x150] sm:$0xff] }
 0x557   : > { %v3798_v40 = vpop.f32.mrf.mxu1 }
 0x558   : > { %3976 = vmatmul.bf16.gmra.mxu0 %v10737_v30  ;;  %v3799_v3 = vadd.f32 %v3798_v40, %v10934_v46 }
 0x559   : > { %4174 = vmatmul.bf16.gmra.mxu2 %v7841_v5 }
 0x55a   : > { %4025 = vmatmul.bf16.gmra.mxu1 %v10737_v30  ;;  %4223 = vmatmul.bf16.gmra.mxu3 %v7841_v5 }
 0x55c   : > { %v3847_v27 = vpop.f32.mrf.mxu2 }
 0x55d   : > { %v11130_v63 = vadd.f32 %v3847_v27, %v3750_v36  ;;  %v3896_v19 = vpop.f32.mrf.mxu3  ;;  %v3751_v16 = vpop.f32.mrf.mxu0 }
 0x55e   : > { %v11132_v23 = vadd.f32 %v3896_v19, %v3799_v3  ;;  %v3752_v51 = vadd.f32 %v3751_v16, %v10944_v41 }
 0x55f   : > { %v3800_v15 = vpop.f32.mrf.mxu1 }
 0x560   : > { %v3801_v10 = vadd.f32 %v3800_v15, %v10946_v24 }
 0x564   : > { %v3849_v30 = vpop.f32.mrf.mxu2 }
 0x565   : > { %v11136_v12 = vadd.f32 %v3849_v30, %v3752_v51  ;;  %v3898_v1 = vpop.f32.mrf.mxu3  ;;  %v3754_v47 = vpop.f32.mrf.mxu0 }
 0x566   : > { %v11139_v55 = vadd.f32 %v3898_v1, %v3801_v10  ;;  %v3755_v41 = vadd.f32 %v3754_v47, %v10959_v35  ;;  %v7843_v35 = vld [vmem:[%s10073_s12 + $0x158] sm:$0xff] }
 0x567   : > { %v3803_v46 = vpop.f32.mrf.mxu1 }
 0x568   : > { %3981 = vmatmul.bf16.gmra.mxu0 %v10772_v13  ;;  %v3804_v24 = vadd.f32 %v3803_v46, %v10961_v18 }
 0x569   : > { %4179 = vmatmul.bf16.gmra.mxu2 %v7842_v42 }
 0x56a   : > { %4030 = vmatmul.bf16.gmra.mxu1 %v10772_v13  ;;  %4228 = vmatmul.bf16.gmra.mxu3 %v7842_v42 }
 0x56c   : > { %v3852_v5 = vpop.f32.mrf.mxu2 }
 0x56d   : > { %v11145_v40 = vadd.f32 %v3852_v5, %v3755_v41  ;;  %v3901_v36 = vpop.f32.mrf.mxu3  ;;  %v3756_v3 = vpop.f32.mrf.mxu0 }
 0x56e   : > { %v11147_v27 = vadd.f32 %v3901_v36, %v3804_v24  ;;  %v3757_v16 = vadd.f32 %v3756_v3, %v10971_v45 }
 0x56f   : > { %v3805_v19 = vpop.f32.mrf.mxu1 }
 0x570   : > { %v3806_v15 = vadd.f32 %v3805_v19, %v10973_v17 }
 0x574   : > { %v3854_v13 = vpop.f32.mrf.mxu2 }
 0x575   : > { %v11151_v51 = vadd.f32 %v3854_v13, %v3757_v16  ;;  %v3903_v10 = vpop.f32.mrf.mxu3  ;;  %v3759_v30 = vpop.f32.mrf.mxu0 }
 0x576   : > { %v11154_v1 = vadd.f32 %v3903_v10, %v3806_v15  ;;  %v3760_v45 = vadd.f32 %v3759_v30, %v10986_v44  ;;  %v7844_v44 = vld [vmem:[%s10073_s12 + $0x160] sm:$0xff] }
 0x577   : > { %v3808_v18 = vpop.f32.mrf.mxu1 }
 0x578   : > { %3986 = vmatmul.bf16.gmra.mxu0 %v10796_v31  ;;  %v3809_v17 = vadd.f32 %v3808_v18, %v10988_v28 }
 0x579   : > { %4184 = vmatmul.bf16.gmra.mxu2 %v7843_v35 }
 0x57a   : > { %4035 = vmatmul.bf16.gmra.mxu1 %v10796_v31  ;;  %4233 = vmatmul.bf16.gmra.mxu3 %v7843_v35 }
 0x57c   : > { %v3857_v47 = vpop.f32.mrf.mxu2 }
 0x57d   : > { %v11160_v42 = vadd.f32 %v3857_v47, %v3760_v45  ;;  %v3906_v46 = vpop.f32.mrf.mxu3  ;;  %v3761_v41 = vpop.f32.mrf.mxu0 }
 0x57e   : > { %v11162_v24 = vadd.f32 %v3906_v46, %v3809_v17  ;;  %v3762_v36 = vadd.f32 %v3761_v41, %v10998_v29 }
 0x57f   : > { %v3810_v5 = vpop.f32.mrf.mxu1 }
 0x580   : > { %v3811_v3 = vadd.f32 %v3810_v5, %v11000_v53 }
 0x584   : > { %v3859_v31 = vpop.f32.mrf.mxu2 }
 0x585   : > { %v11166_v19 = vadd.f32 %v3859_v31, %v3762_v36  ;;  %v3908_v16 = vpop.f32.mrf.mxu3  ;;  %v3764_v15 = vpop.f32.mrf.mxu0 }
 0x586   : > { %v11169_v13 = vadd.f32 %v3908_v16, %v3811_v3  ;;  %v3765_v29 = vadd.f32 %v3764_v15, %v11013_v14  ;;  %v7845_v14 = vld [vmem:[%s10073_s12 + $0x168] sm:$0xff] }
 0x587   : > { %v3813_v28 = vpop.f32.mrf.mxu1 }
 0x588   : > { %3991 = vmatmul.bf16.gmra.mxu0 %v10815_v4  ;;  %v3814_v53 = vadd.f32 %v3813_v28, %v11015_v38 }
 0x589   : > { %4189 = vmatmul.bf16.gmra.mxu2 %v7844_v44 }
 0x58a   : > { %4040 = vmatmul.bf16.gmra.mxu1 %v10815_v4  ;;  %4238 = vmatmul.bf16.gmra.mxu3 %v7844_v44 }
 0x58c   : > { %v3862_v10 = vpop.f32.mrf.mxu2 }
 0x58d   : > { %v11175_v30 = vadd.f32 %v3862_v10, %v3765_v29  ;;  %v3911_v35 = vpop.f32.mrf.mxu3  ;;  %v3766_v18 = vpop.f32.mrf.mxu0 }
 0x58e   : > { %v11177_v45 = vadd.f32 %v3911_v35, %v3814_v53  ;;  %v3767_v47 = vadd.f32 %v3766_v18, %v11025_v54 }
 0x58f   : > { %v3815_v17 = vpop.f32.mrf.mxu1 }
 0x590   : > { %v3816_v46 = vadd.f32 %v3815_v17, %v11027_v61 }
 0x594   : > { %v3864_v4 = vpop.f32.mrf.mxu2 }
 0x595   : > { %v11181_v41 = vadd.f32 %v3864_v4, %v3767_v47  ;;  %v3913_v5 = vpop.f32.mrf.mxu3  ;;  %v3769_v36 = vpop.f32.mrf.mxu0 }
 0x596   : > { %v11184_v3 = vadd.f32 %v3913_v5, %v3816_v46  ;;  %v3770_v54 = vadd.f32 %v3769_v36, %v11040_v33  ;;  %v7846_v33 = vld [vmem:[%s10073_s12 + $0x170] sm:$0xff] }
 0x597   : > { %v3818_v38 = vpop.f32.mrf.mxu1 }
 0x598   : > { %3996 = vmatmul.bf16.gmra.mxu0 %v10834_v6  ;;  %v3819_v61 = vadd.f32 %v3818_v38, %v11042_v50 }
 0x599   : > { %4194 = vmatmul.bf16.gmra.mxu2 %v7845_v14 }
 0x59a   : > { %4045 = vmatmul.bf16.gmra.mxu1 %v10834_v6  ;;  %4243 = vmatmul.bf16.gmra.mxu3 %v7845_v14 }
 0x59c   : > { %v3867_v31 = vpop.f32.mrf.mxu2 }
 0x59d   : > { %v11190_v16 = vadd.f32 %v3867_v31, %v3770_v54  ;;  %v3916_v15 = vpop.f32.mrf.mxu3  ;;  %v3771_v44 = vpop.f32.mrf.mxu0 }
 0x59e   : > { %v11192_v28 = vadd.f32 %v3916_v15, %v3819_v61  ;;  %v3772_v53 = vadd.f32 %v3771_v44, %v11052_v62 }
 0x59f   : > { %v3820_v29 = vpop.f32.mrf.mxu1 }
 0x5a0   : > { %v3821_v10 = vadd.f32 %v3820_v29, %v11054_v2 }
 0x5a4   : > { %v3869_v6 = vpop.f32.mrf.mxu2 }
 0x5a5   : > { %v11196_v35 = vadd.f32 %v3869_v6, %v3772_v53  ;;  %v3918_v18 = vpop.f32.mrf.mxu3  ;;  %v3774_v17 = vpop.f32.mrf.mxu0 }
 0x5a6   : > { %v11199_v47 = vadd.f32 %v3918_v18, %v3821_v10  ;;  %v3775_v62 = vadd.f32 %v3774_v17, %v11067_v22  ;;  %v7847_v22 = vld [vmem:[%s10073_s12 + $0x178] sm:$0xff] }
 0x5a7   : > { %v3823_v50 = vpop.f32.mrf.mxu1 }
 0x5a8   : > { %4001 = vmatmul.bf16.gmra.mxu0 %v10853_v8  ;;  %v3824_v2 = vadd.f32 %v3823_v50, %v11069_v21 }
 0x5a9   : > { %4199 = vmatmul.bf16.gmra.mxu2 %v7846_v33 }
 0x5aa   : > { %4050 = vmatmul.bf16.gmra.mxu1 %v10853_v8  ;;  %4248 = vmatmul.bf16.gmra.mxu3 %v7846_v33 }
 0x5ac   : > { %v3872_v46 = vpop.f32.mrf.mxu2 }
 0x5ad   : > { %v11205_v4 = vadd.f32 %v3872_v46, %v3775_v62  ;;  %v3921_v5 = vpop.f32.mrf.mxu3  ;;  %v3776_v36 = vpop.f32.mrf.mxu0 }
 0x5ae   : > { %v11207_v14 = vadd.f32 %v3921_v5, %v3824_v2  ;;  %v3777_v54 = vadd.f32 %v3776_v36, %v11079_v43 }
 0x5af   : > { %v3825_v38 = vpop.f32.mrf.mxu1 }
 0x5b0   : > { %v3826_v61 = vadd.f32 %v3825_v38, %v11081_v32 }
 0x5b4   : > { %v3874_v8 = vpop.f32.mrf.mxu2 }
 0x5b5   : > { %v11211_v31 = vadd.f32 %v3874_v8, %v3777_v54  ;;  %v3923_v15 = vpop.f32.mrf.mxu3  ;;  %v3779_v44 = vpop.f32.mrf.mxu0 }
 0x5b6   : > { %v11214_v29 = vadd.f32 %v3923_v15, %v3826_v61  ;;  %v3780_v53 = vadd.f32 %v3779_v44, %v11094_v11 }
 0x5b7   : > { %v3828_v21 = vpop.f32.mrf.mxu1 }
 0x5b8   : > { %4006 = vmatmul.bf16.gmra.mxu0 %v10872_v0  ;;  %v3829_v43 = vadd.f32 %v3828_v21, %v11096_v37 }
 0x5b9   : > { %4204 = vmatmul.bf16.gmra.mxu2 %v7847_v22 }
 0x5ba   : > { %4055 = vmatmul.bf16.gmra.mxu1 %v10872_v0  ;;  %4253 = vmatmul.bf16.gmra.mxu3 %v7847_v22 }
 0x5bc   : > { %v3877_v32 = vpop.f32.mrf.mxu2 }
 0x5bd   : > { %v11220_v10 = vadd.f32 %v3877_v32, %v3780_v53  ;;  %v3926_v6 = vpop.f32.mrf.mxu3  ;;  %v3781_v18 = vpop.f32.mrf.mxu0 }
 0x5be   : > { %v11222_v17 = vadd.f32 %v3926_v6, %v3829_v43  ;;  %v3782_v50 = vadd.f32 %v3781_v18, %v11106_v58  ;;  %v11240_v18 = vld [vmem:[%s11770_s4] ss:$0 sm:$0xff] }
 0x5bf   : > { %v3830_v33 = vpop.f32.mrf.mxu1 }
 0x5c0   : > { %v3831_v62 = vadd.f32 %v3830_v33, %v11108_v59  ;;  %v12060_v59 = vmax.f32 %v10895_v25, %v10898_v7  ;;  %v12061_v7 = vmax.f32 %v10910_v49, %v10913_v57  ;;  %v12062_v49 = vmax.f32 %v10922_v48, %v10925_v20 }
 0x5c4   : > { %v3879_v2 = vpop.f32.mrf.mxu2 }
 0x5c5   : > { %v11226_v0 = vadd.f32 %v3879_v2, %v3782_v50  ;;  %v3928_v46 = vpop.f32.mrf.mxu3  ;;  %v3972_v5 = vpop.f32.mrf.mxu0 }
 0x5c6   : > { %v11228_v11 = vadd.f32 %v3928_v46, %v3831_v62  ;;  %v4061_v36 = vadd.f32 %v3972_v5, %v11115_v60 }
 0x5c7   : > { %v4021_v37 = vpop.f32.mrf.mxu1 }
 0x5c8   : > { %v4062_v38 = vadd.f32 %v4021_v37, %v11117_v56 }
 0x5cc   : > { %v4170_v54 = vpop.f32.mrf.mxu2 }
 0x5cd   : > { %v4259_v61 = vadd.f32 %v4170_v54, %v4061_v36  ;;  %v4219_v8 = vpop.f32.mrf.mxu3  ;;  %v3974_v15 = vpop.f32.mrf.mxu0 }
 0x5ce   : > { %v4260_v44 = vadd.f32 %v4219_v8, %v4062_v38  ;;  %v4063_v53 = vadd.f32 %v3974_v15, %v11121_v39 }
 0x5cf   : > { %v4023_v58 = vpop.f32.mrf.mxu1 }
 0x5d0   : > { %v4291_v22 = vmax.f32 %v4259_v61, %v4260_v44  ;;  %v4064_v43 = vadd.f32 %v4023_v58, %v11124_v26 }
 0x5d2   : > { %v4307_v21 = vmax.f32 %v12060_v59, %v4291_v22 }
 0x5d4   : > { %v4172_v32 = vpop.f32.mrf.mxu2  ;;  %v4327_v25 = vadd.f32 %v11240_v18, %v4307_v21 }
 0x5d5   : > { %v4261_v60 = vadd.f32 %v4172_v32, %v4063_v53  ;;  %v4221_v6 = vpop.f32.mrf.mxu3  ;;  %v3977_v56 = vpop.f32.mrf.mxu0 }
 0x5d6   : > { %v4262_v33 = vadd.f32 %v4221_v6, %v4064_v43  ;;  %v4065_v26 = vadd.f32 %v3977_v56, %v11130_v63  ;;  %v4343_v54 = vmax.f32 %v4327_v25, 0.0  ;;  %v12063_v56 = vmax.f32 %v10937_v34, %v10940_v9  ;;  %v12064_v34 = vld [vmem:[#allocation27_spill] sm:$0xff] }
 0x5d7   : > { %v4026_v50 = vpop.f32.mrf.mxu1  ;;  %v12065_v9 = vmax.f32 %v10949_v52, %v12064_v34  ;;  %v12073_v34 = vld [vmem:[#allocation33_spill] sm:$0xff] }
 0x5d8   : > { %v4292_v62 = vmax.f32 %v4261_v60, %v4262_v33  ;;  %v4066_v46 = vadd.f32 %v4026_v50, %v11132_v23 }
 0x5da   : > { %v4308_v39 = vmax.f32 %v12061_v7, %v4292_v62 }
 0x5dc   : > { %v4328_v2 = vadd.f32 %v11240_v18, %v4308_v39  ;;  %v4175_v5 = vpop.f32.mrf.mxu2 }
 0x5dd   : > { %v4263_v37 = vadd.f32 %v4175_v5, %v4065_v26  ;;  %v4224_v36 = vpop.f32.mrf.mxu3  ;;  %v3979_v38 = vpop.f32.mrf.mxu0 }
 0x5de   : > { %v4344_v61 = vmax.f32 %v4328_v2, 0.0  ;;  %v4264_v8 = vadd.f32 %v4224_v36, %v4066_v46  ;;  %v4067_v63 = vadd.f32 %v3979_v38, %v11136_v12 }
 0x5df   : > { %v4028_v15 = vpop.f32.mrf.mxu1 }
 0x5e0   : > { %v7988_v44 = vpack.c.bf16 %v4344_v61, %v4343_v54  ;;  %v4293_v58 = vmax.f32 %v4263_v37, %v4264_v8  ;;  %v4068_v23 = vadd.f32 %v4028_v15, %v11139_v55 }
 0x5e2   : > { %7989 = vst [vmem:[%s11250_s18] sm:$0xff] %v7988_v44   ;;  %v4309_v57 = vmax.f32 %v12062_v49, %v4293_v58  ;;  %v12066_v49 = vld [vmem:[#allocation28_spill] sm:$0xff] }
 0x5e4   : > { %v4177_v22 = vpop.f32.mrf.mxu2  ;;  %v4329_v6 = vadd.f32 %v11240_v18, %v4309_v57  ;;  %v12067_v57 = vld [vmem:[#allocation29_spill] sm:$0xff] }
 0x5e5   : > { %v4265_v59 = vadd.f32 %v4177_v22, %v4067_v63  ;;  %v4226_v21 = vpop.f32.mrf.mxu3  ;;  %v3982_v53 = vpop.f32.mrf.mxu0  ;;  %v12068_v63 = vmax.f32 %v12066_v49, %v12067_v57  ;;  %v12075_v57 = vld [vmem:[#allocation36_spill] sm:$0xff] }
 0x5e6   : > { %v4266_v43 = vadd.f32 %v4226_v21, %v4068_v23  ;;  %v4069_v48 = vadd.f32 %v3982_v53, %v11145_v40  ;;  %v4345_v7 = vmax.f32 %v4329_v6, 0.0 }
 0x5e7   : > { %v4031_v32 = vpop.f32.mrf.mxu1 }
 0x5e8   : > { %v4294_v60 = vmax.f32 %v4265_v59, %v4266_v43  ;;  %v4070_v12 = vadd.f32 %v4031_v32, %v11147_v27 }
 0x5ea   : > { %v4310_v33 = vmax.f32 %v12063_v56, %v4294_v60 }
 0x5ec   : > { %v4330_v20 = vadd.f32 %v11240_v18, %v4310_v33  ;;  %v4180_v55 = vpop.f32.mrf.mxu2 }
 0x5ed   : > { %v4267_v50 = vadd.f32 %v4180_v55, %v4069_v48  ;;  %v4229_v62 = vpop.f32.mrf.mxu3  ;;  %v3984_v25 = vpop.f32.mrf.mxu0  ;;  %v12069_v48 = vld [vmem:[#allocation30_spill] sm:$0xff] }
 0x5ee   : > { %v4346_v39 = vmax.f32 %v4330_v20, 0.0  ;;  %v4268_v26 = vadd.f32 %v4229_v62, %v4070_v12  ;;  %v4071_v40 = vadd.f32 %v3984_v25, %v11151_v51  ;;  %v12070_v20 = vld [vmem:[#allocation31_spill] sm:$0xff] }
 0x5ef   : > { %v4033_v2 = vpop.f32.mrf.mxu1  ;;  %v12071_v12 = vmax.f32 %v12069_v48, %v12070_v20 }
 0x5f0   : > { %v7993_v46 = vpack.c.bf16 %v4346_v39, %v4345_v7  ;;  %v4295_v5 = vmax.f32 %v4267_v50, %v4268_v26  ;;  %v4072_v36 = vadd.f32 %v4033_v2, %v11154_v1 }
 0x5f2   : > { %8032 = vst [vmem:[%s11250_s18 + $0x8] sm:$0xff] %v7993_v46   ;;  %v4311_v37 = vmax.f32 %v12065_v9, %v4295_v5  ;;  %v12072_v5 = vld [vmem:[#allocation32_spill] sm:$0xff] }
 0x5f3   : > { %v12074_v9 = vmax.f32 %v12072_v5, %v12073_v34 }
 0x5f4   : > { %v4182_v27 = vpop.f32.mrf.mxu2  ;;  %v4331_v58 = vadd.f32 %v11240_v18, %v4311_v37 }
 0x5f5   : > { %v4269_v38 = vadd.f32 %v4182_v27, %v4071_v40  ;;  %v4231_v54 = vpop.f32.mrf.mxu3  ;;  %v3987_v61 = vpop.f32.mrf.mxu0 }
 0x5f6   : > { %v4270_v8 = vadd.f32 %v4231_v54, %v4072_v36  ;;  %v4073_v52 = vadd.f32 %v3987_v61, %v11160_v42  ;;  %v4347_v43 = vmax.f32 %v4331_v58, 0.0 }
 0x5f7   : > { %v4036_v15 = vpop.f32.mrf.mxu1 }
 0x5f8   : > { %v4296_v44 = vmax.f32 %v4269_v38, %v4270_v8  ;;  %v4074_v1 = vadd.f32 %v4036_v15, %v11162_v24 }
 0x5fa   : > { %v4312_v23 = vmax.f32 %v12068_v63, %v4296_v44  ;;  %v12076_v63 = vld [vmem:[#allocation39_spill] sm:$0xff] }
 0x5fc   : > { %v4332_v51 = vadd.f32 %v11240_v18, %v4312_v23  ;;  %v4185_v22 = vpop.f32.mrf.mxu2  ;;  %v12077_v23 = vmax.f32 %v12075_v57, %v12076_v63 }
 0x5fd   : > { %v4271_v59 = vadd.f32 %v4185_v22, %v4073_v52  ;;  %v4234_v21 = vpop.f32.mrf.mxu3  ;;  %v3989_v53 = vpop.f32.mrf.mxu0 }
 0x5fe   : > { %v4348_v32 = vmax.f32 %v4332_v51, 0.0  ;;  %v4272_v60 = vadd.f32 %v4234_v21, %v4074_v1  ;;  %v4075_v42 = vadd.f32 %v3989_v53, %v11166_v19 }
 0x5ff   : > { %v4038_v6 = vpop.f32.mrf.mxu1 }
 0x600   : > { %v7998_v56 = vpack.c.bf16 %v4348_v32, %v4347_v43  ;;  %v4297_v33 = vmax.f32 %v4271_v59, %v4272_v60  ;;  %v4076_v50 = vadd.f32 %v4038_v6, %v11169_v13  ;;  %v12078_v60 = vld [vmem:[#allocation41_spill] sm:$0xff]  ;;  %v12079_v6 = vld [vmem:[#allocation42_spill] sm:$0xff] }
 0x602   : > { %8033 = vst [vmem:[%s11250_s18 + $0x10] sm:$0xff] %v7998_v56   ;;  %v4313_v55 = vmax.f32 %v12071_v12, %v4297_v33  ;;  %v12080_v56 = vmax.f32 %v12078_v60, %v12079_v6 }
 0x604   : > { %v4187_v24 = vpop.f32.mrf.mxu2  ;;  %v4333_v46 = vadd.f32 %v11240_v18, %v4313_v55 }
 0x605   : > { %v4273_v62 = vadd.f32 %v4187_v24, %v4075_v42  ;;  %v4236_v25 = vpop.f32.mrf.mxu3  ;;  %v3992_v7 = vpop.f32.mrf.mxu0 }
 0x606   : > { %v4274_v39 = vadd.f32 %v4236_v25, %v4076_v50  ;;  %v4077_v40 = vadd.f32 %v3992_v7, %v11175_v30  ;;  %v4349_v61 = vmax.f32 %v4333_v46, 0.0 }
 0x607   : > { %v4041_v26 = vpop.f32.mrf.mxu1 }
 0x608   : > { %v4298_v2 = vmax.f32 %v4273_v62, %v4274_v39  ;;  %v4078_v13 = vadd.f32 %v4041_v26, %v11177_v45  ;;  %v12081_v26 = vld [vmem:[#allocation43_spill] sm:$0xff] }
 0x60a   : > { %v4314_v37 = vmax.f32 %v12074_v9, %v4298_v2  ;;  %v12082_v2 = vld [vmem:[#allocation38_spill] sm:$0xff] }
 0x60b   : > { %v12083_v46 = vmax.f32 %v12081_v26, %v12082_v2 }
 0x60c   : > { %v4334_v19 = vadd.f32 %v11240_v18, %v4314_v37  ;;  %v4190_v36 = vpop.f32.mrf.mxu2 }
 0x60d   : > { %v4275_v27 = vadd.f32 %v4190_v36, %v4077_v40  ;;  %v4239_v38 = vpop.f32.mrf.mxu3  ;;  %v3994_v54 = vpop.f32.mrf.mxu0 }
 0x60e   : > { %v4350_v8 = vmax.f32 %v4334_v19, 0.0  ;;  %v4276_v15 = vadd.f32 %v4239_v38, %v4078_v13  ;;  %v4079_v30 = vadd.f32 %v3994_v54, %v11181_v41  ;;  %v12084_v38 = vld [vmem:[#allocation45_spill] sm:$0xff]  ;;  %v12085_v54 = vld [vmem:[#allocation47_spill] sm:$0xff] }
 0x60f   : > { %v4043_v44 = vpop.f32.mrf.mxu1 }
 0x610   : > { %v8003_v58 = vpack.c.bf16 %v4350_v8, %v4349_v61  ;;  %v4299_v49 = vmax.f32 %v4275_v27, %v4276_v15  ;;  %v4080_v51 = vadd.f32 %v4043_v44, %v11184_v3  ;;  %v12086_v61 = vmax.f32 %v12084_v38, %v12085_v54  ;;  %v12097_v38 = vld [vmem:[#allocation50_spill] sm:$0xff] }
 0x612   : > { %8034 = vst [vmem:[%s11250_s18 + $0x18] sm:$0xff] %v8003_v58   ;;  %v4315_v52 = vmax.f32 %v12077_v23, %v4299_v49 }
 0x614   : > { %v4192_v45 = vpop.f32.mrf.mxu2  ;;  %v4335_v32 = vadd.f32 %v11240_v18, %v4315_v52 }
 0x615   : > { %v4277_v1 = vadd.f32 %v4192_v45, %v4079_v30  ;;  %v4241_v22 = vpop.f32.mrf.mxu3  ;;  %v3997_v59 = vpop.f32.mrf.mxu0 }
 0x616   : > { %v4278_v21 = vadd.f32 %v4241_v22, %v4080_v51  ;;  %v4081_v48 = vadd.f32 %v3997_v59, %v11190_v16  ;;  %v4351_v50 = vmax.f32 %v4335_v32, 0.0  ;;  %v12088_v22 = vld [vmem:[#allocation49_spill] sm:$0xff] }
 0x617   : > { %v4046_v53 = vpop.f32.mrf.mxu1 }
 0x618   : > { %v4300_v43 = vmax.f32 %v4277_v1, %v4278_v21  ;;  %v4082_v3 = vadd.f32 %v4046_v53, %v11192_v28  ;;  %v12087_v1 = vld [vmem:[#allocation48_spill] sm:$0xff] }
 0x619   : > { %v12089_v59 = vmax.f32 %v12087_v1, %v12088_v22  ;;  %v11399_v1 = vld [vmem:[%s11771_s5 + $0x98] sm:$0xff] (%p2207_p1) }
 0x61a   : > { %v4316_v33 = vmax.f32 %v12080_v56, %v4300_v43  ;;  %v7900_v22 = vld [vmem:[%s11771_s5 + $0x58] sm:$0xff] (%p2207_p1) }
 0x61c   : > { %v4336_v41 = vadd.f32 %v11240_v18, %v4316_v33  ;;  %v4195_v20 = vpop.f32.mrf.mxu2 }
 0x61d   : > { %v4279_v12 = vadd.f32 %v4195_v20, %v4081_v48  ;;  %v4244_v55 = vpop.f32.mrf.mxu3  ;;  %v3999_v42 = vpop.f32.mrf.mxu0 }
 0x61e   : > { %v4352_v24 = vmax.f32 %v4336_v41, 0.0  ;;  %v4280_v62 = vadd.f32 %v4244_v55, %v4082_v3  ;;  %v4083_v16 = vadd.f32 %v3999_v42, %v11196_v35  ;;  %v12090_v41 = vld [vmem:[#allocation44_spill] sm:$0xff]  ;;  %v12091_v3 = vld [vmem:[#allocation51_spill] sm:$0xff] }
 0x61f   : > { %v4048_v25 = vpop.f32.mrf.mxu1  ;;  %v12092_v20 = vmax.f32 %v12090_v41, %v12091_v3 }
 0x620   : > { %v8008_v7 = vpack.c.bf16 %v4352_v24, %v4351_v50  ;;  %v4301_v39 = vmax.f32 %v4279_v12, %v4280_v62  ;;  %v4084_v34 = vadd.f32 %v4048_v25, %v11199_v47 }
 0x622   : > { %8035 = vst [vmem:[%s11250_s18 + $0x20] sm:$0xff] %v8008_v7   ;;  %v4317_v5 = vmax.f32 %v12083_v46, %v4301_v39 }
 0x624   : > { %v4197_v28 = vpop.f32.mrf.mxu2  ;;  %v4337_v27 = vadd.f32 %v11240_v18, %v4317_v5  ;;  %v12093_v5 = vld [vmem:[#allocation53_spill] sm:$0xff] }
 0x625   : > { %v4281_v9 = vadd.f32 %v4197_v28, %v4083_v16  ;;  %v4246_v37 = vpop.f32.mrf.mxu3  ;;  %v4002_v40 = vpop.f32.mrf.mxu0  ;;  %v12094_v16 = vld [vmem:[#allocation54_spill] sm:$0xff] }
 0x626   : > { %v4282_v19 = vadd.f32 %v4246_v37, %v4084_v34  ;;  %v4085_v15 = vadd.f32 %v4002_v40, %v11205_v4  ;;  %v4353_v63 = vmax.f32 %v4337_v27, 0.0  ;;  %v12095_v34 = vmax.f32 %v12093_v5, %v12094_v16  ;;  %v12096_v27 = vld [vmem:[#allocation55_spill] sm:$0xff] }
 0x627   : > { %v4051_v13 = vpop.f32.mrf.mxu1  ;;  %v12098_v54 = vmax.f32 %v12096_v27, %v12097_v38  ;;  %v7924_v27 = vld [vmem:[%s11771_s5 + $0x118] sm:$0xff] (%p2207_p1)  ;;  %v7923_v38 = vld [vmem:[%s11771_s5 + $0x110] sm:$0xff] (%p2207_p1) }
 0x628   : > { %v4302_v36 = vmax.f32 %v4281_v9, %v4282_v19  ;;  %v4086_v47 = vadd.f32 %v4051_v13, %v11207_v14 }
 0x62a   : > { %v4318_v8 = vmax.f32 %v12086_v61, %v4302_v36 }
 0x62c   : > { %v4338_v35 = vadd.f32 %v11240_v18, %v4318_v8  ;;  %v4200_v44 = vpop.f32.mrf.mxu2 }
 0x62d   : > { %v4283_v58 = vadd.f32 %v4200_v44, %v4085_v15  ;;  %v4249_v49 = vpop.f32.mrf.mxu3  ;;  %v4004_v57 = vpop.f32.mrf.mxu0  ;;  %v7895_v44 = vld [vmem:[%s11771_s5 + $0x30] sm:$0xff] (%p2207_p1) }
 0x62e   : > { %v4354_v23 = vmax.f32 %v4338_v35, 0.0  ;;  %v4284_v52 = vadd.f32 %v4249_v49, %v4086_v47  ;;  %v4087_v4 = vadd.f32 %v4004_v57, %v11211_v31  ;;  %v7903_v49 = vld [vmem:[%s11771_s5 + $0x70] sm:$0xff] (%p2207_p1)  ;;  %v7894_v57 = vld [vmem:[%s11771_s5 + $0x28] sm:$0xff] (%p2207_p1) }
 0x62f   : > { %v4053_v30 = vpop.f32.mrf.mxu1 }
 0x630   : > { %v8013_v51 = vpack.c.bf16 %v4354_v23, %v4353_v63  ;;  %v4303_v45 = vmax.f32 %v4283_v58, %v4284_v52  ;;  %v4088_v53 = vadd.f32 %v4053_v30, %v11214_v29  ;;  %v11363_v58 = vld [vmem:[%s11771_s5 + $0xb0] sm:$0xff] (%p2207_p1)  ;;  %v11375_v63 = vld [vmem:[%s11771_s5 + $0xa8] sm:$0xff] (%p2207_p1)  ;;  %v7893_v52 = vld [vmem:[%s11771_s5 + $0x20] sm:$0xff] (%p2207_p1) }
 0x631   :  { %v7902_v23 = vld [vmem:[%s11771_s5 + $0x68] sm:$0xff] (%p2207_p1)  ;;  %v11387_v30 = vld [vmem:[%s11771_s5 + $0xa0] sm:$0xff] (%p2207_p1) }
 0x632   : > { %8036 = vst [vmem:[%s11250_s18 + $0x28] sm:$0xff] %v8013_v51   ;;  %v4319_v21 = vmax.f32 %v12089_v59, %v4303_v45  ;;  %v7901_v51 = vld [vmem:[%s11771_s5 + $0x60] sm:$0xff] (%p2207_p1)  ;;  %v7892_v45 = vld [vmem:[%s11771_s5 + $0x18] sm:$0xff] (%p2207_p1)  ;;  %v7891_v59 = vld [vmem:[%s11771_s5 + $0x10] sm:$0xff] (%p2207_p1) }
 0x634   : > { %v4202_v14 = vpop.f32.mrf.mxu2  ;;  %v4339_v48 = vadd.f32 %v11240_v18, %v4319_v21  ;;  %v11411_v21 = vld [vmem:[%s11771_s5 + $0x90] sm:$0xff] (%p2207_p1) }
 0x635   : > { %v4285_v43 = vadd.f32 %v4202_v14, %v4087_v4  ;;  %v4251_v32 = vpop.f32.mrf.mxu3  ;;  %v4007_v6 = vpop.f32.mrf.mxu0  ;;  %v7899_v4 = vld [vmem:[%s11771_s5 + $0x50] sm:$0xff] (%p2207_p1)  ;;  %v11423_v14 = vld [vmem:[%s11771_s5 + $0x88] sm:$0xff] (%p2207_p1) }
 0x636   : > { %v4286_v60 = vadd.f32 %v4251_v32, %v4088_v53  ;;  %v4089_v55 = vadd.f32 %v4007_v6, %v11220_v10  ;;  %v4355_v62 = vmax.f32 %v4339_v48, 0.0  ;;  %v7890_v53 = vld [vmem:[%s11771_s5 + $0x8] sm:$0xff] (%p2207_p1)  ;;  %v7889_v32 = vld [vmem:[%s11771_s5] sm:$0xff] (%p2207_p1) }
 0x637   : > { %v4056_v56 = vpop.f32.mrf.mxu1  ;;  %v11438_v6 = vld [vmem:[%s11771_s5 + $0x80] sm:$0xff] (%p2207_p1) }
 0x638   : > { %v4304_v33 = vmax.f32 %v4285_v43, %v4286_v60  ;;  %v4090_v29 = vadd.f32 %v4056_v56, %v11222_v17  ;;  %v7898_v43 = vld [vmem:[%s11771_s5 + $0x48] sm:$0xff] (%p2207_p1)  ;;  %v7920_v60 = vld [vmem:[%s11771_s5 + $0xf8] sm:$0xff] (%p2207_p1)  ;;  %v7897_v56 = vld [vmem:[%s11771_s5 + $0x40] sm:$0xff] (%p2207_p1) }
 0x63a   : > { %v4320_v12 = vmax.f32 %v12092_v20, %v4304_v33  ;;  %v7919_v20 = vld [vmem:[%s11771_s5 + $0xf0] sm:$0xff] (%p2207_p1) }
 0x63c   : > { %v4340_v31 = vadd.f32 %v11240_v18, %v4320_v12  ;;  %v4205_v42 = vpop.f32.mrf.mxu2  ;;  %v7918_v12 = vld [vmem:[%s11771_s5 + $0xe8] sm:$0xff] (%p2207_p1) }
 0x63d   : > { %v4287_v50 = vadd.f32 %v4205_v42, %v4089_v55  ;;  %v4254_v24 = vpop.f32.mrf.mxu3  ;;  %v4009_v2 = vpop.f32.mrf.mxu0  ;;  %v7917_v55 = vld [vmem:[%s11771_s5 + $0xe0] sm:$0xff] (%p2207_p1) }
 0x63e   : > { %v4356_v25 = vmax.f32 %v4340_v31, 0.0  ;;  %v4288_v7 = vadd.f32 %v4254_v24, %v4090_v29  ;;  %v4091_v28 = vadd.f32 %v4009_v2, %v11226_v0  ;;  %v7896_v0 = vld [vmem:[%s11771_s5 + $0x38] sm:$0xff] (%p2207_p1)  ;;  %v7914_v2 = vld [vmem:[%s11771_s5 + $0xc8] sm:$0xff] (%p2207_p1) }
 0x63f   : > { %v4058_v46 = vpop.f32.mrf.mxu1  ;;  %5042 = vmatpush.bf16.msra.mxu0 (%p2207_p1), %v7896_v0  ;;  %8039 = vmatpush.bf16.msra.mxu3 (%p2207_p1), %v7896_v0  ;;  %v7916_v24 = vld [vmem:[%s11771_s5 + $0xd8] sm:$0xff] (%p2207_p1) }
 0x640   : > { %v8018_v39 = vpack.c.bf16 %v4356_v25, %v4355_v62  ;;  %v4305_v26 = vmax.f32 %v4287_v50, %v4288_v7  ;;  %v4092_v17 = vadd.f32 %v4058_v46, %v11228_v11  ;;  %v11351_v11 = vld [vmem:[%s11771_s5 + $0xb8] sm:$0xff] (%p2207_p1)  ;;  %v7915_v62 = vld [vmem:[%s11771_s5 + $0xd0] sm:$0xff] (%p2207_p1) }
 0x641   :  { %8055 = vmatpush.bf16.msra.mxu2 (%p2207_p1), %v11351_v11 }
 0x642   : > { %8037 = vst [vmem:[%s11250_s18 + $0x30] sm:$0xff] %v8018_v39   ;;  %v4321_v10 = vmax.f32 %v12095_v34, %v4305_v26 }
 0x643   :  { %5043 = vmatpush.bf16.msra.mxu0 (%p2207_p1), %v7895_v44  ;;  %8040 = vmatpush.bf16.msra.mxu3 (%p2207_p1), %v7895_v44 }
 0x644   : > { %v4207_v9 = vpop.f32.mrf.mxu2  ;;  %v4341_v36 = vadd.f32 %v11240_v18, %v4321_v10  ;;  %v7913_v10 = vld [vmem:[%s11771_s5 + $0xc0] sm:$0xff] (%p2207_p1) }
 0x645   : > { %v4289_v37 = vadd.f32 %v4207_v9, %v4091_v28  ;;  %v4256_v40 = vpop.f32.mrf.mxu3  ;;  %8056 = vmatpush.bf16.msra.mxu2 (%p2207_p1), %v11363_v58  ;;  %v7928_v28 = vld [vmem:[%s11771_s5 + $0x138] sm:$0xff] (%p2207_p1) }
 0x646   : > { %v4290_v19 = vadd.f32 %v4256_v40, %v4092_v17  ;;  %v4357_v15 = vmax.f32 %v4341_v36, 0.0  ;;  %v7927_v17 = vld [vmem:[%s11771_s5 + $0x130] sm:$0xff] (%p2207_p1)  ;;  %v7926_v40 = vld [vmem:[%s11771_s5 + $0x128] sm:$0xff] (%p2207_p1)  ;;  %v7925_v36 = vld [vmem:[%s11771_s5 + $0x120] sm:$0xff] (%p2207_p1) }
 0x647   :  { %5044 = vmatpush.bf16.msra.mxu0 (%p2207_p1), %v7894_v57  ;;  %8041 = vmatpush.bf16.msra.mxu3 (%p2207_p1), %v7894_v57 }
 0x648   : > { %v4306_v13 = vmax.f32 %v4289_v37, %v4290_v19 }
 0x649   :  { %8057 = vmatpush.bf16.msra.mxu2 (%p2207_p1), %v11375_v63 }
 0x64a   : > { %v4322_v61 = vmax.f32 %v12098_v54, %v4306_v13 }
 0x64b   :  { %5045 = vmatpush.bf16.msra.mxu0 (%p2207_p1), %v7893_v52  ;;  %8042 = vmatpush.bf16.msra.mxu3 (%p2207_p1), %v7893_v52 }
 0x64c   : > { %v4342_v8 = vadd.f32 %v11240_v18, %v4322_v61  ;;  %v7904_v18 = vld [vmem:[%s11771_s5 + $0x78] sm:$0xff] (%p2207_p1) }
 0x64d   :  { %8047 = vmatpush.bf16.msra.mxu1 (%p2207_p1), %v7904_v18  ;;  %8058 = vmatpush.bf16.msra.mxu2 (%p2207_p1), %v11387_v30 }
 0x64e   : > { %v4358_v35 = vmax.f32 %v4342_v8, 0.0  ;;  %2209 = sbr.rel (!%p2207_p1) target bundleno = 806 (0x326), region = 115  ;;  %v7922_v8 = vld [vmem:[%s11771_s5 + $0x108] sm:$0xff] (%p2207_p1) }
 0x64f   :  { %5046 = vmatpush.bf16.msra.mxu0 (%p2207_p1), %v7892_v45  ;;  %8043 = vmatpush.bf16.msra.mxu3 (%p2207_p1), %v7892_v45 }
 0x650   : > { %v8023_v47 = vpack.c.bf16 %v4358_v35, %v4357_v15 }
 0x651   :  { %8048 = vmatpush.bf16.msra.mxu1 (%p2207_p1), %v7903_v49  ;;  %8059 = vmatpush.bf16.msra.mxu2 (%p2207_p1), %v11399_v1 }
 0x652   : > { %8038 = vst [vmem:[%s11250_s18 + $0x38] sm:$0xff] %v8023_v47   ;;  %v7921_v47 = vld [vmem:[%s11771_s5 + $0x100] sm:$0xff] (%p2207_p1) }
 0x653   :  { %5047 = vmatpush.bf16.msra.mxu0 %v7891_v59  ;;  %8044 = vmatpush.bf16.msra.mxu3 %v7891_v59 }
 0x655   :  { %8049 = vmatpush.bf16.msra.mxu1 %v7902_v23  ;;  %8060 = vmatpush.bf16.msra.mxu2 %v11411_v21 }
 0x657   :  { %5048 = vmatpush.bf16.msra.mxu0 %v7890_v53  ;;  %8045 = vmatpush.bf16.msra.mxu3 %v7890_v53  ;;  %v7933_v53 = vld [vmem:[%s11773_s7 + $0x20] sm:$0xff] }
 0x659   :  { %8050 = vmatpush.bf16.msra.mxu1 %v7901_v51  ;;  %8061 = vmatpush.bf16.msra.mxu2 %v11423_v14  ;;  %v7849_v33 = vld [vmem:[#allocation3] sm:$0xff]  ;;  %v7851_v48 = vld [vmem:[#allocation3 + $0x10] sm:$0xff]  ;;  %v7850_v31 = vld [vmem:[#allocation3 + $0x8] sm:$0xff] }
 0x65a   :  { %v7867_v41 = vld [vmem:[#allocation3 + $0x90] sm:$0xff]  ;;  %v7852_v29 = vld [vmem:[#allocation3 + $0x18] sm:$0xff]  ;;  %v7853_v25 = vld [vmem:[#allocation3 + $0x20] sm:$0xff] }
 0x65b   :  { %5049 = vmatpush.bf16.msra.mxu0 %v7889_v32  ;;  %8046 = vmatpush.bf16.msra.mxu3 %v7889_v32  ;;  %v7859_v3 = vld [vmem:[#allocation3 + $0x50] sm:$0xff]  ;;  %v7868_v42 = vld [vmem:[#allocation3 + $0x98] sm:$0xff]  ;;  %v7857_v7 = vld [vmem:[#allocation3 + $0x40] sm:$0xff] }
 0x65c   :  { %v7860_v50 = vld [vmem:[#allocation3 + $0x58] sm:$0xff]  ;;  %v7869_v39 = vld [vmem:[#allocation3 + $0xa0] sm:$0xff]  ;;  %v7854_v46 = vld [vmem:[#allocation3 + $0x28] sm:$0xff] }
 0x65d   :  { %8051 = vmatpush.bf16.msra.mxu1 %v7900_v22  ;;  %8062 = vmatpush.bf16.msra.mxu2 %v11438_v6  ;;  %v7861_v26 = vld [vmem:[#allocation3 + $0x60] sm:$0xff]  ;;  %v7858_v5 = vld [vmem:[#allocation3 + $0x48] sm:$0xff]  ;;  %v7855_v9 = vld [vmem:[#allocation3 + $0x30] sm:$0xff] }
 0x65e   :  { %5050 = vmatmul.bf16.vlgmr.msra.gmra.mxu0 %v7849_v33  ;;  %5060 = vmatmul.bf16.vlgmr.msra.gmra.mxu3 %v7851_v48  ;;  %v7870_v16 = vld [vmem:[#allocation3 + $0xa8] sm:$0xff]  ;;  %v7865_v37 = vld [vmem:[#allocation3 + $0x80] sm:$0xff]  ;;  %v7871_v19 = vld [vmem:[#allocation3 + $0xb0] sm:$0xff] }
 0x65f   :  { %5189 = vmatpush.bf16.msrb.mxu3 %v7920_v60  ;;  %5091 = vmatpush.bf16.msrb.mxu0 %v7904_v18  ;;  %v7862_v34 = vld [vmem:[#allocation3 + $0x68] sm:$0xff]  ;;  %v7863_v13 = vld [vmem:[#allocation3 + $0x70] sm:$0xff]  ;;  %v7856_v54 = vld [vmem:[#allocation3 + $0x38] sm:$0xff] }
 0x660   :  { %5158 = vmatmul.bf16.vlgmr.msra.gmra.mxu2 %v7867_v41  ;;  %v7866_v61 = vld [vmem:[#allocation3 + $0x88] sm:$0xff]  ;;  %v7872_v15 = vld [vmem:[#allocation3 + $0xb8] sm:$0xff]  ;;  %v7873_v0 = vld [vmem:[#allocation3 + $0xc0] sm:$0xff] }
 0x661   :  { %8052 = vmatpush.bf16.msra.mxu1 %v7899_v4  ;;  %v7864_v35 = vld [vmem:[#allocation3 + $0x78] sm:$0xff]  ;;  %v7874_v18 = vld [vmem:[#allocation3 + $0xc8] sm:$0xff]  ;;  %v7883_v57 = vld [vmem:[#allocation3 + $0x110] sm:$0xff] }
 0x662   :  { %v7882_v44 = vld [vmem:[#allocation3 + $0x108] sm:$0xff]  ;;  %v7876_v45 = vld [vmem:[#allocation3 + $0xd8] sm:$0xff]  ;;  %v7877_v60 = vld [vmem:[#allocation3 + $0xe0] sm:$0xff] }
 0x663   :  { %5092 = vmatpush.bf16.msrb.mxu0 %v7903_v49  ;;  %5190 = vmatpush.bf16.msrb.mxu3 %v7919_v20  ;;  %v7875_v49 = vld [vmem:[#allocation3 + $0xd0] sm:$0xff]  ;;  %v7932_v41 = vld [vmem:[%s11773_s7 + $0x18] sm:$0xff] }
 0x665   :  { %8053 = vmatpush.bf16.msra.mxu1 %v7898_v43 }
 0x667   :  { %5093 = vmatpush.bf16.msrb.mxu0 %v7902_v23  ;;  %5191 = vmatpush.bf16.msrb.mxu3 %v7918_v12  ;;  %v7935_v23 = vld [vmem:[%s11773_s7 + $0x30] sm:$0xff] }
 0x669   :  { %8054 = vmatpush.bf16.msra.mxu1 %v7897_v56 }
 0x66b   :  { %5094 = vmatpush.bf16.msrb.mxu0 %v7901_v51  ;;  %5192 = vmatpush.bf16.msrb.mxu3 %v7917_v55  ;;  %v7878_v55 = vld [vmem:[#allocation3 + $0xe8] sm:$0xff] }
 0x66c   :  { %5109 = vmatmul.bf16.vlgmr.msra.gmra.mxu1 %v7859_v3 }
 0x66e   :  { %5055 = vmatmul.bf16.gmra.mxu0 %v7850_v31  ;;  %5065 = vmatmul.bf16.gmra.mxu3 %v7852_v29  ;;  %v7886_v31 = vld [vmem:[#allocation3 + $0x128] sm:$0xff] }
 0x66f   :  { %5095 = vmatpush.bf16.msrb.mxu0 %v7900_v22  ;;  %5193 = vmatpush.bf16.msrb.mxu3 %v7916_v24  ;;  %v7934_v22 = vld [vmem:[%s11773_s7 + $0x28] sm:$0xff] }
 0x670   :  { %5163 = vmatmul.bf16.gmra.mxu2 %v7868_v42 }
 0x673   :  { %5096 = vmatpush.bf16.msrb.mxu0 %v7899_v4  ;;  %5194 = vmatpush.bf16.msrb.mxu3 %v7915_v62 }
 0x677   :  { %5097 = vmatpush.bf16.msrb.mxu0 %v7898_v43  ;;  %5195 = vmatpush.bf16.msrb.mxu3 %v7914_v2 }
 0x67b   :  { %5098 = vmatpush.bf16.msrb.mxu0 %v7897_v56  ;;  %5196 = vmatpush.bf16.msrb.mxu3 %v7913_v10  ;;  %v7880_v10 = vld [vmem:[#allocation3 + $0xf8] sm:$0xff] }
 0x67c   :  { %5114 = vmatmul.bf16.gmra.mxu1 %v7860_v50  ;;  %v7931_v50 = vld [vmem:[%s11773_s7 + $0x10] sm:$0xff] }
 0x67e   :  { %5070 = vmatmul.bf16.gmra.mxu3 %v7853_v25  ;;  %5099 = vmatmul.bf16.vlgmr.msrb.gmra.mxu0 %v7857_v7  ;;  %v7879_v7 = vld [vmem:[#allocation3 + $0xf0] sm:$0xff] }
 0x67f   :  { %5140 = vmatpush.bf16.msra.mxu0 %v11351_v11  ;;  %v7881_v11 = vld [vmem:[#allocation3 + $0x100] sm:$0xff] }
 0x680   :  { %5168 = vmatmul.bf16.gmra.mxu2 %v7869_v39  ;;  %v7887_v39 = vld [vmem:[#allocation3 + $0x130] sm:$0xff] }
 0x683   :  { %5141 = vmatpush.bf16.msra.mxu0 %v11363_v58  ;;  %v7936_v58 = vld [vmem:[%s11773_s7 + $0x38] sm:$0xff] }
 0x684   :  { %5379 = vmatpush.bf16.msrb.mxu1 %v7936_v58 }
 0x687   :  { %5142 = vmatpush.bf16.msra.mxu0 %v11375_v63 }
 0x688   :  { %5380 = vmatpush.bf16.msrb.mxu1 %v7935_v23 }
 0x68b   :  { %5143 = vmatpush.bf16.msra.mxu0 %v11387_v30 }
 0x68c   :  { %5119 = vmatmul.bf16.gmra.mxu1 %v7861_v26  ;;  %v7930_v26 = vld [vmem:[%s11773_s7 + $0x8] sm:$0xff] }
 0x68d   :  { %5381 = vmatpush.bf16.msrb.mxu1 %v7934_v22 }
 0x68e   :  { %5075 = vmatmul.bf16.gmra.mxu3 %v7854_v46  ;;  %5104 = vmatmul.bf16.gmra.mxu0 %v7858_v5 }
 0x68f   :  { %5144 = vmatpush.bf16.msra.mxu0 %v11399_v1  ;;  %v7884_v1 = vld [vmem:[#allocation3 + $0x118] sm:$0xff] }
 0x690   :  { %5173 = vmatmul.bf16.gmra.mxu2 %v7870_v16  ;;  %v7929_v16 = vld [vmem:[%s11773_s7] sm:$0xff] }
 0x691   :  { %5382 = vmatpush.bf16.msrb.mxu1 %v7933_v53 }
 0x693   :  { %5145 = vmatpush.bf16.msra.mxu0 %v11411_v21 }
 0x695   :  { %5383 = vmatpush.bf16.msrb.mxu1 %v7932_v41 }
 0x697   :  { %5146 = vmatpush.bf16.msra.mxu0 %v11423_v14  ;;  %v11522_v14 = vld [vmem:[%s11772_s6] ss:$0 sm:$0xff] }
 0x699   :  { %5384 = vmatpush.bf16.msrb.mxu1 %v7931_v50 }
 0x69b   :  { %5147 = vmatpush.bf16.msra.mxu0 %v11438_v6  ;;  %v7885_v6 = vld [vmem:[#allocation3 + $0x120] sm:$0xff] }
 0x69c   :  { %5124 = vmatmul.bf16.gmra.mxu1 %v7862_v34 }
 0x69d   :  { %5385 = vmatpush.bf16.msrb.mxu1 %v7930_v26 }
 0x69e   :  { %5080 = vmatmul.bf16.gmra.mxu3 %v7855_v9  ;;  %5148 = vmatmul.bf16.vlgmr.msra.gmra.mxu0 %v7865_v37 }
 0x69f   :  { %5238 = vmatpush.bf16.msrb.mxu0 %v7928_v28  ;;  %v7888_v28 = vld [vmem:[#allocation3 + $0x138] sm:$0xff] }
 0x6a0   :  { %5178 = vmatmul.bf16.gmra.mxu2 %v7871_v19 }
 0x6a1   :  { %5386 = vmatpush.bf16.msrb.mxu1 %v7929_v16 }
 0x6a3   :  { %5239 = vmatpush.bf16.msrb.mxu0 %v7927_v17 }
 0x6a7   :  { %5240 = vmatpush.bf16.msrb.mxu0 %v7926_v40 }
 0x6ab   :  { %5241 = vmatpush.bf16.msrb.mxu0 %v7925_v36 }
 0x6ac   :  { %5129 = vmatmul.bf16.gmra.mxu1 %v7863_v13 }
 0x6ae   :  { %5085 = vmatmul.bf16.gmra.mxu3 %v7856_v54  ;;  %5153 = vmatmul.bf16.gmra.mxu0 %v7866_v61 }
 0x6af   :  { %5242 = vmatpush.bf16.msrb.mxu0 %v7924_v27 }
 0x6b0   :  { %5183 = vmatmul.bf16.gmra.mxu2 %v7872_v15 }
 0x6b3   :  { %5243 = vmatpush.bf16.msrb.mxu0 %v7923_v38 }
 0x6b7   :  { %5244 = vmatpush.bf16.msrb.mxu0 %v7922_v8 }
 0x6bb   :  { %5245 = vmatpush.bf16.msrb.mxu0 %v7921_v47 }
 0x6bc   :  { %5134 = vmatmul.bf16.gmra.mxu1 %v7864_v35 }
 0x6be   :  { %5197 = vmatmul.bf16.vlgmr.msrb.gmra.mxu3 %v7873_v0  ;;  %5246 = vmatmul.bf16.vlgmr.msrb.gmra.mxu0 %v7881_v11 }
 0x6ce   :  { %5202 = vmatmul.bf16.gmra.mxu3 %v7874_v18  ;;  %5251 = vmatmul.bf16.gmra.mxu0 %v7882_v44 }
 0x6db   :  { %v5051_v63 = vpop.f32.mrf.mxu0 }
 0x6dc   :  { %v5052_v32 = vadd.f32 %v11522_v14, %v5051_v63 }
 0x6de   :  { %5207 = vmatmul.bf16.gmra.mxu3 %v7875_v49  ;;  %5256 = vmatmul.bf16.gmra.mxu0 %v7883_v57 }
 0x6e1   :  { %v11503_v52 = vpop.f32.mrf.mxu3 }
 0x6e3   :  { %v11505_v30 = vpop.f32.mrf.mxu0  ;;  %v5159_v15 = vpop.f32.mrf.mxu2 }
 0x6e4   :  { %v5054_v38 = vadd.f32 %v11522_v14, %v11505_v30 }
 0x6e9   :  { %v11507_v51 = vpop.f32.mrf.mxu3  ;;  %v5110_v36 = vpop.f32.mrf.mxu1 }
 0x6ea   :  { %v5064_v50 = vadd.f32 %v11522_v14, %v11507_v51 }
 0x6eb   :  { %v5056_v59 = vpop.f32.mrf.mxu0  ;;  %v5161_v23 = vpop.f32.mrf.mxu2 }
 0x6ec   :  { %v5057_v12 = vadd.f32 %v11522_v14, %v5056_v59 }
 0x6ee   :  { %5212 = vmatmul.bf16.gmra.mxu3 %v7876_v45  ;;  %5261 = vmatmul.bf16.gmra.mxu0 %v7884_v1 }
 0x6f1   :  { %v11512_v21 = vpop.f32.mrf.mxu3  ;;  %v5112_v44 = vpop.f32.mrf.mxu1 }
 0x6f3   :  { %v11514_v4 = vpop.f32.mrf.mxu0  ;;  %v5164_v41 = vpop.f32.mrf.mxu2 }
 0x6f4   :  { %v5059_v30 = vadd.f32 %v11522_v14, %v11514_v4  ;;  %v7944_v4 = vld [vmem:[%s11775_s9 + $0x38] sm:$0xff] }
 0x6f5   :  { %5520 = vmatpush.bf16.msrb.mxu2 %v7944_v4 }
 0x6f9   :  { %v11524_v43 = vpop.f32.mrf.mxu3  ;;  %v5115_v59 = vpop.f32.mrf.mxu1 }
 0x6fb   :  { %v5100_v56 = vpop.f32.mrf.mxu0 }
 0x6fc   :  { %v5101_v33 = vadd.f32 %v5100_v56, %v5052_v32 }
 0x6fe   :  { %5217 = vmatmul.bf16.gmra.mxu3 %v7877_v60  ;;  %5266 = vmatmul.bf16.gmra.mxu0 %v7885_v6 }
 0x701   :  { %v11527_v48 = vpop.f32.mrf.mxu3 }
 0x703   :  { %v5102_v3 = vpop.f32.mrf.mxu0 }
 0x704   :  { %v5103_v61 = vadd.f32 %v5102_v3, %v5054_v38 }
 0x709   :  { %v11532_v20 = vpop.f32.mrf.mxu3 }
 0x70b   :  { %v5105_v29 = vpop.f32.mrf.mxu0 }
 0x70c   :  { %v5106_v42 = vadd.f32 %v5105_v29, %v5057_v12  ;;  %v5062_v12 = vadd.f32 %v11522_v14, %v11503_v52  ;;  %v5166_v52 = vpop.f32.mrf.mxu2 }
 0x70e   :  { %5222 = vmatmul.bf16.gmra.mxu3 %v7878_v55  ;;  %5271 = vmatmul.bf16.gmra.mxu0 %v7886_v31 }
 0x711   :  { %v11538_v24 = vpop.f32.mrf.mxu3 }
 0x713   :  { %v5107_v62 = vpop.f32.mrf.mxu0 }
 0x714   :  { %v5108_v53 = vadd.f32 %v5107_v62, %v5059_v30  ;;  %v5117_v62 = vpop.f32.mrf.mxu1 }
 0x719   :  { %v11540_v25 = vpop.f32.mrf.mxu3 }
 0x71b   :  { %v5149_v2 = vpop.f32.mrf.mxu0 }
 0x71c   :  { %v5150_v54 = vadd.f32 %v5149_v2, %v5101_v33 }
 0x71e   :  { %5227 = vmatmul.bf16.gmra.mxu3 %v7879_v7  ;;  %5276 = vmatmul.bf16.gmra.mxu0 %v7887_v39 }
 0x721   :  { %v11545_v46 = vpop.f32.mrf.mxu3 }
 0x723   :  { %v5151_v5 = vpop.f32.mrf.mxu0 }
 0x724   :  { %v5152_v35 = vadd.f32 %v5151_v5, %v5103_v61  ;;  %v5113_v5 = vadd.f32 %v5112_v44, %v5064_v50  ;;  %v5169_v61 = vpop.f32.mrf.mxu2 }
 0x729   :  { %v11550_v34 = vpop.f32.mrf.mxu3 }
 0x72b   :  { %v5154_v17 = vpop.f32.mrf.mxu0 }
 0x72c   :  { %v5155_v22 = vadd.f32 %v5154_v17, %v5106_v42  ;;  %v5111_v42 = vadd.f32 %v5110_v36, %v5062_v12  ;;  %v5120_v17 = vpop.f32.mrf.mxu1  ;;  %v5067_v36 = vadd.f32 %v11522_v14, %v11512_v21 }
 0x72e   :  { %5232 = vmatmul.bf16.gmra.mxu3 %v7880_v10  ;;  %5281 = vmatmul.bf16.gmra.mxu0 %v7888_v28  ;;  %v5160_v2 = vadd.f32 %v5159_v15, %v5111_v42  ;;  %v5162_v10 = vadd.f32 %v5161_v23, %v5113_v5  ;;  %v5069_v15 = vadd.f32 %v11522_v14, %v11524_v43  ;;  %v7940_v5 = vld [vmem:[%s11775_s9 + $0x18] sm:$0xff] }
 0x731   :  { %v11552_v9 = vpop.f32.mrf.mxu3 }
 0x733   :  { %v5156_v37 = vpop.f32.mrf.mxu0 }
 0x734   :  { %v5157_v60 = vadd.f32 %v5156_v37, %v5108_v53  ;;  %v5122_v21 = vpop.f32.mrf.mxu1 }
 0x739   :  { %v11554_v40 = vpop.f32.mrf.mxu3 }
 0x73b   :  { %v5247_v19 = vpop.f32.mrf.mxu0 }
 0x741   :  { %v5198_v13 = vpop.f32.mrf.mxu3 }
 0x742   :  { %v5199_v8 = vadd.f32 %v5198_v13, %v5150_v54  ;;  %v7943_v54 = vld [vmem:[%s11775_s9 + $0x30] sm:$0xff] }
 0x743   :  { %v5249_v27 = vpop.f32.mrf.mxu0  ;;  %5521 = vmatpush.bf16.msrb.mxu2 %v7943_v54 }
 0x744   :  { %v5248_v0 = vadd.f32 %v5247_v19, %v5199_v8  ;;  %v5116_v8 = vadd.f32 %v5115_v59, %v5067_v36 }
 0x746   :  { %v5287_v49 = vmax.f32 %v5248_v0, 0.0 }
 0x749   :  { %v5200_v47 = vpop.f32.mrf.mxu3 }
 0x74a   :  { %v5201_v11 = vadd.f32 %v5200_v47, %v5152_v35 }
 0x74b   :  { %v5252_v18 = vpop.f32.mrf.mxu0 }
 0x74c   :  { %v5250_v58 = vadd.f32 %v5249_v27, %v5201_v11  ;;  %v5165_v11 = vadd.f32 %v5164_v41, %v5116_v8 }
 0x74e   :  { %v5288_v57 = vmax.f32 %v5250_v58, 0.0  ;;  %v7942_v58 = vld [vmem:[%s11775_s9 + $0x28] sm:$0xff] }
 0x74f   :  { %5522 = vmatpush.bf16.msrb.mxu2 %v7942_v58 }
 0x750   :  { %v5303_v63 = vpack.c.bf16 %v5288_v57, %v5287_v49  ;;  %v5171_v57 = vpop.f32.mrf.mxu2 }
 0x751   :  { %v5203_v45 = vpop.f32.mrf.mxu3 }
 0x752   :  { %5387 = vmatmul.bf16.vlgmr.msrb.gmra.mxu1 %v5303_v63  ;;  %v5204_v32 = vadd.f32 %v5203_v45, %v5155_v22  ;;  %v5125_v22 = vpop.f32.mrf.mxu1 }
 0x753   :  { %v5254_v1 = vpop.f32.mrf.mxu0 }
 0x754   :  { %v5253_v56 = vadd.f32 %v5252_v18, %v5204_v32  ;;  %v5118_v18 = vadd.f32 %v5117_v62, %v5069_v15 }
 0x756   :  { %v5289_v31 = vmax.f32 %v5253_v56, 0.0  ;;  %v5167_v49 = vadd.f32 %v5166_v52, %v5118_v18  ;;  %v5084_v18 = vadd.f32 %v11522_v14, %v11550_v34 }
 0x759   :  { %v5205_v6 = vpop.f32.mrf.mxu3 }
 0x75a   :  { %v5206_v33 = vadd.f32 %v5205_v6, %v5157_v60  ;;  %v5074_v60 = vadd.f32 %v11522_v14, %v11532_v20  ;;  %v5077_v20 = vadd.f32 %v11522_v14, %v11538_v24 }
 0x75b   :  { %v5257_v3 = vpop.f32.mrf.mxu0 }
 0x75c   :  { %v5255_v55 = vadd.f32 %v5254_v1, %v5206_v33  ;;  %v5072_v1 = vadd.f32 %v11522_v14, %v11527_v48  ;;  %v5174_v33 = vpop.f32.mrf.mxu2  ;;  %v5123_v12 = vadd.f32 %v5122_v21, %v5074_v60  ;;  %v7941_v48 = vld [vmem:[%s11775_s9 + $0x20] sm:$0xff]  ;;  %v5126_v52 = vadd.f32 %v5125_v22, %v5077_v20 }
 0x75d   :  { %5523 = vmatpush.bf16.msrb.mxu2 %v7941_v48 }
 0x75e   :  { %v5290_v29 = vmax.f32 %v5255_v55, 0.0  ;;  %v5121_v32 = vadd.f32 %v5120_v17, %v5072_v1 }
 0x760   :  { %v5304_v7 = vpack.c.bf16 %v5290_v29, %v5289_v31  ;;  %v5172_v31 = vadd.f32 %v5171_v57, %v5123_v12  ;;  %v5127_v29 = vpop.f32.mrf.mxu1 }
 0x761   :  { %v5208_v39 = vpop.f32.mrf.mxu3  ;;  %5524 = vmatpush.bf16.msrb.mxu2 %v7940_v5 }
 0x762   :  { %5392 = vmatmul.bf16.gmra.mxu1 %v5304_v7  ;;  %v5209_v16 = vadd.f32 %v5208_v39, %v5160_v2 }
 0x763   :  { %v5259_v26 = vpop.f32.mrf.mxu0 }
 0x764   :  { %v5258_v37 = vadd.f32 %v5257_v3, %v5209_v16  ;;  %v5170_v3 = vadd.f32 %v5169_v61, %v5121_v32  ;;  %v5176_v39 = vpop.f32.mrf.mxu2  ;;  %v5079_v16 = vadd.f32 %v11522_v14, %v11540_v25  ;;  %v5082_v61 = vadd.f32 %v11522_v14, %v11545_v46  ;;  %v7938_v46 = vld [vmem:[%s11775_s9 + $0x8] sm:$0xff] }
 0x766   :  { %v5291_v27 = vmax.f32 %v5258_v37, 0.0  ;;  %v5128_v24 = vadd.f32 %v5127_v29, %v5079_v16 }
 0x768   :  { %v5130_v17 = vpop.f32.mrf.mxu1 }
 0x769   :  { %v5210_v28 = vpop.f32.mrf.mxu3 }
 0x76a   :  { %v5211_v19 = vadd.f32 %v5210_v28, %v5162_v10 }
 0x76b   :  { %v5262_v13 = vpop.f32.mrf.mxu0 }
 0x76c   :  { %v5260_v51 = vadd.f32 %v5259_v26, %v5211_v19  ;;  %v5175_v19 = vadd.f32 %v5174_v33, %v5126_v52  ;;  %v5179_v36 = vpop.f32.mrf.mxu2 }
 0x76e   :  { %v5292_v38 = vmax.f32 %v5260_v51, 0.0  ;;  %v5177_v51 = vadd.f32 %v5176_v39, %v5128_v24 }
 0x770   :  { %v5305_v35 = vpack.c.bf16 %v5292_v38, %v5291_v27  ;;  %v5132_v8 = vpop.f32.mrf.mxu1 }
 0x771   :  { %v5213_v47 = vpop.f32.mrf.mxu3  ;;  %v5133_v57 = vadd.f32 %v5132_v8, %v5084_v18 }
 0x772   :  { %5397 = vmatmul.bf16.gmra.mxu1 %v5305_v35  ;;  %v5214_v44 = vadd.f32 %v5213_v47, %v5165_v11  ;;  %v5131_v11 = vadd.f32 %v5130_v17, %v5082_v61 }
 0x773   :  { %v5264_v0 = vpop.f32.mrf.mxu0 }
 0x774   :  { %v5263_v23 = vadd.f32 %v5262_v13, %v5214_v44  ;;  %v5181_v44 = vpop.f32.mrf.mxu2 }
 0x776   :  { %v5293_v59 = vmax.f32 %v5263_v23, 0.0 }
 0x779   :  { %v5215_v63 = vpop.f32.mrf.mxu3 }
 0x77a   :  { %v5216_v45 = vadd.f32 %v5215_v63, %v5167_v49  ;;  %v5180_v49 = vadd.f32 %v5179_v36, %v5131_v11  ;;  %v5135_v63 = vpop.f32.mrf.mxu1 }
 0x77b   :  { %v5267_v43 = vpop.f32.mrf.mxu0 }
 0x77c   :  { %v5265_v30 = vadd.f32 %v5264_v0, %v5216_v45  ;;  %v7939_v0 = vld [vmem:[%s11775_s9 + $0x10] sm:$0xff]  ;;  %v5184_v34 = vpop.f32.mrf.mxu2 }
 0x77d   :  { %5525 = vmatpush.bf16.msrb.mxu2 %v7939_v0 }
 0x77e   :  { %v5294_v53 = vmax.f32 %v5265_v30, 0.0 }
 0x780   :  { %v5306_v6 = vpack.c.bf16 %v5294_v53, %v5293_v59  ;;  %v5087_v59 = vadd.f32 %v11522_v14, %v11552_v9 }
 0x781   :  { %v5218_v56 = vpop.f32.mrf.mxu3  ;;  %5526 = vmatpush.bf16.msrb.mxu2 %v7938_v46 }
 0x782   :  { %5402 = vmatmul.bf16.gmra.mxu1 %v5306_v6  ;;  %v5219_v55 = vadd.f32 %v5218_v56, %v5170_v3  ;;  %v5136_v6 = vadd.f32 %v5135_v63, %v5087_v59  ;;  %v5089_v56 = vadd.f32 %v11522_v14, %v11554_v40  ;;  %v5137_v33 = vpop.f32.mrf.mxu1 }
 0x783   :  { %v5269_v41 = vpop.f32.mrf.mxu0 }
 0x784   :  { %v5268_v42 = vadd.f32 %v5267_v43, %v5219_v55  ;;  %v5182_v43 = vadd.f32 %v5181_v44, %v5133_v57  ;;  %v7937_v55 = vld [vmem:[%s11775_s9] sm:$0xff]  ;;  %v5185_v48 = vadd.f32 %v5184_v34, %v5136_v6  ;;  %v5186_v9 = vpop.f32.mrf.mxu2 }
 0x785   :  { %5527 = vmatpush.bf16.msrb.mxu2 %v7937_v55 }
 0x786   :  { %v5295_v26 = vmax.f32 %v5268_v42, 0.0 }
 0x789   :  { %v5220_v4 = vpop.f32.mrf.mxu3 }
 0x78a   :  { %v5221_v50 = vadd.f32 %v5220_v4, %v5172_v31  ;;  %v5138_v31 = vadd.f32 %v5137_v33, %v5089_v56 }
 0x78b   :  { %v5272_v62 = vpop.f32.mrf.mxu0 }
 0x78c   :  { %v5270_v7 = vadd.f32 %v5269_v41, %v5221_v50  ;;  %v5187_v4 = vadd.f32 %v5186_v9, %v5138_v31 }
 0x78e   :  { %v5296_v2 = vmax.f32 %v5270_v7, 0.0 }
 0x790   :  { %v5307_v10 = vpack.c.bf16 %v5296_v2, %v5295_v26  ;;  %v8098_v2 = vld [vmem:[%s11774_s8] ss:$0 sm:$0xff] }
 0x791   :  { %v5223_v28 = vpop.f32.mrf.mxu3 }
 0x792   :  { %5407 = vmatmul.bf16.gmra.mxu1 %v5307_v10  ;;  %v5224_v13 = vadd.f32 %v5223_v28, %v5175_v19 }
 0x793   :  { %v5274_v37 = vpop.f32.mrf.mxu0 }
 0x794   :  { %v5273_v38 = vadd.f32 %v5272_v62, %v5224_v13 }
 0x796   :  { %v5297_v35 = vmax.f32 %v5273_v38, 0.0 }
 0x799   :  { %v5225_v27 = vpop.f32.mrf.mxu3 }
 0x79a   :  { %v5226_v54 = vadd.f32 %v5225_v27, %v5177_v51 }
 0x79b   :  { %v5277_v25 = vpop.f32.mrf.mxu0 }
 0x79c   :  { %v5275_v15 = vadd.f32 %v5274_v37, %v5226_v54 }
 0x79e   :  { %v5298_v47 = vmax.f32 %v5275_v15, 0.0 }
 0x7a0   :  { %v5308_v21 = vpack.c.bf16 %v5298_v47, %v5297_v35 }
 0x7a1   :  { %v5228_v58 = vpop.f32.mrf.mxu3 }
 0x7a2   :  { %5412 = vmatmul.bf16.gmra.mxu1 %v5308_v21  ;;  %v5229_v23 = vadd.f32 %v5228_v58, %v5180_v49 }
 0x7a3   :  { %v5279_v45 = vpop.f32.mrf.mxu0 }
 0x7a4   :  { %v5278_v30 = vadd.f32 %v5277_v25, %v5229_v23 }
 0x7a6   :  { %v5299_v32 = vmax.f32 %v5278_v30, 0.0 }
 0x7a9   :  { %v5230_v1 = vpop.f32.mrf.mxu3 }
 0x7aa   :  { %v5231_v22 = vadd.f32 %v5230_v1, %v5182_v43 }
 0x7ab   :  { %v5282_v3 = vpop.f32.mrf.mxu0 }
 0x7ac   :  { %v5280_v53 = vadd.f32 %v5279_v45, %v5231_v22 }
 0x7ae   :  { %v5300_v60 = vmax.f32 %v5280_v53, 0.0 }
 0x7b0   :  { %v5309_v41 = vpack.c.bf16 %v5300_v60, %v5299_v32 }
 0x7b1   :  { %v5233_v12 = vpop.f32.mrf.mxu3 }
 0x7b2   :  { %5417 = vmatmul.bf16.gmra.mxu1 %v5309_v41  ;;  %v5234_v29 = vadd.f32 %v5233_v12, %v5185_v48 }
 0x7b3   :  { %v5284_v20 = vpop.f32.mrf.mxu0 }
 0x7b4   :  { %v5283_v50 = vadd.f32 %v5282_v3, %v5234_v29 }
 0x7b6   :  { %v5301_v40 = vmax.f32 %v5283_v50, 0.0  ;;  %v8099_v50 = vld [vmem:[%s11776_s10] ss:$0 sm:$0xff] }
 0x7b9   :  { %v5235_v42 = vpop.f32.mrf.mxu3 }
 0x7ba   :  { %v5236_v62 = vadd.f32 %v5235_v42, %v5187_v4 }
 0x7bc   :  { %v5285_v14 = vadd.f32 %v5284_v20, %v5236_v62 }
 0x7be   :  { %v5302_v7 = vmax.f32 %v5285_v14, 0.0 }
 0x7c0   :  { %v5310_v39 = vpack.c.bf16 %v5302_v7, %v5301_v40 }
 0x7c2   :  { %5422 = vmatmul.bf16.gmra.mxu1 %v5310_v39 }
 0x7cf   :  { %v5388_v26 = vpop.f32.mrf.mxu1 }
 0x7d0   :  { %v5389_v5 = vadd.f32 %v8098_v2, %v5388_v26 }
 0x7d2   :  { %v5428_v10 = vmax.f32 %v5389_v5, 0.0 }
 0x7d7   :  { %v5390_v52 = vpop.f32.mrf.mxu1 }
 0x7d8   :  { %v5391_v16 = vadd.f32 %v8098_v2, %v5390_v52 }
 0x7da   :  { %v5429_v28 = vmax.f32 %v5391_v16, 0.0 }
 0x7dc   :  { %v5444_v17 = vpack.c.bf16 %v5429_v28, %v5428_v10 }
 0x7de   :  { %5528 = vmatmul.bf16.vlgmr.msrb.gmra.mxu2 %v5444_v17 }
 0x7df   :  { %v5393_v37 = vpop.f32.mrf.mxu1 }
 0x7e0   :  { %v5394_v19 = vadd.f32 %v8098_v2, %v5393_v37 }
 0x7e2   :  { %v5430_v36 = vmax.f32 %v5394_v19, 0.0 }
 0x7e7   :  { %v5395_v24 = vpop.f32.mrf.mxu1 }
 0x7e8   :  { %v5396_v13 = vadd.f32 %v8098_v2, %v5395_v24 }
 0x7ea   :  { %v5431_v51 = vmax.f32 %v5396_v13, 0.0 }
 0x7ec   :  { %v5445_v27 = vpack.c.bf16 %v5431_v51, %v5430_v36 }
 0x7ee   :  { %5533 = vmatmul.bf16.gmra.mxu2 %v5445_v27 }
 0x7ef   :  { %v5398_v38 = vpop.f32.mrf.mxu1 }
 0x7f0   :  { %v5399_v54 = vadd.f32 %v8098_v2, %v5398_v38 }
 0x7f2   :  { %v5432_v15 = vmax.f32 %v5399_v54, 0.0 }
 0x7f7   :  { %v5400_v61 = vpop.f32.mrf.mxu1 }
 0x7f8   :  { %v5401_v8 = vadd.f32 %v8098_v2, %v5400_v61 }
 0x7fa   :  { %v5433_v25 = vmax.f32 %v5401_v8, 0.0 }
 0x7fc   :  { %v5446_v35 = vpack.c.bf16 %v5433_v25, %v5432_v15 }
 0x7fe   :  { %5538 = vmatmul.bf16.gmra.mxu2 %v5446_v35 }
 0x7ff   :  { %v5403_v47 = vpop.f32.mrf.mxu1 }
 0x800   :  { %v5404_v0 = vadd.f32 %v8098_v2, %v5403_v47 }
 0x802   :  { %v5434_v21 = vmax.f32 %v5404_v0, 0.0 }
 0x807   :  { %v5405_v11 = vpop.f32.mrf.mxu1 }
 0x808   :  { %v5406_v18 = vadd.f32 %v8098_v2, %v5405_v11 }
 0x80a   :  { %v5435_v44 = vmax.f32 %v5406_v18, 0.0 }
 0x80c   :  { %v5447_v58 = vpack.c.bf16 %v5435_v44, %v5434_v21 }
 0x80e   :  { %5543 = vmatmul.bf16.gmra.mxu2 %v5447_v58 }
 0x80f   :  { %v5408_v46 = vpop.f32.mrf.mxu1 }
 0x810   :  { %v5409_v49 = vadd.f32 %v8098_v2, %v5408_v46 }
 0x812   :  { %v5436_v23 = vmax.f32 %v5409_v49, 0.0 }
 0x817   :  { %v5410_v57 = vpop.f32.mrf.mxu1 }
 0x818   :  { %v5411_v63 = vadd.f32 %v8098_v2, %v5410_v57 }
 0x81a   :  { %v5437_v45 = vmax.f32 %v5411_v63, 0.0 }
 0x81c   :  { %v5448_v43 = vpack.c.bf16 %v5437_v45, %v5436_v23 }
 0x81e   :  { %5548 = vmatmul.bf16.gmra.mxu2 %v5448_v43 }
 0x81f   :  { %v5413_v1 = vpop.f32.mrf.mxu1 }
 0x820   :  { %v5414_v30 = vadd.f32 %v8098_v2, %v5413_v1 }
 0x822   :  { %v5438_v59 = vmax.f32 %v5414_v30, 0.0 }
 0x827   :  { %v5415_v22 = vpop.f32.mrf.mxu1 }
 0x828   :  { %v5416_v34 = vadd.f32 %v8098_v2, %v5415_v22 }
 0x82a   :  { %v5439_v53 = vmax.f32 %v5416_v34, 0.0 }
 0x82c   :  { %v5449_v32 = vpack.c.bf16 %v5439_v53, %v5438_v59 }
 0x82e   :  { %5553 = vmatmul.bf16.gmra.mxu2 %v5449_v32 }
 0x82f   :  { %v5418_v60 = vpop.f32.mrf.mxu1 }
 0x830   :  { %v5419_v6 = vadd.f32 %v8098_v2, %v5418_v60 }
 0x832   :  { %v5440_v41 = vmax.f32 %v5419_v6, 0.0 }
 0x837   :  { %v5420_v56 = vpop.f32.mrf.mxu1 }
 0x838   :  { %v5421_v33 = vadd.f32 %v8098_v2, %v5420_v56 }
 0x83a   :  { %v5441_v3 = vmax.f32 %v5421_v33, 0.0 }
 0x83c   :  { %v5450_v12 = vpack.c.bf16 %v5441_v3, %v5440_v41 }
 0x83e   :  { %5558 = vmatmul.bf16.gmra.mxu2 %v5450_v12 }
 0x83f   :  { %v5423_v55 = vpop.f32.mrf.mxu1 }
 0x840   :  { %v5424_v48 = vadd.f32 %v8098_v2, %v5423_v55 }
 0x842   :  { %v5442_v29 = vmax.f32 %v5424_v48, 0.0 }
 0x847   :  { %v5425_v31 = vpop.f32.mrf.mxu1 }
 0x848   :  { %v5426_v9 = vadd.f32 %v8098_v2, %v5425_v31 }
 0x84a   :  { %v5443_v4 = vmax.f32 %v5426_v9, 0.0 }
 0x84c   :  { %v5451_v42 = vpack.c.bf16 %v5443_v4, %v5442_v29 }
 0x84e   :  { %5563 = vmatmul.bf16.gmra.mxu2 %v5451_v42 }
 0x861   :  { %v5529_v62 = vpop.f32.mrf.mxu2 }
 0x862   :  { %v5530_v20 = vadd.f32 %v8099_v50, %v5529_v62 }
 0x864   :  { %5569 = vmax.xlane.f32.xlu0 %v5530_v20 }
 0x869   :  { %v5531_v14 = vpop.f32.mrf.mxu2 }
 0x86a   :  { %v5532_v40 = vadd.f32 %v8099_v50, %v5531_v14 }
 0x86c   :  { %5571 = vmax.xlane.f32.xlu0 %v5532_v40 }
 0x871   :  { %v5534_v7 = vpop.f32.mrf.mxu2 }
 0x872   :  { %v5535_v39 = vadd.f32 %v8099_v50, %v5534_v7 }
 0x874   :  { %5573 = vmax.xlane.f32.xlu1 %v5535_v39 }
 0x879   :  { %v5536_v26 = vpop.f32.mrf.mxu2 }
 0x87a   :  { %v5537_v5 = vadd.f32 %v8099_v50, %v5536_v26 }
 0x87c   :  { %5575 = vmax.xlane.f32.xlu1 %v5537_v5 }
 0x881   :  { %v5539_v2 = vpop.f32.mrf.mxu2 }
 0x882   :  { %v5540_v52 = vadd.f32 %v8099_v50, %v5539_v2 }
 0x884   :  { %5577 = vmax.xlane.f32.xlu2 %v5540_v52 }
 0x889   :  { %v5541_v16 = vpop.f32.mrf.mxu2 }
 0x88a   :  { %v5542_v10 = vadd.f32 %v8099_v50, %v5541_v16 }
 0x88c   :  { %5579 = vmax.xlane.f32.xlu2 %v5542_v10 }
 0x891   :  { %v5544_v28 = vpop.f32.mrf.mxu2 }
 0x892   :  { %v11614_v17 = vadd.f32 %v8099_v50, %v5544_v28 }
 0x894   :  { %5581 = vmax.xlane.f32.xlu0 %v11614_v17 }
 0x899   :  { %v5546_v37 = vpop.f32.mrf.mxu2 }
 0x89a   :  { %v11617_v19 = vadd.f32 %v8099_v50, %v5546_v37 }
 0x89c   :  { %5583 = vmax.xlane.f32.xlu1 %v11617_v19 }
 0x8a1   :  { %v5549_v24 = vpop.f32.mrf.mxu2 }
 0x8a2   :  { %v11620_v13 = vadd.f32 %v8099_v50, %v5549_v24 }
 0x8a4   :  { %5585 = vmax.xlane.f32.xlu2 %v11620_v13 }
 0x8a9   :  { %v5551_v36 = vpop.f32.mrf.mxu2 }
 0x8aa   :  { %v11623_v51 = vadd.f32 %v8099_v50, %v5551_v36 }
 0x8ac   :  { %5587 = vmax.xlane.f32.xlu0 %v11623_v51 }
 0x8b1   :  { %v5554_v27 = vpop.f32.mrf.mxu2 }
 0x8b2   :  { %v11626_v38 = vadd.f32 %v8099_v50, %v5554_v27 }
 0x8b4   :  { %5589 = vmax.xlane.f32.xlu1 %v11626_v38 }
 0x8b9   :  { %v5556_v54 = vpop.f32.mrf.mxu2 }
 0x8ba   :  { %v11629_v61 = vadd.f32 %v8099_v50, %v5556_v54 }
 0x8bc   :  { %5591 = vmax.xlane.f32.xlu2 %v11629_v61 }
 0x8c1   :  { %v5559_v8 = vpop.f32.mrf.mxu2 }
 0x8c2   :  { %v11632_v15 = vadd.f32 %v8099_v50, %v5559_v8 }
 0x8c4   :  { %5593 = vmax.xlane.f32.xlu0 %v11632_v15 }
 0x8c9   :  { %v5561_v25 = vpop.f32.mrf.mxu2 }
 0x8ca   :  { %v11635_v35 = vadd.f32 %v8099_v50, %v5561_v25 }
 0x8cc   :  { %5595 = vmax.xlane.f32.xlu1 %v11635_v35 }
 0x8d1   :  { %v5564_v47 = vpop.f32.mrf.mxu2 }
 0x8d2   :  { %v11638_v0 = vadd.f32 %v8099_v50, %v5564_v47 }
 0x8d4   :  { %5597 = vmax.xlane.f32.xlu2 %v11638_v0 }
 0x8d7   :  { %v5570_v11 = vpop.xlane.xlu0 %5569 }
 0x8d8   :  { %v11641_v18 = vsub.f32 %v5530_v20, %v5570_v11 }
 0x8d9   :  { %v5566_v21 = vpop.f32.mrf.mxu2 }
 0x8da   :  { %v5617_v44 = vmul.f32 1.442695, %v11641_v18  ;;  %v11644_v58 = vadd.f32 %v8099_v50, %v5566_v21 }
 0x8dc   :  { %8100 = vpow2.f32 %v5617_v44  ;;  %5599 = vmax.xlane.f32.xlu0 %v11644_v58 }
 0x8df   :  { %v5572_v46 = vpop.xlane.xlu0 %5571 }
 0x8e0   :  { %v11647_v49 = vsub.f32 %v5532_v40, %v5572_v46 }
 0x8e2   :  { %v8101_v57 = vpop.eup %8100  ;;  %v5619_v63 = vmul.f32 1.442695, %v11647_v49 }
 0x8e3   :  { %5649 = vadd.xlane.f32.xlu1 %v8101_v57 }
 0x8e4   :  { %8102 = vpow2.f32 %v5619_v63 }
 0x8e7   :  { %v5574_v23 = vpop.xlane.xlu1 %5573 }
 0x8e8   :  { %v11650_v45 = vsub.f32 %v5535_v39, %v5574_v23 }
 0x8ea   :  { %v8103_v43 = vpop.eup %8102  ;;  %v5621_v1 = vmul.f32 1.442695, %v11650_v45 }
 0x8eb   :  { %5651 = vadd.xlane.f32.xlu2 %v8103_v43 }
 0x8ec   :  { %8104 = vpow2.f32 %v5621_v1 }
 0x8ef   :  { %v5576_v30 = vpop.xlane.xlu1 %5575 }
 0x8f0   :  { %v11653_v22 = vsub.f32 %v5537_v5, %v5576_v30 }
 0x8f2   :  { %v8105_v34 = vpop.eup %8104  ;;  %v5623_v59 = vmul.f32 1.442695, %v11653_v22 }
 0x8f3   :  { %5653 = vadd.xlane.f32.xlu0 %v8105_v34 }
 0x8f4   :  { %8106 = vpow2.f32 %v5623_v59 }
 0x8f7   :  { %v5578_v53 = vpop.xlane.xlu2 %5577 }
 0x8f8   :  { %v11656_v32 = vsub.f32 %v5540_v52, %v5578_v53 }
 0x8fa   :  { %v8107_v60 = vpop.eup %8106  ;;  %v5625_v6 = vmul.f32 1.442695, %v11656_v32 }
 0x8fb   :  { %5655 = vadd.xlane.f32.xlu1 %v8107_v60 }
 0x8fc   :  { %8108 = vpow2.f32 %v5625_v6 }
 0x8ff   :  { %v5580_v56 = vpop.xlane.xlu2 %5579 }
 0x900   :  { %v11659_v33 = vsub.f32 %v5542_v10, %v5580_v56 }
 0x902   :  { %v8109_v41 = vpop.eup %8108  ;;  %v5627_v3 = vmul.f32 1.442695, %v11659_v33 }
 0x903   :  { %5657 = vadd.xlane.f32.xlu2 %v8109_v41 }
 0x904   :  { %8110 = vpow2.f32 %v5627_v3 }
 0x907   :  { %v5582_v12 = vpop.xlane.xlu0 %5581 }
 0x908   :  { %v11663_v55 = vsub.f32 %v11614_v17, %v5582_v12 }
 0x90a   :  { %v8111_v48 = vpop.eup %8110  ;;  %v5629_v31 = vmul.f32 1.442695, %v11663_v55 }
 0x90b   :  { %5659 = vadd.xlane.f32.xlu0 %v8111_v48 }
 0x90c   :  { %8112 = vpow2.f32 %v5629_v31 }
 0x90f   :  { %v5584_v9 = vpop.xlane.xlu1 %5583 }
 0x910   :  { %v11667_v29 = vsub.f32 %v11617_v19, %v5584_v9 }
 0x912   :  { %v8113_v4 = vpop.eup %8112  ;;  %v5631_v42 = vmul.f32 1.442695, %v11667_v29 }
 0x913   :  { %5661 = vadd.xlane.f32.xlu1 %v8113_v4 }
 0x914   :  { %8114 = vpow2.f32 %v5631_v42 }
 0x917   :  { %v5586_v50 = vpop.xlane.xlu2 %5585 }
 0x918   :  { %v11671_v62 = vsub.f32 %v11620_v13, %v5586_v50 }
 0x91a   :  { %v8115_v20 = vpop.eup %8114  ;;  %v5633_v14 = vmul.f32 1.442695, %v11671_v62 }
 0x91b   :  { %5663 = vadd.xlane.f32.xlu2 %v8115_v20 }
 0x91c   :  { %8116 = vpow2.f32 %v5633_v14 }
 0x91f   :  { %v5588_v40 = vpop.xlane.xlu0 %5587 }
 0x920   :  { %v11675_v7 = vsub.f32 %v11623_v51, %v5588_v40 }
 0x922   :  { %v8117_v39 = vpop.eup %8116  ;;  %v5635_v26 = vmul.f32 1.442695, %v11675_v7 }
 0x923   :  { %5665 = vadd.xlane.f32.xlu0 %v8117_v39 }
 0x924   :  { %8118 = vpow2.f32 %v5635_v26 }
 0x927   :  { %v5590_v5 = vpop.xlane.xlu1 %5589 }
 0x928   :  { %v11679_v2 = vsub.f32 %v11626_v38, %v5590_v5 }
 0x92a   :  { %v8119_v52 = vpop.eup %8118  ;;  %v5637_v16 = vmul.f32 1.442695, %v11679_v2 }
 0x92b   :  { %5667 = vadd.xlane.f32.xlu1 %v8119_v52 }
 0x92c   :  { %8120 = vpow2.f32 %v5637_v16 }
 0x92f   :  { %v5592_v10 = vpop.xlane.xlu2 %5591 }
 0x930   :  { %v11683_v28 = vsub.f32 %v11629_v61, %v5592_v10 }
 0x932   :  { %v8121_v17 = vpop.eup %8120  ;;  %v5639_v37 = vmul.f32 1.442695, %v11683_v28 }
 0x933   :  { %5669 = vadd.xlane.f32.xlu2 %v8121_v17 }
 0x934   :  { %8122 = vpow2.f32 %v5639_v37 }
 0x937   :  { %v5594_v19 = vpop.xlane.xlu0 %5593 }
 0x938   :  { %v11687_v24 = vsub.f32 %v11632_v15, %v5594_v19 }
 0x93a   :  { %v8123_v13 = vpop.eup %8122  ;;  %v5641_v36 = vmul.f32 1.442695, %v11687_v24 }
 0x93b   :  { %5671 = vadd.xlane.f32.xlu0 %v8123_v13 }
 0x93c   :  { %8124 = vpow2.f32 %v5641_v36 }
 0x93f   :  { %v5596_v51 = vpop.xlane.xlu1 %5595 }
 0x940   :  { %v11691_v27 = vsub.f32 %v11635_v35, %v5596_v51 }
 0x942   :  { %v8125_v38 = vpop.eup %8124  ;;  %v5643_v54 = vmul.f32 1.442695, %v11691_v27 }
 0x943   :  { %5673 = vadd.xlane.f32.xlu1 %v8125_v38 }
 0x944   :  { %8126 = vpow2.f32 %v5643_v54 }
 0x947   :  { %v5598_v61 = vpop.xlane.xlu2 %5597 }
 0x948   :  { %v11695_v8 = vsub.f32 %v11638_v0, %v5598_v61 }
 0x94a   :  { %v8127_v15 = vpop.eup %8126  ;;  %v5645_v25 = vmul.f32 1.442695, %v11695_v8 }
 0x94b   :  { %5675 = vadd.xlane.f32.xlu2 %v8127_v15 }
 0x94c   :  { %8128 = vpow2.f32 %v5645_v25 }
 0x94f   :  { %v5600_v47 = vpop.xlane.xlu0 %5599 }
 0x950   :  { %v11699_v11 = vsub.f32 %v11644_v58, %v5600_v47 }
 0x952   :  { %v8129_v35 = vpop.eup %8128  ;;  %v5647_v21 = vmul.f32 1.442695, %v11699_v11 }
 0x953   :  { %5677 = vadd.xlane.f32.xlu0 %v8129_v35 }
 0x954   :  { %8130 = vpow2.f32 %v5647_v21 }
 0x956   :  { %v5650_v44 = vpop.xlane.xlu1 %5649 }
 0x957   :  { %8132 = vlog2.f32 %v5650_v44 }
 0x95a   :  { %v8131_v46 = vpop.eup %8130 }
 0x95b   :  { %5679 = vadd.xlane.f32.xlu1 %v8131_v46 }
 0x95d   :  { %v8133_v0 = vpop.eup %8132 }
 0x95e   :  { %v5682_v57 = vmul.f32 0.6931472, %v8133_v0  ;;  %v5652_v63 = vpop.xlane.xlu2 %5651 }
 0x95f   :  { %8134 = vlog2.f32 %v5652_v63 }
 0x960   :  { %v5713_v23 = vsub.f32 %v11641_v18, %v5682_v57 }
 0x962   :  { %5729 = vst [vmem:[%s11777_s11] sm:$0xff] %v5713_v23 }
 0x965   :  { %v8135_v58 = vpop.eup %8134 }
 0x966   :  { %v5684_v43 = vmul.f32 0.6931472, %v8135_v58  ;;  %v5654_v1 = vpop.xlane.xlu0 %5653 }
 0x967   :  { %8136 = vlog2.f32 %v5654_v1 }
 0x968   :  { %v5714_v30 = vsub.f32 %v11647_v49, %v5684_v43 }
 0x96a   :  { %5730 = vst [vmem:[%s11777_s11 + $0x8] sm:$0xff] %v5714_v30 }
 0x96d   :  { %v8137_v34 = vpop.eup %8136 }
 0x96e   :  { %v5686_v59 = vmul.f32 0.6931472, %v8137_v34  ;;  %v5656_v53 = vpop.xlane.xlu1 %5655 }
 0x96f   :  { %8138 = vlog2.f32 %v5656_v53 }
 0x970   :  { %v5715_v18 = vsub.f32 %v11650_v45, %v5686_v59 }
 0x972   :  { %5731 = vst [vmem:[%s11777_s11 + $0x10] sm:$0xff] %v5715_v18 }
 0x975   :  { %v8139_v60 = vpop.eup %8138 }
 0x976   :  { %v5688_v6 = vmul.f32 0.6931472, %v8139_v60  ;;  %v5658_v56 = vpop.xlane.xlu2 %5657 }
 0x977   :  { %8140 = vlog2.f32 %v5658_v56 }
 0x978   :  { %v5716_v49 = vsub.f32 %v11653_v22, %v5688_v6 }
 0x97a   :  { %5732 = vst [vmem:[%s11777_s11 + $0x18] sm:$0xff] %v5716_v49 }
 0x97d   :  { %v8141_v41 = vpop.eup %8140 }
 0x97e   :  { %v5690_v3 = vmul.f32 0.6931472, %v8141_v41  ;;  %v5660_v12 = vpop.xlane.xlu0 %5659 }
 0x97f   :  { %8142 = vlog2.f32 %v5660_v12 }
 0x980   :  { %v5717_v45 = vsub.f32 %v11656_v32, %v5690_v3 }
 0x982   :  { %5733 = vst [vmem:[%s11777_s11 + $0x20] sm:$0xff] %v5717_v45 }
 0x985   :  { %v8143_v48 = vpop.eup %8142 }
 0x986   :  { %v5692_v31 = vmul.f32 0.6931472, %v8143_v48  ;;  %v5662_v9 = vpop.xlane.xlu1 %5661 }
 0x987   :  { %8144 = vlog2.f32 %v5662_v9 }
 0x988   :  { %v5718_v22 = vsub.f32 %v11659_v33, %v5692_v31 }
 0x98a   :  { %5734 = vst [vmem:[%s11777_s11 + $0x28] sm:$0xff] %v5718_v22 }
 0x98d   :  { %v8145_v4 = vpop.eup %8144 }
 0x98e   :  { %v5694_v42 = vmul.f32 0.6931472, %v8145_v4  ;;  %v5664_v50 = vpop.xlane.xlu2 %5663 }
 0x98f   :  { %8146 = vlog2.f32 %v5664_v50 }
 0x990   :  { %v5719_v32 = vsub.f32 %v11663_v55, %v5694_v42 }
 0x992   :  { %5735 = vst [vmem:[%s11777_s11 + $0x30] sm:$0xff] %v5719_v32 }
 0x995   :  { %v8147_v20 = vpop.eup %8146 }
 0x996   :  { %v5696_v14 = vmul.f32 0.6931472, %v8147_v20  ;;  %v5666_v40 = vpop.xlane.xlu0 %5665 }
 0x997   :  { %8148 = vlog2.f32 %v5666_v40 }
 0x998   :  { %v5720_v33 = vsub.f32 %v11667_v29, %v5696_v14 }
 0x99a   :  { %5736 = vst [vmem:[%s11777_s11 + $0x38] sm:$0xff] %v5720_v33 }
 0x99d   :  { %v8149_v39 = vpop.eup %8148 }
 0x99e   :  { %v5698_v26 = vmul.f32 0.6931472, %v8149_v39  ;;  %v5668_v5 = vpop.xlane.xlu1 %5667 }
 0x99f   :  { %8150 = vlog2.f32 %v5668_v5 }
 0x9a0   :  { %v5721_v55 = vsub.f32 %v11671_v62, %v5698_v26 }
 0x9a2   :  { %5737 = vst [vmem:[%s11777_s11 + $0x40] sm:$0xff] %v5721_v55 }
 0x9a5   :  { %v8151_v52 = vpop.eup %8150 }
 0x9a6   :  { %v5700_v16 = vmul.f32 0.6931472, %v8151_v52  ;;  %v5670_v10 = vpop.xlane.xlu2 %5669 }
 0x9a7   :  { %8152 = vlog2.f32 %v5670_v10 }
 0x9a8   :  { %v5722_v29 = vsub.f32 %v11675_v7, %v5700_v16 }
 0x9aa   :  { %5738 = vst [vmem:[%s11777_s11 + $0x48] sm:$0xff] %v5722_v29 }
 0x9ad   :  { %v8153_v17 = vpop.eup %8152 }
 0x9ae   :  { %v5702_v37 = vmul.f32 0.6931472, %v8153_v17  ;;  %v5672_v19 = vpop.xlane.xlu0 %5671 }
 0x9af   :  { %8154 = vlog2.f32 %v5672_v19 }
 0x9b0   :  { %v5723_v62 = vsub.f32 %v11679_v2, %v5702_v37 }
 0x9b2   :  { %5739 = vst [vmem:[%s11777_s11 + $0x50] sm:$0xff] %v5723_v62 }
 0x9b5   :  { %v8155_v13 = vpop.eup %8154 }
 0x9b6   :  { %v5704_v36 = vmul.f32 0.6931472, %v8155_v13  ;;  %v5674_v51 = vpop.xlane.xlu1 %5673 }
 0x9b7   :  { %8156 = vlog2.f32 %v5674_v51 }
 0x9b8   :  { %v5724_v7 = vsub.f32 %v11683_v28, %v5704_v36 }
 0x9ba   :  { %5740 = vst [vmem:[%s11777_s11 + $0x58] sm:$0xff] %v5724_v7 }
 0x9bd   :  { %v8157_v38 = vpop.eup %8156 }
 0x9be   :  { %v5706_v54 = vmul.f32 0.6931472, %v8157_v38  ;;  %v5676_v61 = vpop.xlane.xlu2 %5675 }
 0x9bf   :  { %8158 = vlog2.f32 %v5676_v61 }
 0x9c0   :  { %v5725_v2 = vsub.f32 %v11687_v24, %v5706_v54 }
 0x9c2   :  { %5741 = vst [vmem:[%s11777_s11 + $0x60] sm:$0xff] %v5725_v2 }
 0x9c5   :  { %v8159_v15 = vpop.eup %8158 }
 0x9c6   :  { %v5708_v25 = vmul.f32 0.6931472, %v8159_v15  ;;  %v5678_v47 = vpop.xlane.xlu0 %5677 }
 0x9c7   :  { %8160 = vlog2.f32 %v5678_v47 }
 0x9c8   :  { %v5726_v28 = vsub.f32 %v11691_v27, %v5708_v25 }
 0x9ca   :  { %5742 = vst [vmem:[%s11777_s11 + $0x68] sm:$0xff] %v5726_v28 }
 0x9cd   :  { %v8161_v35 = vpop.eup %8160 }
 0x9ce   :  { %v5710_v21 = vmul.f32 0.6931472, %v8161_v35  ;;  %v5680_v44 = vpop.xlane.xlu1 %5679 }
 0x9cf   :  { %8162 = vlog2.f32 %v5680_v44 }
 0x9d0   :  { %v5727_v24 = vsub.f32 %v11695_v8, %v5710_v21 }
 0x9d2   :  { %5743 = vst [vmem:[%s11777_s11 + $0x70] sm:$0xff] %v5727_v24 }
 0x9d5   :  { %v8163_v46 = vpop.eup %8162 }
 0x9d6   :  { %v5712_v0 = vmul.f32 0.6931472, %v8163_v46 }
 0x9d8   :  { %v5728_v57 = vsub.f32 %v11699_v11, %v5712_v0 }
 0x9da   :  { %5744 = vst [vmem:[%s11777_s11 + $0x78] sm:$0xff] %v5728_v57 }

</bundles_post_ra>
